<compile_context>
chip_gen: v5e
topology: v5e:2x2
jax: 0.10.0
libtpu: 0.0.40
codegen_flags: <defaults>
</compile_context>

<pallas_src>
import functools

import jax
import jax.numpy as jnp
from jax.experimental import pallas as pl
from jax.experimental.pallas import tpu as pltpu

PRIMITIVES = ("none", "skip_connect", "conv_1x1", "conv_3x3",
              "avg_pool_3x3", "max_pool_3x3")


def _mixed_op_kernel(wmax_ref, p_ref, w_ref, b_ref, inv_ref, out_ref, *, Cp):
    # p_ref  : (TM, 9*Cp)  im2col patch rows (tap k in columns [k*Cp:(k+1)*Cp])
    # w_ref  : (9*Cp, Cp)  fused weight: w_c3*conv3x3 taps, center tap also
    #                      carries w_c1*conv1x1 + w_skip*I
    # b_ref  : (TM, 9)     max-pool border bias (0 for valid tap, -1e30 else)
    # inv_ref: (TM, 1)     w_avg / pool-count per output position
    # wmax_ref: (1,) SMEM  mixture weight for max_pool

    # --- skip + conv_1x1 + conv_3x3 : one fused MXU matmul ------------------
    acc = jnp.dot(p_ref[...], w_ref[...], preferred_element_type=jnp.float32)

    # --- avg_pool / max_pool over the 9 lane-aligned taps -------------------
    b = b_ref[...]                                  # (TM, 9)
    s = None
    m = None
    for k in range(9):
        tap = p_ref[:, k * Cp:(k + 1) * Cp]         # (TM, Cp), lane-aligned slice
        s = tap if s is None else s + tap
        mk = tap + b[:, k:k + 1]                    # -1e30 on padded-border taps
        m = mk if m is None else jnp.maximum(m, mk)

    acc = acc + s * inv_ref[...]                    # w_avg already folded in
    acc = acc + wmax_ref[0] * m
    out_ref[...] = acc.astype(out_ref.dtype)


def mixed_op(x_nchw, mix_weights, w1_io, w3_kio):
    """x_nchw: (N, C, H, W) f32.  mix_weights: (6,) f32 (softmax over PRIMITIVES).
    w1_io: (C, C) = (Cin, Cout).  w3_kio: (9, C, C) = (dy*3+dx, Cin, Cout)."""
    N, C, H, W = x_nchw.shape
    LANE = 128
    Cp = ((C + LANE - 1) // LANE) * LANE            # lane-dense channel pad
    rows = N * H * W

    w_skip = mix_weights[1]
    w_c1 = mix_weights[2]
    w_c3 = mix_weights[3]
    w_avg = mix_weights[4]
    w_max = mix_weights[5]
    # 'none' (mix_weights[0]) contributes exactly zero -> dropped.

    # --- layout: NCHW -> NHWC, pad channels, zero spatial pad, im2col -------
    x = jnp.transpose(x_nchw, (0, 2, 3, 1)).astype(jnp.float32)      # NHWC
    x = jnp.pad(x, ((0, 0), (0, 0), (0, 0), (0, Cp - C)))
    xpad = jnp.pad(x, ((0, 0), (1, 1), (1, 1), (0, 0)))              # zeros

    taps = [xpad[:, dy:dy + H, dx:dx + W, :]
            for dy in range(3) for dx in range(3)]
    patches = jnp.concatenate(taps, axis=-1).reshape(rows, 9 * Cp)   # (rows, 9*Cp)

    # --- fused weight: fold mixture weights for skip / conv1x1 / conv3x3 ----
    w1 = jnp.zeros((Cp, Cp), jnp.float32).at[:C, :C].set(w1_io)
    w3 = jnp.zeros((9, Cp, Cp), jnp.float32).at[:, :C, :C].set(w3_kio)
    wf = w_c3 * w3
    wf = wf.at[4].add(w_c1 * w1 + w_skip * jnp.eye(Cp, dtype=jnp.float32))
    wf = wf.reshape(9 * Cp, Cp)

    # --- grid-invariant per-position constants (hoisted out of kernel) ------
    ii = jnp.arange(H)
    jj = jnp.arange(W)
    rcnt = 3.0 - (ii == 0).astype(jnp.float32) - (ii == H - 1).astype(jnp.float32)
    ccnt = 3.0 - (jj == 0).astype(jnp.float32) - (jj == W - 1).astype(jnp.float32)
    inv = w_avg / (rcnt[:, None] * ccnt[None, :])                    # (H, W)
    inv = jnp.broadcast_to(inv[None], (N, H, W)).reshape(rows, 1)

    NEG = jnp.float32(-1e30)
    btaps = []
    for dy in range(3):
        for dx in range(3):
            vi = (ii + dy - 1 >= 0) & (ii + dy - 1 <= H - 1)
            vj = (jj + dx - 1 >= 0) & (jj + dx - 1 <= W - 1)
            valid = vi[:, None] & vj[None, :]                        # (H, W)
            btaps.append(jnp.where(valid, jnp.float32(0.0), NEG))
    bias = jnp.stack(btaps, axis=-1)                                 # (H, W, 9)
    bias = jnp.broadcast_to(bias[None], (N, H, W, 9)).reshape(rows, 9)
    bias = bias.astype(jnp.float32)

    # --- row-tile grid -------------------------------------------------------
    TM = None
    for cand in (128, 64, 32, 16, 8):
        if rows % cand == 0:
            TM = cand
            break
    if TM is None:
        TM = rows

    kernel = functools.partial(_mixed_op_kernel, Cp=Cp)
    out = pl.pallas_call(
        kernel,
        out_shape=jax.ShapeDtypeStruct((rows, Cp), jnp.float32),
        grid=(rows // TM,),
        in_specs=[
            pl.BlockSpec(memory_space=pltpu.SMEM),                   # w_max scalar
            pl.BlockSpec((TM, 9 * Cp), lambda r: (r, 0)),            # patches
            pl.BlockSpec((9 * Cp, Cp), lambda r: (0, 0)),            # fused weight
            pl.BlockSpec((TM, 9), lambda r: (r, 0)),                 # max-pool bias
            pl.BlockSpec((TM, 1), lambda r: (r, 0)),                 # avg-pool scale
        ],
        out_specs=pl.BlockSpec((TM, Cp), lambda r: (r, 0)),
        compiler_params=pltpu.CompilerParams(
            dimension_semantics=("parallel",)),
    )(w_max.reshape(1), patches, wf, bias, inv)

    out = out[:, :C].reshape(N, H, W, C)
    return jnp.transpose(out, (0, 3, 1, 2))                          # back to NCHW


def _reference(x_nchw, mix_weights, w1_io, w3_kio):
    """Pure-JAX reference (same math, XLA ops) for a sanity check."""
    N, C, H, W = x_nchw.shape
    x = jnp.transpose(x_nchw, (0, 2, 3, 1)).astype(jnp.float32)
    xp = jnp.pad(x, ((0, 0), (1, 1), (1, 1), (0, 0)))

    out = mix_weights[1] * x                                          # skip
    out = out + mix_weights[2] * jnp.einsum("nhwc,cd->nhwd", x, w1_io)
    c3 = jnp.zeros_like(x)
    for dy in range(3):
        for dx in range(3):
            c3 = c3 + jnp.einsum("nhwc,cd->nhwd",
                                 xp[:, dy:dy + H, dx:dx + W, :],
                                 w3_kio[dy * 3 + dx])
    out = out + mix_weights[3] * c3

    ii = jnp.arange(H)[:, None, None]
    jj = jnp.arange(W)[None, :, None]
    s = jnp.zeros_like(x)
    m = jnp.full_like(x, -jnp.inf)
    for dy in (-1, 0, 1):
        for dx in (-1, 0, 1):
            sh = xp[:, 1 + dy:1 + dy + H, 1 + dx:1 + dx + W, :]
            s = s + sh
            valid = ((ii + dy >= 0) & (ii + dy <= H - 1) &
                     (jj + dx >= 0) & (jj + dx <= W - 1))
            m = jnp.maximum(m, jnp.where(valid[None], sh, -jnp.inf))
    rcnt = 3.0 - (ii == 0) - (ii == H - 1)
    ccnt = 3.0 - (jj == 0) - (jj == W - 1)
    out = out + mix_weights[4] * (s / (rcnt * ccnt))
    out = out + mix_weights[5] * m
    return jnp.transpose(out, (0, 3, 1, 2))


if __name__ == "__main__":
    N, C, H, W = 2, 4, 16, 16
    key = jax.random.PRNGKey(0)
    kx, ka, k1, k3 = jax.random.split(key, 4)

    x = jax.random.normal(kx, (N, C, H, W), jnp.float32)
    # architecture weights: softmax over the 6 primitives
    alphas = jax.random.normal(ka, (len(PRIMITIVES),), jnp.float32)
    mix_w = jax.nn.softmax(alphas)

    # deterministic conv parameters (PyTorch layout -> kernel layout)
    w1_torch = 0.1 * jax.random.normal(k1, (C, C, 1, 1), jnp.float32)   # (Co,Ci,1,1)
    w3_torch = 0.1 * jax.random.normal(k3, (C, C, 3, 3), jnp.float32)   # (Co,Ci,3,3)
    w1_io = jnp.transpose(w1_torch[:, :, 0, 0], (1, 0))                 # (Ci, Co)
    w3_kio = jnp.transpose(w3_torch, (2, 3, 1, 0)).reshape(9, C, C)     # (kh*kw, Ci, Co)

    mixed_op_jit = jax.jit(mixed_op)
    out = mixed_op_jit(x, mix_w, w1_io, w3_kio)
    out = jax.block_until_ready(out)

    ref = jax.block_until_ready(_reference(x, mix_w, w1_io, w3_kio))
    assert out.shape == (N, C, H, W)
    assert jnp.allclose(out, ref, rtol=2e-2, atol=2e-2)

    print("KERNEL_OK")
</pallas_src>

<mosaic_0001>
module attributes {stable_mosaic.version = 11 : i64} {
  func.func @_mixed_op_kernel(%arg0: i32, %arg1: memref<1xf32, #tpu.memory_space<smem>>, %arg2: memref<128x1152xf32, #tpu.memory_space<vmem>>, %arg3: memref<1152x128xf32, #tpu.memory_space<vmem>>, %arg4: memref<128x9xf32, #tpu.memory_space<vmem>>, %arg5: memref<128x1xf32, #tpu.memory_space<vmem>>, %arg6: memref<128x128xf32, #tpu.memory_space<vmem>>) attributes {dimension_semantics = [#tpu.dimension_semantics<parallel>], iteration_bounds = array<i64: 4>, scalar_prefetch = 0 : i64, scratch_operands = 0 : i64, tpu.core_type = #tpu.core_type<tc>, window_params = [{transform_indices = @transform_0, window_bounds = array<i64: 1>}, {transform_indices = @transform_1, window_bounds = array<i64: 128, 1152>}, {pipeline_mode = #tpu.pipeline_mode<synchronous>, transform_indices = @transform_2, window_bounds = array<i64: 1152, 128>}, {transform_indices = @transform_3, window_bounds = array<i64: 128, 9>}, {transform_indices = @transform_4, window_bounds = array<i64: 128, 1>}, {transform_indices = @transform_5, window_bounds = array<i64: 128, 128>}]} {
    %c0 = arith.constant 0 : index
    %c0_0 = arith.constant 0 : index
    %0 = vector.load %arg2[%c0, %c0_0] : memref<128x1152xf32, #tpu.memory_space<vmem>>, vector<128x1152xf32>
    %c0_1 = arith.constant 0 : index
    %c0_2 = arith.constant 0 : index
    %1 = vector.load %arg3[%c0_1, %c0_2] : memref<1152x128xf32, #tpu.memory_space<vmem>>, vector<1152x128xf32>
    %cst = arith.constant dense<0.000000e+00> : vector<128x128xf32>
    %2 = tpu.matmul %0, %1, %cst {dimension_numbers = #tpu.dot_dimension_numbers<[1], [0], [0], [1], [0, 0, 1, 1], [], []>} : vector<128x1152xf32>, vector<1152x128xf32>, vector<128x128xf32> -> vector<128x128xf32>
    %c0_3 = arith.constant 0 : index
    %c0_4 = arith.constant 0 : index
    %3 = vector.load %arg4[%c0_3, %c0_4] : memref<128x9xf32, #tpu.memory_space<vmem>>, vector<128x9xf32>
    %c0_5 = arith.constant 0 : index
    %c0_6 = arith.constant 0 : index
    %4 = vector.load %arg2[%c0_5, %c0_6] : memref<128x1152xf32, #tpu.memory_space<vmem>>, vector<128x128xf32>
    %5 = vector.extract_strided_slice %3 {offsets = [0, 0], sizes = [128, 1], strides = [1, 1]} : vector<128x9xf32> to vector<128x1xf32>
    %6 = vector.broadcast %5 : vector<128x1xf32> to vector<128x128xf32>
    %7 = arith.addf %4, %6 : vector<128x128xf32>
    %c0_7 = arith.constant 0 : index
    %c128 = arith.constant 128 : index
    %8 = vector.load %arg2[%c0_7, %c128] : memref<128x1152xf32, #tpu.memory_space<vmem>>, vector<128x128xf32>
    %9 = arith.addf %4, %8 : vector<128x128xf32>
    %10 = vector.extract_strided_slice %3 {offsets = [0, 1], sizes = [128, 1], strides = [1, 1]} : vector<128x9xf32> to vector<128x1xf32>
    %11 = vector.broadcast %10 : vector<128x1xf32> to vector<128x128xf32>
    %12 = arith.addf %8, %11 : vector<128x128xf32>
    %13 = arith.maximumf %7, %12 : vector<128x128xf32>
    %c0_8 = arith.constant 0 : index
    %c256 = arith.constant 256 : index
    %14 = vector.load %arg2[%c0_8, %c256] : memref<128x1152xf32, #tpu.memory_space<vmem>>, vector<128x128xf32>
    %15 = arith.addf %9, %14 : vector<128x128xf32>
    %16 = vector.extract_strided_slice %3 {offsets = [0, 2], sizes = [128, 1], strides = [1, 1]} : vector<128x9xf32> to vector<128x1xf32>
    %17 = vector.broadcast %16 : vector<128x1xf32> to vector<128x128xf32>
    %18 = arith.addf %14, %17 : vector<128x128xf32>
    %19 = arith.maximumf %13, %18 : vector<128x128xf32>
    %c0_9 = arith.constant 0 : index
    %c384 = arith.constant 384 : index
    %20 = vector.load %arg2[%c0_9, %c384] : memref<128x1152xf32, #tpu.memory_space<vmem>>, vector<128x128xf32>
    %21 = arith.addf %15, %20 : vector<128x128xf32>
    %22 = vector.extract_strided_slice %3 {offsets = [0, 3], sizes = [128, 1], strides = [1, 1]} : vector<128x9xf32> to vector<128x1xf32>
    %23 = vector.broadcast %22 : vector<128x1xf32> to vector<128x128xf32>
    %24 = arith.addf %20, %23 : vector<128x128xf32>
    %25 = arith.maximumf %19, %24 : vector<128x128xf32>
    %c0_10 = arith.constant 0 : index
    %c512 = arith.constant 512 : index
    %26 = vector.load %arg2[%c0_10, %c512] : memref<128x1152xf32, #tpu.memory_space<vmem>>, vector<128x128xf32>
    %27 = arith.addf %21, %26 : vector<128x128xf32>
    %28 = vector.extract_strided_slice %3 {offsets = [0, 4], sizes = [128, 1], strides = [1, 1]} : vector<128x9xf32> to vector<128x1xf32>
    %29 = vector.broadcast %28 : vector<128x1xf32> to vector<128x128xf32>
    %30 = arith.addf %26, %29 : vector<128x128xf32>
    %31 = arith.maximumf %25, %30 : vector<128x128xf32>
    %c0_11 = arith.constant 0 : index
    %c640 = arith.constant 640 : index
    %32 = vector.load %arg2[%c0_11, %c640] : memref<128x1152xf32, #tpu.memory_space<vmem>>, vector<128x128xf32>
    %33 = arith.addf %27, %32 : vector<128x128xf32>
    %34 = vector.extract_strided_slice %3 {offsets = [0, 5], sizes = [128, 1], strides = [1, 1]} : vector<128x9xf32> to vector<128x1xf32>
    %35 = vector.broadcast %34 : vector<128x1xf32> to vector<128x128xf32>
    %36 = arith.addf %32, %35 : vector<128x128xf32>
    %37 = arith.maximumf %31, %36 : vector<128x128xf32>
    %c0_12 = arith.constant 0 : index
    %c768 = arith.constant 768 : index
    %38 = vector.load %arg2[%c0_12, %c768] : memref<128x1152xf32, #tpu.memory_space<vmem>>, vector<128x128xf32>
    %39 = arith.addf %33, %38 : vector<128x128xf32>
    %40 = vector.extract_strided_slice %3 {offsets = [0, 6], sizes = [128, 1], strides = [1, 1]} : vector<128x9xf32> to vector<128x1xf32>
    %41 = vector.broadcast %40 : vector<128x1xf32> to vector<128x128xf32>
    %42 = arith.addf %38, %41 : vector<128x128xf32>
    %43 = arith.maximumf %37, %42 : vector<128x128xf32>
    %c0_13 = arith.constant 0 : index
    %c896 = arith.constant 896 : index
    %44 = vector.load %arg2[%c0_13, %c896] : memref<128x1152xf32, #tpu.memory_space<vmem>>, vector<128x128xf32>
    %45 = arith.addf %39, %44 : vector<128x128xf32>
    %46 = vector.extract_strided_slice %3 {offsets = [0, 7], sizes = [128, 1], strides = [1, 1]} : vector<128x9xf32> to vector<128x1xf32>
    %47 = vector.broadcast %46 : vector<128x1xf32> to vector<128x128xf32>
    %48 = arith.addf %44, %47 : vector<128x128xf32>
    %49 = arith.maximumf %43, %48 : vector<128x128xf32>
    %c0_14 = arith.constant 0 : index
    %c1024 = arith.constant 1024 : index
    %50 = vector.load %arg2[%c0_14, %c1024] : memref<128x1152xf32, #tpu.memory_space<vmem>>, vector<128x128xf32>
    %51 = arith.addf %45, %50 : vector<128x128xf32>
    %52 = vector.extract_strided_slice %3 {offsets = [0, 8], sizes = [128, 1], strides = [1, 1]} : vector<128x9xf32> to vector<128x1xf32>
    %53 = vector.broadcast %52 : vector<128x1xf32> to vector<128x128xf32>
    %54 = arith.addf %50, %53 : vector<128x128xf32>
    %55 = arith.maximumf %49, %54 : vector<128x128xf32>
    %c0_15 = arith.constant 0 : index
    %c0_16 = arith.constant 0 : index
    %56 = vector.load %arg5[%c0_15, %c0_16] : memref<128x1xf32, #tpu.memory_space<vmem>>, vector<128x1xf32>
    %57 = vector.broadcast %56 : vector<128x1xf32> to vector<128x128xf32>
    %58 = arith.mulf %51, %57 : vector<128x128xf32>
    %59 = arith.addf %2, %58 : vector<128x128xf32>
    %c0_17 = arith.constant 0 : index
    %60 = memref.load %arg1[%c0_17] : memref<1xf32, #tpu.memory_space<smem>>
    %61 = vector.broadcast %60 : f32 to vector<128x128xf32>
    %62 = arith.mulf %61, %55 : vector<128x128xf32>
    %63 = arith.addf %59, %62 : vector<128x128xf32>
    %c0_18 = arith.constant 0 : index
    %c0_19 = arith.constant 0 : index
    %64 = vector.load %arg6[%c0_18, %c0_19] : memref<128x128xf32, #tpu.memory_space<vmem>>, vector<128x128xf32>
    tpu.vector_store %arg6[%c0_18, %c0_19], %63 {strides = array<i32>} : memref<128x128xf32, #tpu.memory_space<vmem>>, vector<128x128xf32>,
    return
  }
  func.func @transform_0(%arg0: i32) -> i32 {
    %c0_i32 = arith.constant 0 : i32
    %c0_i32_0 = arith.constant 0 : i32
    return %c0_i32 : i32
  }
  func.func @transform_1(%arg0: i32) -> (i32, i32) {
    %c0_i32 = arith.constant 0 : i32
    %c0_i32_0 = arith.constant 0 : i32
    return %arg0, %c0_i32 : i32, i32
  }
  func.func @transform_2(%arg0: i32) -> (i32, i32) {
    %c0_i32 = arith.constant 0 : i32
    %c0_i32_0 = arith.constant 0 : i32
    %c0_i32_1 = arith.constant 0 : i32
    return %c0_i32, %c0_i32_0 : i32, i32
  }
  func.func @transform_3(%arg0: i32) -> (i32, i32) {
    %c0_i32 = arith.constant 0 : i32
    %c0_i32_0 = arith.constant 0 : i32
    return %arg0, %c0_i32 : i32, i32
  }
  func.func @transform_4(%arg0: i32) -> (i32, i32) {
    %c0_i32 = arith.constant 0 : i32
    %c0_i32_0 = arith.constant 0 : i32
    return %arg0, %c0_i32 : i32, i32
  }
  func.func @transform_5(%arg0: i32) -> (i32, i32) {
    %c0_i32 = arith.constant 0 : i32
    %c0_i32_0 = arith.constant 0 : i32
    return %arg0, %c0_i32 : i32, i32
  }
}

</mosaic_0001>

<bundles_post_ra>
// kernel: mixed_op.1
= control target key start
LH: loop header
LB: loop body
LE: loop exit
PB: predicated region body
PF: predicated region fallthrough
CT: control target
= control target key end

     0   :  { %s2775_s20 = smov 0   ;;  %s5357_s0 = inlined_call_operand.<no memory space> [shape: f32[1], index: 0, kind: input, shape index: {}]   ;;  %s5358_s1 = inlined_call_operand.vmem [shape: f32[512,1152], index: 1, kind: input, shape index: {}]   ;;  %s5359_s2 = inlined_call_operand.vmem [shape: f32[1152,128], index: 2, kind: input, shape index: {}]   ;;  %s5360_s3 = inlined_call_operand.vmem [shape: f32[512,9], index: 3, kind: input, shape index: {}]   ;;  %s5361_s4 = inlined_call_operand.vmem [shape: f32[512,1], index: 4, kind: input, shape index: {}]   ;;  %s5362_s5 = inlined_call_operand.vmem [shape: f32[512,128], index: 5, kind: output, shape index: {}]  }
   0x1   :  { %10 = sst [smem:[#allocation2]] %s5357_s0 }
   0x2 LB: > { %s2527_s21 = sadd.s32 4294967295, %s2731_s20   ;;  %p2531_p0 = scmp.ge.s32.totalorder %s2731_s20, 1  ;;  %s2731_s20 = sphi %s2775_s20, %s16_s20  }
   0x3   : > { %p212_p1 = scmp.lt.s32.totalorder %s2731_s20, 5 }
   0x5   : > { %p213_p2 = pnand %p2531_p0, %p212_p1 }
   0x7   : > { %216 = sbr.rel (%p213_p2) target bundleno = 607 (0x25f), region = 40 }
   0xc   : > { %s2532_s22 = sshll.u32 %s2527_s21, 4  ;;  %v2733_v0 = vmov 1   ;;  %v5363_v1 = vmov 0   ;;  %v2735_v13 = vmov 2   ;;  %v435_v14 = vld [vmem:[%s5359_s2 + $0x78] sm:$0xff]  ;;  %v434_v15 = vld [vmem:[%s5359_s2 + $0x70] sm:$0xff] }
   0xd   : > { %2612 = vset.pattern.permute.xlu0 %v2733_v0  ;;  %2609 = vset.pattern.permute.xlu2 %v5363_v1  ;;  %p252_p3 = scmp.lt.s32.totalorder %s2532_s22, 63  ;;  %v433_v17 = vld [vmem:[%s5359_s2 + $0x68] sm:$0xff]  ;;  %v432_v18 = vld [vmem:[%s5359_s2 + $0x60] sm:$0xff]  ;;  %v431_v19 = vld [vmem:[%s5359_s2 + $0x58] sm:$0xff]  ;;  %v2736_v36 = vmov 3  }
   0xe   : > { %2608 = vset.pattern.permute.xlu1 %v5363_v1  ;;  %2543 = vmatpush.msra.mxu2 %v435_v14  ;;  %v430_v20 = vld [vmem:[%s5359_s2 + $0x50] sm:$0xff]  ;;  %v429_v21 = vld [vmem:[%s5359_s2 + $0x48] sm:$0xff]  ;;  %v428_v22 = vld [vmem:[%s5359_s2 + $0x40] sm:$0xff] }
   0xf   : > { %s5886_s22 = smov (!%p252_p3, %s2532_s22), 63  ;;  %2544 = vmatpush.msra.mxu3 %v435_v14  ;;  %2542 = vmatpush.msra.mxu1 %v435_v14  ;;  %v427_v23 = vld [vmem:[%s5359_s2 + $0x38] sm:$0xff]  ;;  %v426_v25 = vld [vmem:[%s5359_s2 + $0x30] sm:$0xff]  ;;  %v425_v26 = vld [vmem:[%s5359_s2 + $0x28] sm:$0xff] }
  0x10   : > { %s2788_s0 = sshll.u32 %s5886_s22, 3  ;;  %1812 = vmatpush.msra.mxu0 %v435_v14  ;;  %2546 = vmatpush.msra.mxu2 %v434_v15  ;;  %v424_v27 = vld [vmem:[%s5359_s2 + $0x20] sm:$0xff]  ;;  %v423_v29 = vld [vmem:[%s5359_s2 + $0x18] sm:$0xff]  ;;  %s2590_s30 = smul.u32 72, %s5886_s22  ;;  %v422_v30 = vld [vmem:[%s5359_s2 + $0x10] sm:$0xff] }
  0x11   : > { %s2794_s25 = scalar_lea.vmem %s5360_s3, %s2788_s0  ;;  %2547 = vmatpush.msra.mxu3 %v434_v15  ;;  %2545 = vmatpush.msra.mxu1 %v434_v15  ;;  %v421_v31 = vld [vmem:[%s5359_s2 + $0x8] sm:$0xff]  ;;  %v420_v32 = vld [vmem:[%s5359_s2] sm:$0xff]  ;;  %v467_v35 = vld [vmem:[%s5359_s2 + $0x178] sm:$0xff]  ;;  %s4444_s8 = scalar_lea.vmem %s5361_s4, %s2788_s0 }
  0x12   : > { %v2797_v2 = vld [vmem:[%s2794_s25 + $0x20] sm:$0xff]  ;;  %v2800_v3 = vld [vmem:[%s2794_s25 + $0x10] sm:$0xff]  ;;  %v2806_v4 = vld [vmem:[%s2794_s25 + $0x28] sm:$0xff]  ;;  %1813 = vmatpush.msra.mxu0 %v434_v15  ;;  %2549 = vmatpush.msra.mxu2 %v433_v17  ;;  %s2912_s22 = scalar_lea.vmem %s5358_s1, %s2590_s30  ;;  %s5092_s11 = scalar_lea.vmem %s5362_s5, %s2788_s0 }
  0x13   : > { %618 = vperm.xlu2 %2609, %v2797_v2   ;;  %733 = vperm.xlu0 %2612, %v2800_v3   ;;  %v2809_v5 = vld [vmem:[%s2794_s25 + $0x38] sm:$0xff]  ;;  %v2818_v7 = vld [vmem:[%s2794_s25 + $0x40] sm:$0xff]  ;;  %v2821_v8 = vld [vmem:[%s2794_s25 + $0x50] sm:$0xff] }
  0x14   : > { %608 = vperm.xlu1 %2608, %v2800_v3   ;;  %v2812_v6 = vld [vmem:[%s2794_s25 + $0x18] sm:$0xff]  ;;  %v2830_v10 = vld [vmem:[%s2794_s25 + $0x68] sm:$0xff]  ;;  %v2836_v11 = vld [vmem:[%s2794_s25 + $0x70] sm:$0xff]  ;;  %2550 = vmatpush.msra.mxu3 %v433_v17 }
  0x15   : > { %v2827_v9 = vld [vmem:[%s2794_s25 + $0x58] sm:$0xff]  ;;  %v2839_v12 = vld [vmem:[%s2794_s25] sm:$0xff]  ;;  %v2852_v16 = vld [vmem:[%s2794_s25 + $0x8] sm:$0xff]  ;;  %2548 = vmatpush.msra.mxu1 %v433_v17  ;;  %1814 = vmatpush.msra.mxu0 %v433_v17 }
  0x16   : > { %2552 = vmatpush.msra.mxu2 %v432_v18  ;;  %2553 = vmatpush.msra.mxu3 %v432_v18  ;;  %v2882_v24 = vld [vmem:[%s2794_s25 + $0x30] sm:$0xff]  ;;  %v2897_v28 = vld [vmem:[%s2794_s25 + $0x48] sm:$0xff]  ;;  %v2921_v33 = vld [vmem:[%s2794_s25 + $0x60] sm:$0xff] }
  0x17   : > { %2551 = vmatpush.msra.mxu1 %v432_v18  ;;  %1815 = vmatpush.msra.mxu0 %v432_v18  ;;  %v2924_v34 = vld [vmem:[%s2912_s22 + $0x240] sm:$0xff]  ;;  %v466_v38 = vld [vmem:[%s5359_s2 + $0x170] sm:$0xff]  ;;  %v483_v39 = vld [vmem:[%s5359_s2 + $0x1f8] sm:$0xff] }
  0x18   : > { %2555 = vmatpush.msra.mxu2 %v431_v19  ;;  %2556 = vmatpush.msra.mxu3 %v431_v19  ;;  %v384_v37 = vld [vmem:[%s2912_s22 + $0x360] sm:$0xff]  ;;  %v451_v41 = vld [vmem:[%s5359_s2 + $0xf8] sm:$0xff]  ;;  %v465_v42 = vld [vmem:[%s5359_s2 + $0x168] sm:$0xff] }
  0x19   : > { %2554 = vmatpush.msra.mxu1 %v431_v19  ;;  %1816 = vmatpush.msra.mxu0 %v431_v19  ;;  %v2942_v40 = vld [vmem:[%s2912_s22 + $0x120] sm:$0xff]  ;;  %v2951_v43 = vld [vmem:[%s2794_s25 + $0x78] sm:$0xff]  ;;  %v482_v44 = vld [vmem:[%s5359_s2 + $0x1f0] sm:$0xff] }
  0x1a   : > { %2558 = vmatpush.msra.mxu2 %v430_v20  ;;  %2559 = vmatpush.msra.mxu3 %v430_v20  ;;  %v450_v45 = vld [vmem:[%s5359_s2 + $0xf0] sm:$0xff]  ;;  %v464_v46 = vld [vmem:[%s5359_s2 + $0x160] sm:$0xff]  ;;  %v481_v47 = vld [vmem:[%s5359_s2 + $0x1e8] sm:$0xff] }
  0x1b   : > { %623 = vperm.xlu2 %2609, %v2806_v4   ;;  %753 = vperm.xlu0 %2612, %v2809_v5   ;;  %v357_v48 = vld [vmem:[%s2912_s22 + $0x288] sm:$0xff]  ;;  %v463_v50 = vld [vmem:[%s5359_s2 + $0x158] sm:$0xff]  ;;  %v480_v51 = vld [vmem:[%s5359_s2 + $0x1e0] sm:$0xff] }
  0x1c   : > { %613 = vperm.xlu1 %2608, %v2812_v6   ;;  %2561 = vmatpush.msra.mxu2 %v429_v21  ;;  %v449_v49 = vld [vmem:[%s5359_s2 + $0xe8] sm:$0xff]  ;;  %v2980_v52 = vld [vmem:[%s2912_s22 + $0x90] sm:$0xff]  ;;  %v2983_v53 = vld [vmem:[%s2912_s22 + $0x98] sm:$0xff] }
  0x1d   : > { %2557 = vmatpush.msra.mxu1 %v430_v20  ;;  %1817 = vmatpush.msra.mxu0 %v430_v20  ;;  %v276_v54 = vld [vmem:[%s2912_s22] sm:$0xff]  ;;  %v2987_v55 = vld [vmem:[%s2912_s22 + $0x3a8] sm:$0xff]  ;;  %v2991_v56 = vadd.f32 %v2983_v53, %v2980_v52  ;;  %v462_v58 = vld [vmem:[%s5359_s2 + $0x150] sm:$0xff] }
  0x1e   : > { %2562 = vmatpush.msra.mxu3 %v429_v21  ;;  %2564 = vmatpush.msra.mxu2 %v428_v22  ;;  %v448_v57 = vld [vmem:[%s5359_s2 + $0xe0] sm:$0xff]  ;;  %v479_v59 = vld [vmem:[%s5359_s2 + $0x1d8] sm:$0xff]  ;;  %v3005_v60 = vld [vmem:[%s2912_s22 + $0x168] sm:$0xff] }
  0x1f   : > { %2560 = vmatpush.msra.mxu1 %v429_v21  ;;  %1818 = vmatpush.msra.mxu0 %v429_v21  ;;  %v499_v61 = vld [vmem:[%s5359_s2 + $0x278] sm:$0xff]  ;;  %v498_v14 = vld [vmem:[%s5359_s2 + $0x270] sm:$0xff]  ;;  %v460_v17 = vld [vmem:[%s5359_s2 + $0x140] sm:$0xff] }
  0x20   : > { %2565 = vmatpush.msra.mxu3 %v428_v22  ;;  %2567 = vmatpush.msra.mxu2 %v427_v23  ;;  %v447_v63 = vld [vmem:[%s5359_s2 + $0xd8] sm:$0xff]  ;;  %v446_v15 = vld [vmem:[%s5359_s2 + $0xd0] sm:$0xff]  ;;  %v477_v18 = vld [vmem:[%s5359_s2 + $0x1c8] sm:$0xff] }
  0x21   : > { %2563 = vmatpush.msra.mxu1 %v428_v22  ;;  %1819 = vmatpush.msra.mxu0 %v428_v22  ;;  %v497_v19 = vld [vmem:[%s5359_s2 + $0x268] sm:$0xff]  ;;  %v3042_v20 = vld [vmem:[%s2912_s22 + $0x2d0] sm:$0xff]  ;;  %v459_v22 = vld [vmem:[%s5359_s2 + $0x138] sm:$0xff] }
  0x22   : > { %2568 = vmatpush.msra.mxu3 %v427_v23  ;;  %2570 = vmatpush.msra.mxu2 %v426_v25  ;;  %v445_v21 = vld [vmem:[%s5359_s2 + $0xc8] sm:$0xff]  ;;  %v3335_v1 = vld [vmem:[%s2912_s22 + $0x178] sm:$0xff] }
  0x23   : > { %638 = vperm.xlu2 %2609, %v2818_v7   ;;  %765 = vperm.xlu0 %2612, %v2821_v8  }
  0x24   : > { %633 = vperm.xlu1 %2608, %v2809_v5   ;;  %2566 = vmatpush.msra.mxu1 %v427_v23 }
  0x25   : > { %2571 = vmatpush.msra.mxu3 %v426_v25  ;;  %1820 = vmatpush.msra.mxu0 %v427_v23  ;;  %v476_v23 = vld [vmem:[%s5359_s2 + $0x1c0] sm:$0xff] }
  0x26   : > { %2573 = vmatpush.msra.mxu2 %v425_v26  ;;  %2569 = vmatpush.msra.mxu1 %v426_v25 }
  0x27   : > { %2574 = vmatpush.msra.mxu3 %v425_v26  ;;  %1821 = vmatpush.msra.mxu0 %v426_v25  ;;  %v496_v25 = vld [vmem:[%s5359_s2 + $0x260] sm:$0xff] }
  0x28   : > { %2576 = vmatpush.msra.mxu2 %v424_v27  ;;  %2572 = vmatpush.msra.mxu1 %v425_v26 }
  0x29   : > { %2577 = vmatpush.msra.mxu3 %v424_v27  ;;  %1822 = vmatpush.msra.mxu0 %v425_v26 }
  0x2a   : > { %2579 = vmatpush.msra.mxu2 %v423_v29  ;;  %2575 = vmatpush.msra.mxu1 %v424_v27 }
  0x2b   : > { %653 = vperm.xlu2 %2609, %v2827_v9   ;;  %777 = vperm.xlu0 %2612, %v2830_v10  }
  0x2c   : > { %648 = vperm.xlu1 %2608, %v2821_v8   ;;  %2580 = vmatpush.msra.mxu3 %v423_v29 }
  0x2d   : > { %2582 = vmatpush.msra.mxu2 %v422_v30  ;;  %1823 = vmatpush.msra.mxu0 %v424_v27  ;;  %v285_v27 = vld [vmem:[%s2912_s22 + $0x48] sm:$0xff] }
  0x2e   : > { %2578 = vmatpush.msra.mxu1 %v423_v29  ;;  %2583 = vmatpush.msra.mxu3 %v422_v30 }
  0x2f   : > { %2585 = vmatpush.msra.mxu2 %v421_v31  ;;  %1824 = vmatpush.msra.mxu0 %v423_v29  ;;  %v3062_v29 = vld [vmem:[%s2912_s22 + $0x3f0] sm:$0xff] }
  0x30   : > { %2581 = vmatpush.msra.mxu1 %v422_v30  ;;  %2586 = vmatpush.msra.mxu3 %v421_v31 }
  0x31   : > { %2588 = vmatpush.msra.mxu2 %v420_v32  ;;  %1825 = vmatpush.msra.mxu0 %v422_v30  ;;  %v444_v30 = vld [vmem:[%s5359_s2 + $0xc0] sm:$0xff] }
  0x32   : > { %1852 = vmatmul.f32.vlgmr.msra.gmra.mxu2 %v2924_v34  ;;  %2584 = vmatpush.msra.mxu1 %v421_v31 }
  0x33   : > { %668 = vperm.xlu2 %2609, %v2836_v11   ;;  %2613 = vset.pattern.permute.xlu0 %v2735_v13 }
  0x34   : > { %663 = vperm.xlu1 %2608, %v2830_v10   ;;  %853 = vperm.xlu0 %2613, %v2839_v12  }
  0x35   : > { %2589 = vmatpush.msra.mxu3 %v420_v32  ;;  %1942 = vmatpush.msrb.mxu2 %v467_v35  ;;  %v495_v35 = vld [vmem:[%s5359_s2 + $0x258] sm:$0xff] }
  0x36   : > { %1864 = vmatmul.f32.vlgmr.msra.gmra.mxu3 %v384_v37  ;;  %2587 = vmatpush.msra.mxu1 %v420_v32  ;;  %v330_v37 = vld [vmem:[%s2912_s22 + $0x1b0] sm:$0xff] }
  0x37   : > { %1943 = vmatpush.msrb.mxu2 %v466_v38  ;;  %2007 = vmatpush.msrb.mxu3 %v483_v39  ;;  %v457_v38 = vld [vmem:[%s5359_s2 + $0x128] sm:$0xff]  ;;  %v443_v39 = vld [vmem:[%s5359_s2 + $0xb8] sm:$0xff] }
  0x38   : > { %1840 = vmatmul.f32.vlgmr.msra.gmra.mxu1 %v2942_v40  ;;  %1826 = vmatpush.msra.mxu0 %v421_v31  ;;  %v458_v31 = vld [vmem:[%s5359_s2 + $0x130] sm:$0xff] }
  0x39   : > { %1877 = vmatpush.msrb.mxu1 %v451_v41  ;;  %1944 = vmatpush.msrb.mxu2 %v465_v42  ;;  %v474_v41 = vld [vmem:[%s5359_s2 + $0x1b0] sm:$0xff] }
  0x3a   : > { %2008 = vmatpush.msrb.mxu3 %v482_v44  ;;  %1855 = vmatmul.f32.gmra.mxu2 %v357_v48  ;;  %v494_v42 = vld [vmem:[%s5359_s2 + $0x250] sm:$0xff]  ;;  %v493_v48 = vld [vmem:[%s5359_s2 + $0x248] sm:$0xff] }
  0x3b   : > { %2611 = vset.pattern.permute.xlu2 %v2733_v0  ;;  %1878 = vmatpush.msrb.mxu1 %v450_v45  ;;  %v442_v44 = vld [vmem:[%s5359_s2 + $0xb0] sm:$0xff]  ;;  %v456_v45 = vld [vmem:[%s5359_s2 + $0x120] sm:$0xff] }
  0x3c   : > { %2610 = vset.pattern.permute.xlu1 %v2733_v0  ;;  %729 = vperm.xlu2 %2611, %v2852_v16   ;;  %v461_v0 = vld [vmem:[%s5359_s2 + $0x148] sm:$0xff] }
  0x3d   : > { %873 = vperm.xlu0 %2613, %v2806_v4   ;;  %725 = vperm.xlu1 %2610, %v2839_v12  }
  0x3e   : > { %1945 = vmatpush.msrb.mxu2 %v464_v46  ;;  %2009 = vmatpush.msrb.mxu3 %v481_v47  ;;  %v473_v47 = vld [vmem:[%s5359_s2 + $0x1a8] sm:$0xff] }
  0x3f   : > { %1827 = vmatpush.msra.mxu0 %v420_v32  ;;  %1879 = vmatpush.msrb.mxu1 %v449_v49  ;;  %v475_v32 = vld [vmem:[%s5359_s2 + $0x1b8] sm:$0xff]  ;;  %v441_v49 = vld [vmem:[%s5359_s2 + $0xa8] sm:$0xff] }
  0x40   : > { %1946 = vmatpush.msrb.mxu2 %v463_v50  ;;  %2010 = vmatpush.msrb.mxu3 %v480_v51  ;;  %v3113_v50 = vld [vmem:[%s2912_s22 + $0x318] sm:$0xff] }
  0x41   : > { %1828 = vmatmul.f32.vlgmr.msra.gmra.mxu0 %v276_v54  ;;  %1867 = vmatmul.f32.gmra.mxu3 %v2987_v55  ;;  %v455_v51 = vld [vmem:[%s5359_s2 + $0x118] sm:$0xff]  ;;  %v472_v54 = vld [vmem:[%s5359_s2 + $0x1a0] sm:$0xff] }
  0x42   : > { %1880 = vmatpush.msrb.mxu1 %v448_v57  ;;  %1947 = vmatpush.msrb.mxu2 %v462_v58  ;;  %v492_v57 = vld [vmem:[%s5359_s2 + $0x240] sm:$0xff]  ;;  %v411_v58 = vld [vmem:[%s2912_s22 + $0x438] sm:$0xff] }
  0x43   : > { %2011 = vmatpush.msrb.mxu3 %v479_v59  ;;  %2072 = vmatpush.msrb.mxu0 %v499_v61  ;;  %v3126_v59 = vld [vmem:[%s2912_s22 + $0x128] sm:$0xff]  ;;  %v440_v61 = vld [vmem:[%s5359_s2 + $0xa0] sm:$0xff] }
  0x44   : > { %741 = vperm.xlu2 %2611, %v2797_v2   ;;  %1843 = vmatmul.f32.gmra.mxu1 %v3005_v60 }
  0x45   : > { %885 = vperm.xlu0 %2613, %v2818_v7   ;;  %737 = vperm.xlu1 %2610, %v2812_v6  }
  0x46   : > { %1881 = vmatpush.msrb.mxu1 %v447_v63  ;;  %1948 = vmatpush.msrb.mxu2 %v461_v0  ;;  %v3134_v63 = vadd.f32 %v3126_v59, %v2942_v40  ;;  %v454_v0 = vld [vmem:[%s5359_s2 + $0x110] sm:$0xff] }
  0x47   : > { %2073 = vmatpush.msrb.mxu0 %v498_v14  ;;  %1858 = vmatmul.f32.gmra.mxu2 %v3042_v20 }
  0x48   : > { %1882 = vmatpush.msrb.mxu1 %v446_v15  ;;  %1949 = vmatpush.msrb.mxu2 %v460_v17  ;;  %v491_v17 = vld [vmem:[%s5359_s2 + $0x238] sm:$0xff] }
  0x49   : > { %2074 = vmatpush.msrb.mxu0 %v497_v19  ;;  %1870 = vmatmul.f32.gmra.mxu3 %v3062_v29 }
  0x4a   : > { %1883 = vmatpush.msrb.mxu1 %v445_v21  ;;  %1950 = vmatpush.msrb.mxu2 %v459_v22  ;;  %v5367_v22 = vmov 4  }
  0x4b   : > { %2075 = vmatpush.msrb.mxu0 %v496_v25  ;;  %v453_v25 = vld [vmem:[%s5359_s2 + $0x108] sm:$0xff] }
  0x4c   : > { %749 = vperm.xlu2 %2611, %v2882_v24   ;;  %1831 = vmatmul.f32.gmra.mxu0 %v285_v27 }
  0x4d   : > { %897 = vperm.xlu0 %2613, %v2827_v9   ;;  %745 = vperm.xlu1 %2610, %v2806_v4  }
  0x4e   : > { %1884 = vmatpush.msrb.mxu1 %v444_v30  ;;  %1951 = vmatpush.msrb.mxu2 %v458_v31  ;;  %v470_v30 = vld [vmem:[%s5359_s2 + $0x190] sm:$0xff] }
  0x4f   : > { %2076 = vmatpush.msrb.mxu0 %v495_v35  ;;  %1846 = vmatmul.f32.gmra.mxu1 %v330_v37  ;;  %v490_v31 = vld [vmem:[%s5359_s2 + $0x230] sm:$0xff]  ;;  %v469_v37 = vld [vmem:[%s5359_s2 + $0x188] sm:$0xff] }
  0x50   : > { %1952 = vmatpush.msrb.mxu2 %v457_v38  ;;  %1885 = vmatpush.msrb.mxu1 %v443_v39  ;;  %v489_v38 = vld [vmem:[%s5359_s2 + $0x228] sm:$0xff]  ;;  %v278_v39 = vld [vmem:[%s2912_s22 + $0x10] sm:$0xff] }
  0x51   : > { %2077 = vmatpush.msrb.mxu0 %v494_v42  ;;  %1861 = vmatmul.f32.gmra.mxu2 %v3113_v50  ;;  %v468_v42 = vld [vmem:[%s5359_s2 + $0x180] sm:$0xff] }
  0x52   : > { %1886 = vmatpush.msrb.mxu1 %v442_v44  ;;  %1953 = vmatpush.msrb.mxu2 %v456_v45 }
  0x53   : > { %2078 = vmatpush.msrb.mxu0 %v493_v48  ;;  %1873 = vmatmul.f32.gmra.mxu3 %v411_v58  ;;  %v279_v48 = vld [vmem:[%s2912_s22 + $0x18] sm:$0xff] }
  0x54   : > { %761 = vperm.xlu2 %2611, %v2897_v28   ;;  %1887 = vmatpush.msrb.mxu1 %v441_v49  ;;  %v3214_v58 = vld [vmem:[%s2912_s22 + $0xd8] sm:$0xff] }
  0x55   : > { %909 = vperm.xlu0 %2613, %v2836_v11   ;;  %757 = vperm.xlu1 %2610, %v2818_v7  }
  0x56   : > { %1954 = vmatpush.msrb.mxu2 %v455_v51  ;;  %2079 = vmatpush.msrb.mxu0 %v492_v57  ;;  %v436_v51 = vld [vmem:[%s5359_s2 + $0x80] sm:$0xff]  ;;  %v277_v57 = vld [vmem:[%s2912_s22 + $0x8] sm:$0xff] }
  0x57   : > { %1834 = vmatmul.f32.gmra.mxu0 %v2980_v52  ;;  %1888 = vmatpush.msrb.mxu1 %v440_v61  ;;  %v486_v61 = vld [vmem:[%s5359_s2 + $0x210] sm:$0xff] }
  0x58   : > { %1955 = vmatpush.msrb.mxu2 %v454_v0  ;;  %2080 = vmatpush.msrb.mxu0 %v491_v17  ;;  %v3221_v0 = vld [vmem:[%s2912_s22 + $0x200] sm:$0xff] }
  0x5a   : > { %1956 = vmatpush.msrb.mxu2 %v453_v25  ;;  %2081 = vmatpush.msrb.mxu0 %v490_v31  ;;  %v484_v31 = vld [vmem:[%s5359_s2 + $0x200] sm:$0xff] }
  0x5c   : > { %773 = vperm.xlu2 %2611, %v2921_v33   ;;  %2082 = vmatpush.msrb.mxu0 %v489_v38  ;;  %v280_v38 = vld [vmem:[%s2912_s22 + $0x20] sm:$0xff] }
  0x5d   : > { %2617 = vset.pattern.permute.xlu0 %v2736_v36  ;;  %769 = vperm.xlu1 %2610, %v2827_v9  }
  0x5e   : > { %985 = vperm.xlu0 %2617, %v2852_v16  }
  0x5f   : > { %1837 = vmatmul.f32.gmra.mxu0 %v3214_v58 }
  0x64   : > { %785 = vperm.xlu2 %2611, %v2951_v43  }
  0x65   : > { %781 = vperm.xlu1 %2610, %v2836_v11  }
  0x66   : > { %1005 = vperm.xlu0 %2617, %v2882_v24  }
  0x6c   : > { %2615 = vset.pattern.permute.xlu2 %v2735_v13 }
  0x6d   : > { %2614 = vset.pattern.permute.xlu1 %v2735_v13  ;;  %v3011_v62 = vpop.permute.xlu2 %618  ;;  %861 = vperm.xlu2 %2615, %v2800_v3   ;;  %v478_v13 = vld [vmem:[%s5359_s2 + $0x1d0] sm:$0xff] }
  0x6e   : > { %1017 = vperm.xlu0 %2617, %v2897_v28   ;;  %857 = vperm.xlu1 %2614, %v2852_v16  }
  0x6f   : > { %2012 = vmatpush.msrb.mxu3 %v478_v13  ;;  %v471_v13 = vld [vmem:[%s5359_s2 + $0x198] sm:$0xff] }
  0x71   : > { %2013 = vmatpush.msrb.mxu3 %v477_v18  ;;  %v3150_v18 = vld [vmem:[%s2912_s22 + $0x1f8] sm:$0xff] }
  0x72   : > { %1849 = vmatmul.f32.gmra.mxu1 %v3150_v18 }
  0x73   : > { %2014 = vmatpush.msrb.mxu3 %v476_v23  ;;  %v439_v23 = vld [vmem:[%s5359_s2 + $0x98] sm:$0xff] }
  0x74   : > { %1889 = vmatpush.msrb.mxu1 %v439_v23  ;;  %v288_v23 = vld [vmem:[%s2912_s22 + $0x60] sm:$0xff] }
  0x75   : > { %v3057_v26 = vpop.permute.xlu2 %623  ;;  %869 = vperm.xlu2 %2615, %v2797_v2   ;;  %2015 = vmatpush.msrb.mxu3 %v475_v32  ;;  %v452_v32 = vld [vmem:[%s5359_s2 + $0x100] sm:$0xff] }
  0x76   : > { %1029 = vperm.xlu0 %2617, %v2921_v33   ;;  %865 = vperm.xlu1 %2614, %v2812_v6  }
  0x77   : > { %2016 = vmatpush.msrb.mxu3 %v474_v41  ;;  %1957 = vmatpush.msrb.mxu2 %v452_v32  ;;  %v437_v41 = vld [vmem:[%s5359_s2 + $0x88] sm:$0xff] }
  0x78   : > { %1958 = vmatmul.f32.vlgmr.msrb.gmra.mxu2 %v278_v39 }
  0x79   : > { %2017 = vmatpush.msrb.mxu3 %v473_v47  ;;  %v488_v47 = vld [vmem:[%s5359_s2 + $0x220] sm:$0xff] }
  0x7a   : > { %2083 = vmatpush.msrb.mxu0 %v488_v47 }
  0x7b   : > { %2018 = vmatpush.msrb.mxu3 %v472_v54  ;;  %v487_v54 = vld [vmem:[%s5359_s2 + $0x218] sm:$0xff] }
  0x7c   : > { %2084 = vmatpush.msrb.mxu0 %v487_v54 }
  0x7d   : > { %v3098_v46 = vpop.permute.xlu2 %638  ;;  %881 = vperm.xlu2 %2615, %v2809_v5   ;;  %2019 = vmatpush.msrb.mxu3 %v471_v13  ;;  %v287_v13 = vld [vmem:[%s2912_s22 + $0x58] sm:$0xff] }
  0x7e   : > { %1041 = vperm.xlu0 %2617, %v2951_v43   ;;  %877 = vperm.xlu1 %2614, %v2882_v24  }
  0x7f   : > { %2020 = vmatpush.msrb.mxu3 %v470_v30  ;;  %2085 = vmatpush.msrb.mxu0 %v486_v61  ;;  %v3271_v61 = vadd.f32 %v3011_v62, %v2942_v40  ;;  %v307_v62 = vld [vmem:[%s2912_s22 + $0xf8] sm:$0xff] }
  0x80   : > { %1961 = vmatmul.f32.gmra.mxu2 %v287_v13 }
  0x81   : > { %2021 = vmatpush.msrb.mxu3 %v469_v37  ;;  %v693_v37 = vld [vmem:[%s2912_s22 + $0x50] sm:$0xff] }
  0x83   : > { %2022 = vmatpush.msrb.mxu3 %v468_v42  ;;  %v3255_v42 = vld [vmem:[%s2912_s22 + $0x2d8] sm:$0xff] }
  0x84   : > { %2023 = vmatmul.f32.vlgmr.msrb.gmra.mxu3 %v279_v48 }
  0x85   : > { %v3143_v14 = vpop.permute.xlu2 %653  ;;  %v734_v15 = vpop.permute.xlu0 %733  ;;  %893 = vperm.xlu2 %2615, %v2821_v8  }
  0x86   : > { %v3153_v19 = vadd.f32 %v734_v15, %v2983_v53  ;;  %v609_v21 = vpop.permute.xlu1 %608  ;;  %2621 = vset.pattern.permute.xlu0 %v5367_v22  ;;  %889 = vperm.xlu1 %2614, %v2897_v28   ;;  %v485_v15 = vld [vmem:[%s5359_s2 + $0x208] sm:$0xff] }
  0x87   : > { %v3164_v27 = vadd.f32 %v609_v21, %v2980_v52  ;;  %1117 = vperm.xlu0 %2621, %v2800_v3   ;;  %v438_v52 = vld [vmem:[%s5359_s2 + $0x90] sm:$0xff]  ;;  %2086 = vmatpush.msrb.mxu0 %v485_v15 }
  0x88   : > { %1890 = vmatpush.msrb.mxu1 %v438_v52  ;;  %v3240_v52 = vld [vmem:[%s2912_s22 + $0xe0] sm:$0xff] }
  0x89   : > { %v3250_v39 = vadd.f32 %v3214_v58, %v3240_v52  ;;  %2087 = vmatpush.msrb.mxu0 %v484_v31  ;;  %v3306_v31 = vld [vmem:[%s2912_s22 + $0xf0] sm:$0xff] }
  0x8a   : > { %1891 = vmatpush.msrb.mxu1 %v437_v41  ;;  %2088 = vmatmul.f32.vlgmr.msrb.gmra.mxu0 %v280_v38 }
  0x8b   : > { %5436 = vst [vmem:[#allocation4_spill] sm:$0xff] %v3250_v39  ;;  %v3364_v39 = vld [vmem:[%s2912_s22 + $0x250] sm:$0xff] }
  0x8c   : > { %1892 = vmatpush.msrb.mxu1 %v436_v51  ;;  %2026 = vmatmul.f32.gmra.mxu3 %v288_v23  ;;  %v3265_v51 = vld [vmem:[%s2912_s22 + $0xa8] sm:$0xff]  ;;  %v3295_v23 = vld [vmem:[%s2912_s22 + $0x3b0] sm:$0xff] }
  0x8d   : > { %v3195_v44 = vpop.permute.xlu2 %668  ;;  %905 = vperm.xlu2 %2615, %v2830_v10   ;;  %v754_v45 = vpop.permute.xlu0 %753  ;;  %1893 = vmatmul.f32.vlgmr.msrb.gmra.mxu1 %v277_v57 }
  0x8e   : > { %v3202_v49 = vpop.permute.xlu1 %613  ;;  %901 = vperm.xlu1 %2614, %v2921_v33   ;;  %v3228_v17 = vadd.f32 %v754_v45, %v3221_v0  ;;  %v3258_v45 = vld [vmem:[%s2912_s22 + $0xa0] sm:$0xff] }
  0x8f   : > { %1137 = vperm.xlu0 %2621, %v2809_v5   ;;  %1964 = vmatmul.f32.gmra.mxu2 %v3258_v45 }
  0x94   : > { %2029 = vmatmul.f32.gmra.mxu3 %v3265_v51 }
  0x95   : > { %2616 = vset.pattern.permute.xlu2 %v2736_v36  ;;  %v766_v21 = vpop.permute.xlu0 %765  ;;  %1896 = vmatmul.f32.gmra.mxu1 %v693_v37 }
  0x96   : > { %v634_v25 = vpop.permute.xlu1 %633  ;;  %913 = vperm.xlu1 %2614, %v2951_v43   ;;  %v3233_v30 = vpop.permute.xlu2 %729  ;;  %981 = vperm.xlu2 %2616, %v2839_v12   ;;  %v3261_v47 = vadd.f32 %v766_v21, %v3255_v42  ;;  %v3283_v21 = vld [vmem:[%s2912_s22 + $0x170] sm:$0xff] }
  0x97   : > { %5435 = vst [vmem:[#allocation3_spill] sm:$0xff] %v3233_v30  ;;  %v3243_v32 = vadd.f32 %v634_v25, %v3150_v18  ;;  %1149 = vperm.xlu0 %2621, %v2821_v8  }
  0x9c   : > { %2032 = vmatmul.f32.gmra.mxu3 %v3306_v31 }
  0x9d   : > { %v778_v48 = vpop.permute.xlu0 %777  ;;  %1899 = vmatmul.f32.gmra.mxu1 %v2983_v53  ;;  %v5365_v53 = vmov 5  }
  0x9e   : > { %v649_v54 = vpop.permute.xlu1 %648  ;;  %2618 = vset.pattern.permute.xlu1 %v2736_v36  ;;  %v742_v57 = vpop.permute.xlu2 %741  ;;  %993 = vperm.xlu2 %2616, %v2812_v6   ;;  %v289_v36 = vld [vmem:[%s2912_s22 + $0x68] sm:$0xff]  ;;  %v3288_v6 = vadd.f32 %v3283_v21, %v3005_v60  ;;  %v3302_v25 = vadd.f32 %v778_v48, %v3295_v23 }
  0x9f   : > { %v3274_v13 = vadd.f32 %v649_v54, %v3042_v20  ;;  %v3277_v15 = vadd.f32 %v742_v57, %v3126_v59  ;;  %1161 = vperm.xlu0 %2621, %v2830_v10   ;;  %989 = vperm.xlu1 %2618, %v2800_v3   ;;  %v3299_v3 = vld [vmem:[%s2912_s22 + $0xe8] sm:$0xff]  ;;  %v3319_v57 = vld [vmem:[%s2912_s22 + $0xb0] sm:$0xff] }
  0xa0   : > { %2091 = vmatmul.f32.gmra.mxu0 %v289_v36  ;;  %1967 = vmatmul.f32.gmra.mxu2 %v3299_v3 }
  0xa5   : > { %1902 = vmatmul.f32.gmra.mxu1 %v3240_v52 }
  0xa6   : > { %v664_v37 = vpop.permute.xlu1 %663  ;;  %v3308_v38 = vpop.permute.xlu2 %749  ;;  %1001 = vperm.xlu2 %2616, %v2806_v4  }
  0xa7   : > { %5437 = vst [vmem:[#allocation5_spill] sm:$0xff] %v3308_v38  ;;  %v3312_v54 = vadd.f32 %v664_v37, %v2987_v55  ;;  %2622 = vset.pattern.permute.xlu0 %v5365_v53  ;;  %997 = vperm.xlu1 %2618, %v2797_v2   ;;  %v3316_v48 = vpop.permute.xlu0 %853  ;;  %v3328_v37 = vld [vmem:[%s2912_s22 + $0x130] sm:$0xff]  ;;  %v3332_v2 = vadd.f32 %v2991_v56, %v3258_v45  ;;  %v3339_v53 = vld [vmem:[%s2912_s22 + $0x138] sm:$0xff]  ;;  %v3349_v56 = vld [vmem:[%s2912_s22 + $0x320] sm:$0xff] }
  0xa8   : > { %5438 = vst [vmem:[#allocation6_spill] sm:$0xff] %v3316_v48  ;;  %1237 = vperm.xlu0 %2622, %v2839_v12   ;;  %2094 = vmatmul.f32.gmra.mxu0 %v3319_v57  ;;  %v3356_v22 = vadd.f32 %v3349_v56, %v3113_v50  ;;  %v3381_v38 = vadd.f32 %v3202_v49, %v3214_v58  ;;  %v332_v49 = vld [vmem:[%s2912_s22 + $0x1c0] sm:$0xff] }
  0xa9   : > { %1970 = vmatmul.f32.gmra.mxu2 %v3328_v37  ;;  %2035 = vmatmul.f32.gmra.mxu3 %v3339_v53  ;;  %v681_v48 = vadd.f32 %v3057_v26, %v3005_v60  ;;  %v698_v60 = vld [vmem:[%s2912_s22 + $0x1b8] sm:$0xff] }
  0xad   : > { %1905 = vmatmul.f32.gmra.mxu1 %v3126_v59 }
  0xae   : > { %v3341_v40 = vpop.permute.xlu2 %761  ;;  %1013 = vperm.xlu2 %2616, %v2818_v7  }
  0xaf   : > { %5439 = vst [vmem:[#allocation7_spill] sm:$0xff] %v3341_v40  ;;  %1009 = vperm.xlu1 %2618, %v2809_v5   ;;  %v3345_v36 = vpop.permute.xlu1 %725  ;;  %v874_v41 = vpop.permute.xlu0 %873  ;;  %v3361_v5 = vadd.f32 %v3134_v63, %v3328_v37 }
  0xb0   : > { %5440 = vst [vmem:[#allocation8_spill] sm:$0xff] %v3345_v36  ;;  %1257 = vperm.xlu0 %2622, %v2806_v4   ;;  %v921_v35 = vadd.f32 %v874_v41, %v3335_v1  ;;  %2097 = vmatmul.f32.gmra.mxu0 %v307_v62  ;;  %v3368_v4 = vld [vmem:[%s2912_s22 + $0x180] sm:$0xff]  ;;  %v715_v41 = vadd.f32 %v3221_v0, %v3150_v18 }
  0xb1   : > { %5441 = vst [vmem:[#allocation9_spill] sm:$0xff] %v3361_v5  ;;  %1973 = vmatmul.f32.gmra.mxu2 %v3335_v1  ;;  %v3377_v62 = vld [vmem:[%s2912_s22 + $0x140] sm:$0xff]  ;;  %2038 = vmatmul.f32.gmra.mxu3 %v3368_v4  ;;  %v325_v5 = vld [vmem:[%s2912_s22 + $0x188] sm:$0xff] }
  0xb5   : > { %1908 = vmatmul.f32.gmra.mxu1 %v3283_v21 }
  0xb6   : > { %v3372_v40 = vpop.permute.xlu2 %773  ;;  %1025 = vperm.xlu2 %2616, %v2827_v9  }
  0xb7   : > { %5442 = vst [vmem:[#allocation10_spill] sm:$0xff] %v3372_v40  ;;  %1021 = vperm.xlu1 %2618, %v2821_v8   ;;  %v738_v59 = vpop.permute.xlu1 %737  ;;  %v886_v63 = vpop.permute.xlu0 %885  ;;  %v3392_v8 = vld [vmem:[%s2912_s22 + $0x208] sm:$0xff] }
  0xb8   : > { %v3384_v30 = vadd.f32 %v738_v59, %v3240_v52  ;;  %1269 = vperm.xlu0 %2622, %v2818_v7   ;;  %v3388_v18 = vadd.f32 %v886_v63, %v3364_v39  ;;  %2100 = vmatmul.f32.gmra.mxu0 %v3377_v62  ;;  %v3400_v58 = vadd.f32 %v715_v41, %v3392_v8  ;;  %v531_v7 = vld [vmem:[%s5359_s2 + $0x378] sm:$0xff]  ;;  %v3414_v41 = vld [vmem:[%s2912_s22 + $0x328] sm:$0xff] }
  0xb9   : > { %2202 = vmatpush.msra.mxu2 %v531_v7  ;;  %v547_v52 = vld [vmem:[%s5359_s2 + $0x3f8] sm:$0xff]  ;;  %v718_v63 = vadd.f32 %v3255_v42, %v3042_v20  ;;  %v333_v40 = vld [vmem:[%s2912_s22 + $0x1c8] sm:$0xff]  ;;  %v3425_v20 = vld [vmem:[%s2912_s22 + $0x2e0] sm:$0xff] }
  0xba   : > { %5443 = vst [vmem:[#allocation11_spill] sm:$0xff] %v3400_v58  ;;  %v515_v59 = vld [vmem:[%s5359_s2 + $0x2f8] sm:$0xff]  ;;  %2267 = vmatpush.msra.mxu3 %v547_v52  ;;  %1976 = vmatmul.f32.gmra.mxu2 %v332_v49 }
  0xbb   : > { %2137 = vmatpush.msra.mxu1 %v515_v59  ;;  %2041 = vmatmul.f32.gmra.mxu3 %v333_v40  ;;  %v3433_v59 = vadd.f32 %v3425_v20, %v718_v63  ;;  %v514_v40 = vld [vmem:[%s5359_s2 + $0x2f0] sm:$0xff]  ;;  %v3458_v63 = vld [vmem:[%s2912_s22 + $0x400] sm:$0xff] }
  0xbd   : > { %5445 = vst [vmem:[#allocation13_spill] sm:$0xff] %v3433_v59  ;;  %1911 = vmatmul.f32.gmra.mxu1 %v698_v60  ;;  %v684_v60 = vadd.f32 %v3098_v46, %v2924_v34 }
  0xbe   : > { %v3417_v7 = vpop.permute.xlu2 %785  ;;  %1037 = vperm.xlu2 %2616, %v2836_v11   ;;  %2138 = vmatpush.msra.mxu1 %v514_v40 }
  0xbf   : > { %5444 = vst [vmem:[#allocation12_spill] sm:$0xff] %v3417_v7  ;;  %1033 = vperm.xlu1 %2618, %v2830_v10   ;;  %v746_v36 = vpop.permute.xlu1 %745  ;;  %v898_v58 = vpop.permute.xlu0 %897  ;;  %v530_v10 = vld [vmem:[%s5359_s2 + $0x370] sm:$0xff] }
  0xc0   : > { %v793_v52 = vadd.f32 %v746_v36, %v3283_v21  ;;  %1281 = vperm.xlu0 %2622, %v2827_v9   ;;  %v3430_v49 = vadd.f32 %v898_v58, %v3414_v41  ;;  %2103 = vmatmul.f32.gmra.mxu0 %v325_v5  ;;  %v546_v9 = vld [vmem:[%s5359_s2 + $0x3f0] sm:$0xff]  ;;  %v563_v21 = vld [vmem:[%s5359_s2 + $0x478] sm:$0xff]  ;;  %v3453_v5 = vld [vmem:[%s2912_s22 + $0x248] sm:$0xff]  ;;  %v5446_v58 = vmov 4  }
  0xc1   : > { %2203 = vmatpush.msra.mxu2 %v530_v10  ;;  %2268 = vmatpush.msra.mxu3 %v546_v9 }
  0xc2   : > { %v809_v26 = vmax.f32 %v681_v48, %v793_v52  ;;  %v721_v48 = vadd.f32 %v3295_v23, %v2987_v55  ;;  %2332 = vmatpush.msra.mxu0 %v563_v21  ;;  %1979 = vmatmul.f32.gmra.mxu2 %v3392_v8  ;;  %v3461_v52 = vld [vmem:[%s2912_s22 + $0x210] sm:$0xff] }
  0xc3   : > { %2044 = vmatmul.f32.gmra.mxu3 %v3461_v52 }
  0xc4   : > { %v3450_v36 = vmax.f32 %v809_v26, %v921_v35  ;;  %v334_v35 = vld [vmem:[%s2912_s22 + $0x1d0] sm:$0xff]  ;;  %v3469_v26 = vld [vmem:[%s2912_s22 + $0x3b8] sm:$0xff] }
  0xc5   : > { %v3476_v46 = vadd.f32 %v3469_v26, %v721_v48  ;;  %1914 = vmatmul.f32.gmra.mxu1 %v3221_v0  ;;  %v3505_v0 = vld [vmem:[%s2912_s22 + $0x258] sm:$0xff] }
  0xc6   : > { %2620 = vset.pattern.permute.xlu2 %v5446_v58 }
  0xc7   : > { %2619 = vset.pattern.permute.xlu1 %v5446_v58  ;;  %v758_v55 = vpop.permute.xlu1 %757  ;;  %v862_v10 = vpop.permute.xlu2 %861  ;;  %1113 = vperm.xlu2 %2620, %v2852_v16  }
  0xc8   : > { %v796_v9 = vadd.f32 %v758_v55, %v3453_v5  ;;  %v918_v21 = vadd.f32 %v862_v10, %v3258_v45  ;;  %1293 = vperm.xlu0 %2622, %v2836_v11   ;;  %1109 = vperm.xlu1 %2619, %v2839_v12   ;;  %v910_v40 = vpop.permute.xlu0 %909  ;;  %v5447_v55 = vmax.f32 %v3164_v27, %v3153_v19  ;;  %v529_v11 = vld [vmem:[%s5359_s2 + $0x368] sm:$0xff]  ;;  %v562_v45 = vld [vmem:[%s5359_s2 + $0x470] sm:$0xff]  ;;  %v3508_v10 = vld [vmem:[%s2794_s25 + $0x20] sm:$0xff] }
  0xc9   : > { %v3479_v58 = vadd.f32 %v910_v40, %v3458_v63  ;;  %2106 = vmatmul.f32.gmra.mxu0 %v334_v35  ;;  %v545_v12 = vld [vmem:[%s5359_s2 + $0x3e8] sm:$0xff]  ;;  %2204 = vmatpush.msra.mxu2 %v529_v11  ;;  %v3512_v35 = vld [vmem:[%s2912_s22 + $0x218] sm:$0xff] }
  0xca   : > { %v812_v7 = vmax.f32 %v684_v60, %v796_v9  ;;  %v3485_v59 = vmax.f32 %v5447_v55, %v918_v21  ;;  %2269 = vmatpush.msra.mxu3 %v545_v12  ;;  %v513_v19 = vld [vmem:[%s5359_s2 + $0x2e8] sm:$0xff]  ;;  %1982 = vmatmul.f32.gmra.mxu2 %v3364_v39  ;;  %v687_v9 = vadd.f32 %v3143_v14, %v3113_v50  ;;  %v5369_v21 = vmov 6   ;;  %v3520_v40 = vld [vmem:[%s2794_s25 + $0x18] sm:$0xff]  ;;  %v528_v50 = vld [vmem:[%s5359_s2 + $0x360] sm:$0xff] }
  0xcb   : > { %2333 = vmatpush.msra.mxu0 %v562_v45  ;;  %2139 = vmatpush.msra.mxu1 %v513_v19  ;;  %v544_v12 = vld [vmem:[%s5359_s2 + $0x3e0] sm:$0xff]  ;;  %v561_v45 = vld [vmem:[%s5359_s2 + $0x468] sm:$0xff]  ;;  %v3551_v19 = vld [vmem:[%s2912_s22 + $0x3f8] sm:$0xff] }
  0xcc   : > { %v3501_v27 = vmax.f32 %v812_v7, %v3388_v18  ;;  %2047 = vmatmul.f32.gmra.mxu3 %v3505_v0  ;;  %2205 = vmatpush.msra.mxu2 %v528_v50 }
  0xcd   : > { %1917 = vmatmul.f32.gmra.mxu1 %v3453_v5  ;;  %2270 = vmatpush.msra.mxu3 %v544_v12  ;;  %v3563_v12 = vld [vmem:[%s2794_s25 + $0x28] sm:$0xff] }
  0xce   : > { %2334 = vmatpush.msra.mxu0 %v561_v45  ;;  %v5451_v45 = vmax.f32 %v3243_v32, %v3228_v17  ;;  %v511_v17 = vld [vmem:[%s5359_s2 + $0x2d8] sm:$0xff] }
  0xcf   : > { %v770_v48 = vpop.permute.xlu1 %769  ;;  %v870_v60 = vpop.permute.xlu2 %869  ;;  %1125 = vperm.xlu2 %2620, %v3508_v10  }
  0xd0   : > { %v799_v18 = vadd.f32 %v770_v48, %v3349_v56  ;;  %v920_v7 = vadd.f32 %v870_v60, %v3328_v37  ;;  %2626 = vset.pattern.permute.xlu0 %v5369_v21  ;;  %1121 = vperm.xlu1 %2619, %v3520_v40   ;;  %v3523_v55 = vpop.permute.xlu0 %985  ;;  %v5449_v37 = vmax.f32 %v3271_v61, %v3277_v15  ;;  %v512_v61 = vld [vmem:[%s5359_s2 + $0x2e0] sm:$0xff] }
  0xd1   : > { %5448 = vst [vmem:[#allocation14_spill] sm:$0xff] %v3523_v55  ;;  %1369 = vperm.xlu0 %2626, %v2852_v16   ;;  %2109 = vmatmul.f32.gmra.mxu0 %v3512_v35  ;;  %v359_v16 = vld [vmem:[%s2912_s22 + $0x298] sm:$0xff]  ;;  %v360_v48 = vld [vmem:[%s2912_s22 + $0x2a0] sm:$0xff]  ;;  %v5502_v55 = vmov 6  }
  0xd2   : > { %v815_v14 = vmax.f32 %v687_v9, %v799_v18  ;;  %v3533_v11 = vmax.f32 %v5449_v37, %v920_v7  ;;  %2140 = vmatpush.msra.mxu1 %v512_v61  ;;  %1985 = vmatmul.f32.gmra.mxu2 %v359_v16  ;;  %v3556_v18 = vld [vmem:[%s2912_s22 + $0x260] sm:$0xff]  ;;  %v690_v7 = vadd.f32 %v3195_v44, %v3062_v29 }
  0xd3   : > { %v560_v61 = vld [vmem:[%s5359_s2 + $0x460] sm:$0xff] }
  0xd4   : > { %v3548_v15 = vmax.f32 %v815_v14, %v3430_v49  ;;  %v701_v14 = vld [vmem:[%s2912_s22 + $0x290] sm:$0xff]  ;;  %2050 = vmatmul.f32.gmra.mxu3 %v360_v48  ;;  %2335 = vmatpush.msra.mxu0 %v560_v61  ;;  %v3593_v48 = vld [vmem:[%s2912_s22 + $0x2e8] sm:$0xff]  ;;  %v3763_v21 = vld [vmem:[%s2912_s22 + $0x3c0] sm:$0xff] }
  0xd5   : > { %1920 = vmatmul.f32.gmra.mxu1 %v701_v14  ;;  %v3610_v14 = vadd.f32 %v3335_v1, %v3288_v6  ;;  %v559_v1 = vld [vmem:[%s5359_s2 + $0x458] sm:$0xff]  ;;  %v3637_v6 = vld [vmem:[%s2912_s22 + $0x330] sm:$0xff] }
  0xd6   : > { %2141 = vmatpush.msra.mxu1 %v511_v17  ;;  %2336 = vmatpush.msra.mxu0 %v559_v1  ;;  %v3643_v61 = vld [vmem:[%s2912_s22 + $0x2f0] sm:$0xff]  ;;  %v3645_v17 = vpop.f32.mrf.mxu2  ;;  %v509_v1 = vld [vmem:[%s5359_s2 + $0x2c8] sm:$0xff] }
  0xd7   : > { %v782_v60 = vpop.permute.xlu1 %781  ;;  %v882_v9 = vpop.permute.xlu2 %881  ;;  %1133 = vperm.xlu2 %2620, %v2882_v24   ;;  %5454 = vst [vmem:[#allocation18_spill] sm:$0xff] %v3610_v14 }
  0xd8   : > { %v802_v50 = vadd.f32 %v782_v60, %v3551_v19  ;;  %v923_v37 = vadd.f32 %v882_v9, %v3392_v8  ;;  %1129 = vperm.xlu1 %2619, %v3563_v12   ;;  %v3566_v49 = vpop.permute.xlu0 %1005  ;;  %v527_v8 = vld [vmem:[%s5359_s2 + $0x358] sm:$0xff]  ;;  %v361_v9 = vld [vmem:[%s2912_s22 + $0x2a8] sm:$0xff]  ;;  %5457 = vst [vmem:[#allocation20_spill] sm:$0xff] %v3645_v17 }
  0xd9   : > { %5450 = vst [vmem:[#allocation15_spill] sm:$0xff] %v3566_v49  ;;  %1389 = vperm.xlu0 %2626, %v2882_v24   ;;  %2112 = vmatmul.f32.gmra.mxu0 %v3556_v18  ;;  %v543_v24 = vld [vmem:[%s5359_s2 + $0x3d8] sm:$0xff]  ;;  %v3980_v49 = vld [vmem:[%s2912_s22 + $0x80] sm:$0xff] }
  0xda   : > { %v818_v16 = vmax.f32 %v690_v7, %v802_v50  ;;  %v3573_v44 = vmax.f32 %v5451_v45, %v923_v37  ;;  %2206 = vmatpush.msra.mxu2 %v527_v8  ;;  %2271 = vmatpush.msra.mxu3 %v543_v24  ;;  %v3599_v50 = vld [vmem:[%s2794_s25 + $0x40] sm:$0xff]  ;;  %v526_v45 = vld [vmem:[%s5359_s2 + $0x350] sm:$0xff]  ;;  %v3639_v8 = vpop.f32.mrf.mxu1  ;;  %5492 = vst [vmem:[#allocation52_spill] sm:$0xff] %v3980_v49 }
  0xdb   : > { %1988 = vmatmul.f32.gmra.mxu2 %v3425_v20  ;;  %5456 = vst [vmem:[#allocation19_spill] sm:$0xff] %v3639_v8  ;;  %v519_v8 = vld [vmem:[%s5359_s2 + $0x318] sm:$0xff] }
  0xdc   : > { %v3589_v32 = vmax.f32 %v818_v16, %v3479_v58  ;;  %2053 = vmatmul.f32.gmra.mxu3 %v3593_v48  ;;  %2207 = vmatpush.msra.mxu2 %v526_v45 }
  0xdd   : > { %1923 = vmatmul.f32.gmra.mxu1 %v3255_v42  ;;  %v510_v42 = vld [vmem:[%s5359_s2 + $0x2d0] sm:$0xff] }
  0xde   : > { %2142 = vmatpush.msra.mxu1 %v510_v42  ;;  %v523_v42 = vld [vmem:[%s5359_s2 + $0x338] sm:$0xff] }
  0xdf   : > { %v894_v60 = vpop.permute.xlu2 %893  ;;  %1145 = vperm.xlu2 %2620, %v2897_v28  }
  0xe0   : > { %v926_v7 = vadd.f32 %v894_v60, %v3425_v20  ;;  %1141 = vperm.xlu1 %2619, %v3599_v50   ;;  %v3602_v37 = vpop.permute.xlu1 %857  ;;  %v3604_v58 = vpop.permute.xlu0 %1017  ;;  %v5455_v20 = vmax.f32 %v3274_v13, %v3261_v47  ;;  %v525_v47 = vld [vmem:[%s5359_s2 + $0x348] sm:$0xff]  ;;  %v716_v13 = vadd.f32 %v3453_v5, %v2924_v34  ;;  %v524_v34 = vld [vmem:[%s5359_s2 + $0x340] sm:$0xff]  ;;  %v3652_v60 = vld [vmem:[%s2794_s25 + $0x58] sm:$0xff]  ;;  %2143 = vmatpush.msra.mxu1 %v509_v1 }
  0xe1   : > { %5452 = vst [vmem:[#allocation16_spill] sm:$0xff] %v3602_v37  ;;  %1401 = vperm.xlu0 %2626, %v2897_v28   ;;  %2115 = vmatmul.f32.gmra.mxu0 %v361_v9  ;;  %v542_v28 = vld [vmem:[%s5359_s2 + $0x3d0] sm:$0xff]  ;;  %v4030_v37 = vld [vmem:[%s2794_s25 + $0x78] sm:$0xff] }
  0xe2   : > { %5453 = vst [vmem:[#allocation17_spill] sm:$0xff] %v3604_v58  ;;  %v3615_v16 = vmax.f32 %v5455_v20, %v926_v7  ;;  %2272 = vmatpush.msra.mxu3 %v542_v28  ;;  %2208 = vmatpush.msra.mxu2 %v525_v47  ;;  %v541_v20 = vld [vmem:[%s5359_s2 + $0x3c8] sm:$0xff]  ;;  %v844_v28 = vadd.f32 %v3364_v39, %v716_v13  ;;  %v540_v39 = vld [vmem:[%s5359_s2 + $0x3c0] sm:$0xff] }
  0xe3   : > { %1991 = vmatmul.f32.gmra.mxu2 %v3414_v41  ;;  %v5459_v47 = vmax.f32 %v3312_v54, %v3302_v25  ;;  %v508_v54 = vld [vmem:[%s5359_s2 + $0x2c0] sm:$0xff]  ;;  %v3944_v58 = vld [vmem:[%s2794_s25 + $0x48] sm:$0xff] }
  0xe4   : > { %2209 = vmatpush.msra.mxu2 %v524_v34  ;;  %2056 = vmatmul.f32.gmra.mxu3 %v3637_v6  ;;  %v3686_v34 = vpop.f32.mrf.mxu3  ;;  %v3689_v25 = vadd.f32 %v844_v28, %v3505_v0 }
  0xe5   : > { %1926 = vmatmul.f32.gmra.mxu1 %v3349_v56  ;;  %5461 = vst [vmem:[#allocation22_spill] sm:$0xff] %v3686_v34  ;;  %2273 = vmatpush.msra.mxu3 %v541_v20  ;;  %v522_v56 = vld [vmem:[%s5359_s2 + $0x330] sm:$0xff]  ;;  %v3708_v20 = vpop.f32.mrf.mxu0 }
  0xe6   : > { %5462 = vst [vmem:[#allocation23_spill] sm:$0xff] %v3689_v25  ;;  %2210 = vmatpush.msra.mxu2 %v523_v42  ;;  %2144 = vmatpush.msra.mxu1 %v508_v54  ;;  %v507_v42 = vld [vmem:[%s5359_s2 + $0x2b8] sm:$0xff]  ;;  %v3730_v54 = vpop.f32.mrf.mxu1  ;;  %v504_v25 = vld [vmem:[%s5359_s2 + $0x2a0] sm:$0xff] }
  0xe7   : > { %v906_v24 = vpop.permute.xlu2 %905  ;;  %1157 = vperm.xlu2 %2620, %v2921_v33   ;;  %2274 = vmatpush.msra.mxu3 %v540_v39  ;;  %5463 = vst [vmem:[#allocation24_spill] sm:$0xff] %v3708_v20  ;;  %v704_v39 = vld [vmem:[%s2912_s22 + $0x368] sm:$0xff]  ;;  %v518_v20 = vld [vmem:[%s5359_s2 + $0x310] sm:$0xff] }
  0xe8   : > { %v929_v5 = vadd.f32 %v906_v24, %v3469_v26  ;;  %1153 = vperm.xlu1 %2619, %v3652_v60   ;;  %v866_v9 = vpop.permute.xlu1 %865  ;;  %v3655_v7 = vpop.permute.xlu0 %1029  ;;  %2211 = vmatpush.msra.mxu2 %v522_v56  ;;  %5467 = vst [vmem:[#allocation28_spill] sm:$0xff] %v3730_v54  ;;  %v538_v56 = vld [vmem:[%s5359_s2 + $0x3b0] sm:$0xff] }
  0xe9   : > { %5458 = vst [vmem:[#allocation21_spill] sm:$0xff] %v3655_v7  ;;  %v919_v45 = vadd.f32 %v866_v9, %v3299_v3  ;;  %1413 = vperm.xlu0 %2626, %v2921_v33   ;;  %2118 = vmatmul.f32.gmra.mxu0 %v3643_v61  ;;  %v386_v33 = vld [vmem:[%s2912_s22 + $0x370] sm:$0xff]  ;;  %v5460_v3 = vmax.f32 %v3381_v38, %v3384_v30  ;;  %v539_v30 = vld [vmem:[%s5359_s2 + $0x3b8] sm:$0xff] }
  0xea   : > { %v3673_v24 = vmax.f32 %v5459_v47, %v929_v5  ;;  %v558_v38 = vld [vmem:[%s5359_s2 + $0x450] sm:$0xff]  ;;  %v960_v5 = vld [vmem:[%s2912_s22 + $0x378] sm:$0xff]  ;;  %2275 = vmatpush.msra.mxu3 %v539_v30  ;;  %v521_v47 = vld [vmem:[%s5359_s2 + $0x328] sm:$0xff]  ;;  %2145 = vmatpush.msra.mxu1 %v507_v42 }
  0xeb   : > { %v3684_v13 = vmax.f32 %v5460_v3, %v919_v45  ;;  %1994 = vmatmul.f32.gmra.mxu2 %v386_v33  ;;  %v3706_v9 = vld [vmem:[%s2912_s22 + $0x338] sm:$0xff]  ;;  %v3711_v45 = vld [vmem:[%s2794_s25 + $0x70] sm:$0xff]  ;;  %2337 = vmatpush.msra.mxu0 %v558_v38  ;;  %v847_v33 = vadd.f32 %v3414_v41, %v3356_v22  ;;  %v557_v30 = vld [vmem:[%s5359_s2 + $0x448] sm:$0xff]  ;;  %v3739_v22 = vpop.f32.mrf.mxu2 }
  0xec   : > { %2059 = vmatmul.f32.gmra.mxu3 %v960_v5  ;;  %5468 = vst [vmem:[#allocation29_spill] sm:$0xff] %v3739_v22  ;;  %2212 = vmatpush.msra.mxu2 %v521_v47  ;;  %v520_v38 = vld [vmem:[%s5359_s2 + $0x320] sm:$0xff]  ;;  %v537_v5 = vld [vmem:[%s5359_s2 + $0x3a8] sm:$0xff]  ;;  %v3759_v47 = vpop.f32.mrf.mxu3  ;;  %v415_v7 = vld [vmem:[%s2912_s22 + $0x458] sm:$0xff] }
  0xed   : > { %1929 = vmatmul.f32.gmra.mxu1 %v704_v39  ;;  %v3745_v41 = vadd.f32 %v847_v33, %v3637_v6  ;;  %v722_v39 = vadd.f32 %v3551_v19, %v3062_v29  ;;  %2276 = vmatpush.msra.mxu3 %v538_v56  ;;  %v505_v42 = vld [vmem:[%s5359_s2 + $0x2a8] sm:$0xff]  ;;  %5469 = vst [vmem:[#allocation30_spill] sm:$0xff] %v3759_v47  ;;  %v5470_v33 = vmov 5   ;;  %v3769_v56 = vld [vmem:[%s2794_s25 + $0x10] sm:$0xff] }
  0xee   : > { %2338 = vmatpush.msra.mxu0 %v557_v30  ;;  %2213 = vmatpush.msra.mxu2 %v520_v38  ;;  %5472 = vst [vmem:[#allocation32_spill] sm:$0xff] %v3769_v56  ;;  %v388_v30 = vld [vmem:[%s2912_s22 + $0x380] sm:$0xff]  ;;  %v3779_v47 = vld [vmem:[%s2794_s25 + $0x8] sm:$0xff]  ;;  %v3806_v54 = vpop.f32.mrf.mxu1 }
  0xef   : > { %1169 = vperm.xlu2 %2620, %v2951_v43   ;;  %2277 = vmatpush.msra.mxu3 %v537_v5  ;;  %v5371_v5 = vmov 7   ;;  %5474 = vst [vmem:[#allocation34_spill] sm:$0xff] %v3806_v54  ;;  %v963_v54 = vld [vmem:[%s2912_s22 + $0x450] sm:$0xff] }
  0xf0   : > { %1165 = vperm.xlu1 %2619, %v3711_v45   ;;  %v3714_v28 = vpop.permute.xlu1 %877  ;;  %v3716_v1 = vpop.permute.xlu2 %981  ;;  %2214 = vmatpush.msra.mxu2 %v519_v8  ;;  %v517_v8 = vld [vmem:[%s5359_s2 + $0x308] sm:$0xff] }
  0xf1   : > { %5464 = vst [vmem:[#allocation25_spill] sm:$0xff] %v3714_v28  ;;  %1425 = vperm.xlu0 %2626, %v2951_v43   ;;  %v3728_v3 = vpop.permute.xlu0 %1041  ;;  %2121 = vmatmul.f32.gmra.mxu0 %v3706_v9  ;;  %v506_v43 = vld [vmem:[%s5359_s2 + $0x2b0] sm:$0xff] }
  0xf2   : > { %5465 = vst [vmem:[#allocation26_spill] sm:$0xff] %v3716_v1  ;;  %2146 = vmatpush.msra.mxu1 %v506_v43  ;;  %v850_v43 = vadd.f32 %v3458_v63, %v722_v39  ;;  %v3795_v39 = vpop.f32.mrf.mxu0  ;;  %2215 = vmatpush.msra.mxu2 %v518_v20  ;;  %v4061_v1 = vld [vmem:[%s2912_s22 + $0x110] sm:$0xff] }
  0xf3   : > { %5466 = vst [vmem:[#allocation27_spill] sm:$0xff] %v3728_v3  ;;  %1997 = vmatmul.f32.gmra.mxu2 %v3469_v26  ;;  %v3814_v34 = vpop.f32.mrf.mxu2 }
  0xf4   : > { %2147 = vmatpush.msra.mxu1 %v505_v42  ;;  %2062 = vmatmul.f32.gmra.mxu3 %v3763_v21  ;;  %5473 = vst [vmem:[#allocation33_spill] sm:$0xff] %v3795_v39  ;;  %v707_v39 = vld [vmem:[%s2912_s22 + $0x440] sm:$0xff] }
  0xf5   : > { %1932 = vmatmul.f32.gmra.mxu1 %v3295_v23  ;;  %5475 = vst [vmem:[#allocation35_spill] sm:$0xff] %v3814_v34  ;;  %v555_v23 = vld [vmem:[%s5359_s2 + $0x438] sm:$0xff]  ;;  %2216 = vmatpush.msra.mxu2 %v517_v8  ;;  %v516_v8 = vld [vmem:[%s5359_s2 + $0x300] sm:$0xff] }
  0xf6   : > { %2148 = vmatpush.msra.mxu1 %v504_v25  ;;  %v3850_v34 = vld [vmem:[%s2794_s25 + $0x38] sm:$0xff]  ;;  %v3876_v22 = vpop.f32.mrf.mxu1  ;;  %5509 = vst [vmem:[#allocation68_spill] sm:$0xff] %v4061_v1 }
  0xf7   : > { %2624 = vset.pattern.permute.xlu2 %v5470_v33  ;;  %5479 = vst [vmem:[#allocation39_spill] sm:$0xff] %v3876_v22  ;;  %2217 = vmatpush.msra.mxu2 %v516_v8  ;;  %v3891_v22 = vld [vmem:[%s2912_s22 + $0x410] sm:$0xff] }
  0xf8   : > { %2623 = vset.pattern.permute.xlu1 %v5470_v33  ;;  %v3766_v29 = vpop.permute.xlu1 %889  ;;  %1245 = vperm.xlu2 %2624, %v3769_v56   ;;  %v994_v26 = vpop.permute.xlu2 %993  ;;  %v3785_v33 = vld [vmem:[%s2912_s22 + $0x408] sm:$0xff] }
  0xf9   : > { %5471 = vst [vmem:[#allocation31_spill] sm:$0xff] %v3766_v29  ;;  %v3775_v38 = vadd.f32 %v994_v26, %v3306_v31  ;;  %2630 = vset.pattern.permute.xlu0 %v5371_v5  ;;  %1241 = vperm.xlu1 %2623, %v3779_v47   ;;  %v3782_v42 = vpop.permute.xlu0 %1117  ;;  %v536_v31 = vld [vmem:[%s5359_s2 + $0x3a0] sm:$0xff]  ;;  %v3801_v5 = vadd.f32 %v850_v43, %v3785_v33  ;;  %v503_v43 = vld [vmem:[%s5359_s2 + $0x298] sm:$0xff] }
  0xfa   : > { %1501 = vperm.xlu0 %2630, %v3769_v56   ;;  %v556_v26 = vld [vmem:[%s5359_s2 + $0x440] sm:$0xff]  ;;  %2124 = vmatmul.f32.gmra.mxu0 %v388_v30  ;;  %v535_v30 = vld [vmem:[%s5359_s2 + $0x398] sm:$0xff]  ;;  %v3868_v14 = vpop.f32.mrf.mxu0 }
  0xfb   : > { %2278 = vmatpush.msra.mxu3 %v536_v31  ;;  %2000 = vmatmul.f32.gmra.mxu2 %v3458_v63  ;;  %v3829_v31 = vpop.f32.mrf.mxu3  ;;  %5478 = vst [vmem:[#allocation38_spill] sm:$0xff] %v3868_v14  ;;  %v532_v14 = vld [vmem:[%s5359_s2 + $0x380] sm:$0xff]  ;;  %v3964_v29 = vld [vmem:[%s2912_s22 + $0x78] sm:$0xff] }
  0xfc   : > { %2339 = vmatpush.msra.mxu0 %v556_v26  ;;  %5476 = vst [vmem:[#allocation36_spill] sm:$0xff] %v3829_v31  ;;  %v3835_v26 = vld [vmem:[%s2912_s22 + $0x3c8] sm:$0xff]  ;;  %2149 = vmatpush.msra.mxu1 %v503_v43 }
  0xfd   : > { %2279 = vmatpush.msra.mxu3 %v535_v30  ;;  %v534_v30 = vld [vmem:[%s5359_s2 + $0x390] sm:$0xff]  ;;  %1935 = vmatmul.f32.gmra.mxu1 %v3551_v19  ;;  %v835_v31 = vld [vmem:[%s2912_s22 + $0x448] sm:$0xff]  ;;  %5488 = vst [vmem:[#allocation48_spill] sm:$0xff] %v3964_v29 }
  0xfe   : > { %2340 = vmatpush.msra.mxu0 %v555_v23  ;;  %v554_v23 = vld [vmem:[%s5359_s2 + $0x430] sm:$0xff]  ;;  %2065 = vmatmul.f32.gmra.mxu3 %v3785_v33  ;;  %v553_v43 = vld [vmem:[%s5359_s2 + $0x428] sm:$0xff] }
  0xff   : > { %2280 = vmatpush.msra.mxu3 %v534_v30  ;;  %v501_v19 = vld [vmem:[%s5359_s2 + $0x288] sm:$0xff]  ;;  %v3881_v30 = vpop.f32.mrf.mxu2 }
 0x100   : > { %v3831_v17 = vpop.permute.xlu1 %901  ;;  %1253 = vperm.xlu2 %2624, %v3508_v10   ;;  %v1002_v63 = vpop.permute.xlu2 %1001  ;;  %2341 = vmatpush.msra.mxu0 %v554_v23  ;;  %5480 = vst [vmem:[#allocation40_spill] sm:$0xff] %v3881_v30  ;;  %v552_v23 = vld [vmem:[%s5359_s2 + $0x420] sm:$0xff] }
 0x101   : > { %5477 = vst [vmem:[#allocation37_spill] sm:$0xff] %v3831_v17  ;;  %v3838_v25 = vadd.f32 %v1002_v63, %v3368_v4  ;;  %1249 = vperm.xlu1 %2623, %v3520_v40   ;;  %v3841_v20 = vpop.permute.xlu0 %1137  ;;  %v502_v4 = vld [vmem:[%s5359_s2 + $0x290] sm:$0xff]  ;;  %v533_v63 = vld [vmem:[%s5359_s2 + $0x388] sm:$0xff] }
 0x102   : > { %1521 = vperm.xlu0 %2630, %v3850_v34   ;;  %2127 = vmatmul.f32.gmra.mxu0 %v3835_v26  ;;  %v3928_v3 = vpop.f32.mrf.mxu0 }
 0x103   : > { %2003 = vmatmul.f32.gmra.mxu2 %v835_v31  ;;  %2150 = vmatpush.msra.mxu1 %v502_v4  ;;  %5484 = vst [vmem:[#allocation44_spill] sm:$0xff] %v3928_v3 }
 0x104   : > { %2281 = vmatpush.msra.mxu3 %v533_v63  ;;  %2342 = vmatpush.msra.mxu0 %v553_v43  ;;  %v3897_v63 = vld [vmem:[%s2794_s25 + $0x30] sm:$0xff]  ;;  %v3902_v43 = vpop.f32.mrf.mxu3 }
 0x105   : > { %2151 = vmatpush.msra.mxu1 %v501_v19  ;;  %5482 = vst [vmem:[#allocation42_spill] sm:$0xff] %v3902_v43  ;;  %v500_v19 = vld [vmem:[%s5359_s2 + $0x280] sm:$0xff]  ;;  %v550_v43 = vld [vmem:[%s5359_s2 + $0x410] sm:$0xff] }
 0x106   : > { %2282 = vmatpush.msra.mxu3 %v532_v14  ;;  %2343 = vmatpush.msra.mxu0 %v552_v23  ;;  %v551_v14 = vld [vmem:[%s5359_s2 + $0x418] sm:$0xff] }
 0x107   : > { %2068 = vmatmul.f32.gmra.mxu3 %v963_v54  ;;  %1938 = vmatmul.f32.gmra.mxu1 %v707_v39  ;;  %v549_v54 = vld [vmem:[%s5359_s2 + $0x408] sm:$0xff] }
 0x108   : > { %v3887_v31 = vpop.permute.xlu1 %913  ;;  %1265 = vperm.xlu2 %2624, %v3850_v34   ;;  %v1014_v4 = vpop.permute.xlu2 %1013  ;;  %2152 = vmatpush.msra.mxu1 %v500_v19 }
 0x109   : > { %5481 = vst [vmem:[#allocation41_spill] sm:$0xff] %v3887_v31  ;;  %v3894_v8 = vadd.f32 %v1014_v4, %v3505_v0  ;;  %1261 = vperm.xlu1 %2623, %v3897_v63   ;;  %v3900_v30 = vpop.permute.xlu0 %1149  ;;  %v3912_v0 = vld [vmem:[%s2794_s25 + $0x50] sm:$0xff]  ;;  %2344 = vmatpush.msra.mxu0 %v551_v14  ;;  %v283_v31 = vld [vmem:[%s2912_s22 + $0x38] sm:$0xff]  ;;  %v3935_v19 = vpop.f32.mrf.mxu2  ;;  %v3938_v14 = vld [vmem:[%s2912_s22 + $0x28] sm:$0xff] }
 0x10a   : > { %1533 = vperm.xlu0 %2630, %v3912_v0   ;;  %v3916_v4 = vld [vmem:[%s2912_s22 + $0x30] sm:$0xff]  ;;  %2130 = vmatmul.f32.gmra.mxu0 %v3891_v22  ;;  %v3930_v23 = vpop.f32.mrf.mxu1  ;;  %5486 = vst [vmem:[#allocation46_spill] sm:$0xff] %v3935_v19  ;;  %v3954_v19 = vadd.f32 %v3476_v46, %v3763_v21 }
 0x10b   : > { %5483 = vst [vmem:[#allocation43_spill] sm:$0xff] %v3916_v4  ;;  %2218 = vmatmul.f32.vlgmr.msra.gmra.mxu2 %v3916_v4  ;;  %2345 = vmatpush.msra.mxu0 %v550_v43  ;;  %v293_v4 = vld [vmem:[%s2912_s22 + $0x88] sm:$0xff] }
 0x10c   : > { %5485 = vst [vmem:[#allocation45_spill] sm:$0xff] %v3930_v23  ;;  %v548_v23 = vld [vmem:[%s5359_s2 + $0x400] sm:$0xff]  ;;  %v3969_v46 = vpop.f32.mrf.mxu3 }
 0x10d   : > { %5487 = vst [vmem:[#allocation47_spill] sm:$0xff] %v3938_v14  ;;  %2346 = vmatpush.msra.mxu0 %v549_v54  ;;  %v1174_v54 = vadd.f32 %v3782_v42, %v3319_v57 }
 0x10e   : > { %5489 = vst [vmem:[#allocation49_spill] sm:$0xff] %v3969_v46  ;;  %v3984_v46 = vld [vmem:[%s2912_s22 + $0x40] sm:$0xff] }
 0x10f   : > { %2283 = vmatmul.f32.vlgmr.msra.gmra.mxu3 %v283_v31  ;;  %2153 = vmatmul.f32.vlgmr.msra.gmra.mxu1 %v3938_v14  ;;  %v3975_v31 = vpop.f32.mrf.mxu0  ;;  %5493 = vst [vmem:[#allocation53_spill] sm:$0xff] %v3984_v46 }
 0x110   : > { %1277 = vperm.xlu2 %2624, %v3912_v0   ;;  %v1026_v39 = vpop.permute.xlu2 %1025  ;;  %2347 = vmatpush.msra.mxu0 %v548_v23  ;;  %5490 = vst [vmem:[#allocation50_spill] sm:$0xff] %v3975_v31  ;;  %v3992_v23 = vld [vmem:[%s2794_s25 + $0x60] sm:$0xff]  ;;  %v5373_v31 = vmov 8  }
 0x111   : > { %v3941_v17 = vadd.f32 %v1026_v39, %v3637_v6  ;;  %1273 = vperm.xlu1 %2623, %v3944_v58   ;;  %v990_v43 = vpop.permute.xlu1 %989  ;;  %v3947_v3 = vpop.permute.xlu0 %1161  ;;  %v3960_v39 = vld [vmem:[%s2794_s25 + $0x68] sm:$0xff] }
 0x112   : > { %v1046_v6 = vadd.f32 %v990_v43, %v3265_v51  ;;  %1545 = vperm.xlu0 %2630, %v3960_v39   ;;  %2133 = vmatmul.f32.gmra.mxu0 %v415_v7  ;;  %v3977_v43 = vpop.f32.mrf.mxu1  ;;  %v3986_v28 = vpop.f32.mrf.mxu2 }
 0x113   : > { %2221 = vmatmul.f32.gmra.mxu2 %v3964_v29  ;;  %5491 = vst [vmem:[#allocation51_spill] sm:$0xff] %v3977_v43 }
 0x114   : > { %v1062_v51 = vmax.f32 %v3485_v59, %v1046_v6  ;;  %5494 = vst [vmem:[#allocation54_spill] sm:$0xff] %v3986_v28  ;;  %v3996_v6 = vld [vmem:[%s2912_s22 + $0x70] sm:$0xff]  ;;  %v4009_v28 = vld [vmem:[%s2794_s25] sm:$0xff] }
 0x115   : > { %5495 = vst [vmem:[#allocation55_spill] sm:$0xff] %v3996_v6 }
 0x116   : > { %v3973_v42 = vmax.f32 %v1062_v51, %v1174_v54 }
 0x117   : > { %2286 = vmatmul.f32.gmra.mxu3 %v3980_v49  ;;  %2156 = vmatmul.f32.gmra.mxu1 %v3996_v6 }
 0x118   : > { %1289 = vperm.xlu2 %2624, %v3960_v39   ;;  %v1038_v7 = vpop.permute.xlu2 %1037 }
 0x119   : > { %v3989_v59 = vadd.f32 %v1038_v7, %v3785_v33  ;;  %1285 = vperm.xlu1 %2623, %v3992_v23   ;;  %v998_v54 = vpop.permute.xlu1 %997  ;;  %v4004_v33 = vld [vmem:[%s2912_s22 + $0xc0] sm:$0xff]  ;;  %v4023_v7 = vld [vmem:[%s2912_s22 + $0xc8] sm:$0xff] }
 0x11a   : > { %v1048_v51 = vadd.f32 %v998_v54, %v3339_v53  ;;  %2631 = vset.pattern.permute.xlu0 %v5373_v31  ;;  %v4000_v43 = vpop.permute.xlu0 %1237  ;;  %5497 = vst [vmem:[#allocation57_spill] sm:$0xff] %v4004_v33  ;;  %2348 = vmatmul.f32.vlgmr.msra.gmra.mxu0 %v3984_v46  ;;  %v4013_v54 = vpop.f32.mrf.mxu3 }
 0x11b   : > { %5496 = vst [vmem:[#allocation56_spill] sm:$0xff] %v4000_v43  ;;  %1605 = vperm.xlu0 %2631, %v4009_v28   ;;  %2224 = vmatmul.f32.gmra.mxu2 %v4004_v33  ;;  %v4020_v29 = vpop.f32.mrf.mxu1  ;;  %v4027_v46 = vpop.f32.mrf.mxu2  ;;  %v302_v33 = vld [vmem:[%s2912_s22 + $0xd0] sm:$0xff] }
 0x11c   : > { %5498 = vst [vmem:[#allocation58_spill] sm:$0xff] %v4013_v54  ;;  %v1064_v31 = vmax.f32 %v3533_v11, %v1048_v51 }
 0x11d   : > { %v4018_v49 = vpop.f32.mrf.mxu0  ;;  %5500 = vst [vmem:[#allocation60_spill] sm:$0xff] %v4020_v29  ;;  %v1179_v29 = vadd.f32 %v3841_v20, %v3512_v35 }
 0x11e   : > { %5499 = vst [vmem:[#allocation59_spill] sm:$0xff] %v4018_v49  ;;  %v4037_v49 = vld [vmem:[%s2912_s22 + $0xb8] sm:$0xff] }
 0x11f   : > { %5501 = vst [vmem:[#allocation61_spill] sm:$0xff] %v4023_v7  ;;  %2289 = vmatmul.f32.gmra.mxu3 %v4023_v7  ;;  %2159 = vmatmul.f32.gmra.mxu1 %v4037_v49 }
 0x120   : > { %2625 = vset.pattern.permute.xlu2 %v5502_v55  ;;  %5503 = vst [vmem:[#allocation62_spill] sm:$0xff] %v4027_v46  ;;  %v4046_v46 = vld [vmem:[%s2912_s22 + $0x108] sm:$0xff] }
 0x121   : > { %1297 = vperm.xlu1 %2623, %v4030_v37   ;;  %v1010_v11 = vpop.permute.xlu1 %1009  ;;  %1365 = vperm.xlu2 %2625, %v4009_v28   ;;  %v4034_v51 = vpop.permute.xlu2 %1113  ;;  %5505 = vst [vmem:[#allocation64_spill] sm:$0xff] %v4046_v46 }
 0x122   : > { %5504 = vst [vmem:[#allocation63_spill] sm:$0xff] %v4034_v51  ;;  %v1051_v54 = vadd.f32 %v1010_v11, %v3461_v52  ;;  %v4042_v6 = vpop.permute.xlu0 %1257  ;;  %2351 = vmatmul.f32.gmra.mxu0 %v293_v4  ;;  %v4049_v51 = vpop.f32.mrf.mxu3 }
 0x123   : > { %1625 = vperm.xlu0 %2631, %v3563_v12   ;;  %5506 = vst [vmem:[#allocation65_spill] sm:$0xff] %v4049_v51  ;;  %2227 = vmatmul.f32.gmra.mxu2 %v4046_v46  ;;  %v4058_v14 = vpop.f32.mrf.mxu1  ;;  %v4064_v7 = vpop.f32.mrf.mxu2  ;;  %v4097_v46 = vld [vmem:[%s2912_s22 + $0x158] sm:$0xff] }
 0x124   : > { %v1067_v43 = vmax.f32 %v3573_v44, %v1051_v54  ;;  %5508 = vst [vmem:[#allocation67_spill] sm:$0xff] %v4058_v14  ;;  %v4069_v54 = vld [vmem:[%s2912_s22 + $0x100] sm:$0xff] }
 0x125   : > { %v4056_v11 = vpop.f32.mrf.mxu0  ;;  %5510 = vst [vmem:[#allocation69_spill] sm:$0xff] %v4064_v7 }
 0x126   : > { %v4054_v20 = vmax.f32 %v1067_v43, %v1179_v29  ;;  %5507 = vst [vmem:[#allocation66_spill] sm:$0xff] %v4056_v11  ;;  %v1182_v29 = vadd.f32 %v3900_v30, %v3643_v61 }
 0x127   : > { %2292 = vmatmul.f32.gmra.mxu3 %v4061_v1  ;;  %2162 = vmatmul.f32.gmra.mxu1 %v4069_v54  ;;  %5514 = vst [vmem:[#allocation73_spill] sm:$0xff] %v4097_v46 }
 0x129   : > { %2627 = vset.pattern.permute.xlu1 %v5502_v55  ;;  %v1022_v4 = vpop.permute.xlu1 %1021  ;;  %1377 = vperm.xlu2 %2625, %v3520_v40   ;;  %v1126_v44 = vpop.permute.xlu2 %1125  ;;  %v4080_v55 = vld [vmem:[%s2912_s22 + $0x150] sm:$0xff] }
 0x12a   : > { %v1054_v43 = vadd.f32 %v1022_v4, %v3593_v48  ;;  %v1176_v11 = vadd.f32 %v1126_v44, %v3377_v62  ;;  %1373 = vperm.xlu1 %2627, %v3769_v56   ;;  %v4076_v51 = vpop.permute.xlu0 %1269  ;;  %2354 = vmatmul.f32.gmra.mxu0 %v302_v33  ;;  %v4083_v7 = vpop.f32.mrf.mxu3  ;;  %v311_v33 = vld [vmem:[%s2912_s22 + $0x118] sm:$0xff]  ;;  %v2653_v56 = vld [vmem:[%s2912_s22 + $0xa8] sm:$0xff] }
 0x12b   : > { %1637 = vperm.xlu0 %2631, %v3599_v50   ;;  %5511 = vst [vmem:[#allocation70_spill] sm:$0xff] %v4083_v7  ;;  %2230 = vmatmul.f32.gmra.mxu2 %v4080_v55  ;;  %v4094_v1 = vpop.f32.mrf.mxu1 }
 0x12c   : > { %v1070_v30 = vmax.f32 %v3615_v16, %v1054_v43  ;;  %v4086_v4 = vmax.f32 %v1064_v31, %v1176_v11  ;;  %5513 = vst [vmem:[#allocation72_spill] sm:$0xff] %v4094_v1  ;;  %v4100_v7 = vpop.f32.mrf.mxu2  ;;  %v966_v16 = vadd.f32 %v2653_v56, %v3332_v2  ;;  %v1185_v43 = vadd.f32 %v3947_v3, %v3835_v26  ;;  %v4118_v2 = vld [vmem:[%s2912_s22 + $0x198] sm:$0xff] }
 0x12d   : > { %v4092_v14 = vpop.f32.mrf.mxu0  ;;  %5515 = vst [vmem:[#allocation74_spill] sm:$0xff] %v4100_v7 }
 0x12e   : > { %v4090_v44 = vmax.f32 %v1070_v30, %v1182_v29  ;;  %5512 = vst [vmem:[#allocation71_spill] sm:$0xff] %v4092_v14  ;;  %v4108_v29 = vld [vmem:[%s2912_s22 + $0x148] sm:$0xff]  ;;  %v1094_v7 = vadd.f32 %v966_v16, %v3319_v57 }
 0x12f   : > { %2295 = vmatmul.f32.gmra.mxu3 %v4097_v46  ;;  %2165 = vmatmul.f32.gmra.mxu1 %v4108_v29 }
 0x131   : > { %v1034_v31 = vpop.permute.xlu1 %1033  ;;  %1385 = vperm.xlu2 %2625, %v3563_v12   ;;  %v4105_v11 = vpop.permute.xlu2 %1133 }
 0x132   : > { %5516 = vst [vmem:[#allocation75_spill] sm:$0xff] %v4105_v11  ;;  %v1057_v30 = vadd.f32 %v1034_v31, %v3763_v21  ;;  %1381 = vperm.xlu1 %2627, %v3508_v10   ;;  %v4114_v1 = vpop.permute.xlu0 %1281  ;;  %2357 = vmatmul.f32.gmra.mxu0 %v311_v33  ;;  %v4121_v56 = vpop.f32.mrf.mxu3  ;;  %v5518_v21 = vld [vmem:[#allocation9_spill] sm:$0xff]  ;;  %v4136_v33 = vld [vmem:[%s2912_s22 + $0x1a0] sm:$0xff] }
 0x133   : > { %1649 = vperm.xlu0 %2631, %v3652_v60   ;;  %5517 = vst [vmem:[#allocation76_spill] sm:$0xff] %v4121_v56  ;;  %v968_v31 = vadd.f32 %v5518_v21, %v3339_v53  ;;  %2233 = vmatmul.f32.gmra.mxu2 %v4118_v2  ;;  %v4133_v46 = vpop.f32.mrf.mxu1  ;;  %v1209_v53 = vld [vmem:[%s2912_s22 + $0x190] sm:$0xff] }
 0x134   : > { %v1073_v3 = vmax.f32 %v3673_v24, %v1057_v30  ;;  %5520 = vst [vmem:[#allocation77_spill] sm:$0xff] %v4133_v46  ;;  %v4139_v24 = vadd.f32 %v1094_v7, %v4037_v49  ;;  %v320_v30 = vld [vmem:[%s2912_s22 + $0x160] sm:$0xff]  ;;  %v4142_v56 = vpop.f32.mrf.mxu2  ;;  %v1079_v46 = vld [vmem:[%s2912_s22 + $0xf8] sm:$0xff] }
 0x135   : > { %v4131_v11 = vpop.f32.mrf.mxu0  ;;  %5521 = vst [vmem:[#allocation78_spill] sm:$0xff] %v4136_v33  ;;  %v1096_v21 = vadd.f32 %v968_v31, %v3377_v62  ;;  %v4156_v7 = vld [vmem:[%s2912_s22 + $0x1e0] sm:$0xff] }
 0x136   : > { %v4129_v14 = vmax.f32 %v1073_v3, %v1185_v43  ;;  %5519 = vst [vmem:[#allocation9_spill] sm:$0xff] %v4131_v11 }
 0x137   : > { %5522 = vst [vmem:[#allocation79_spill] sm:$0xff] %v4139_v24  ;;  %2298 = vmatmul.f32.gmra.mxu3 %v4136_v33  ;;  %2168 = vmatmul.f32.gmra.mxu1 %v1209_v53  ;;  %v4163_v3 = vadd.f32 %v1096_v21, %v4108_v29  ;;  %v4174_v24 = vld [vmem:[%s2912_s22 + $0x1a8] sm:$0xff]  ;;  %v4184_v21 = vld [vmem:[%s2912_s22 + $0x1d8] sm:$0xff] }
 0x138   : > { %5523 = vst [vmem:[#allocation80_spill] sm:$0xff] %v4142_v56  ;;  %v4170_v56 = vld [vmem:[%s2912_s22 + $0x1e8] sm:$0xff] }
 0x139   : > { %1397 = vperm.xlu2 %2625, %v3599_v50   ;;  %v4147_v57 = vpop.permute.xlu2 %1145  ;;  %5525 = vst [vmem:[#allocation82_spill] sm:$0xff] %v4156_v7 }
 0x13a   : > { %5524 = vst [vmem:[#allocation81_spill] sm:$0xff] %v4147_v57  ;;  %1393 = vperm.xlu1 %2627, %v3850_v34   ;;  %v4150_v16 = vpop.permute.xlu1 %1109  ;;  %v4152_v43 = vpop.permute.xlu0 %1293  ;;  %2360 = vmatmul.f32.gmra.mxu0 %v320_v30  ;;  %v5533_v30 = vld [vmem:[#allocation11_spill] sm:$0xff] }
 0x13b   : > { %1661 = vperm.xlu0 %2631, %v3711_v45   ;;  %v4159_v62 = vpop.f32.mrf.mxu3  ;;  %2236 = vmatmul.f32.gmra.mxu2 %v4156_v7  ;;  %5527 = vst [vmem:[#allocation84_spill] sm:$0xff] %v4163_v3  ;;  %v4167_v11 = vpop.f32.mrf.mxu1 }
 0x13c   : > { %5526 = vst [vmem:[#allocation83_spill] sm:$0xff] %v4159_v62  ;;  %v971_v62 = vadd.f32 %v5533_v30, %v3461_v52 }
 0x13d   : > { %v4165_v31 = vpop.f32.mrf.mxu0  ;;  %5529 = vst [vmem:[#allocation86_spill] sm:$0xff] %v4167_v11  ;;  %v4176_v33 = vpop.f32.mrf.mxu2 }
 0x13e   : > { %5528 = vst [vmem:[#allocation85_spill] sm:$0xff] %v4165_v31  ;;  %v4189_v31 = vld [vmem:[%s2912_s22 + $0x228] sm:$0xff] }
 0x13f   : > { %5530 = vst [vmem:[#allocation87_spill] sm:$0xff] %v4170_v56  ;;  %2301 = vmatmul.f32.gmra.mxu3 %v4170_v56  ;;  %2171 = vmatmul.f32.gmra.mxu1 %v4184_v21 }
 0x140   : > { %5531 = vst [vmem:[#allocation88_spill] sm:$0xff] %v4174_v24 }
 0x141   : > { %5532 = vst [vmem:[#allocation89_spill] sm:$0xff] %v4176_v33  ;;  %1409 = vperm.xlu2 %2625, %v3652_v60   ;;  %v4181_v57 = vpop.permute.xlu2 %1157  ;;  %v5536_v33 = vmov 0  }
 0x142   : > { %5534 = vst [vmem:[#allocation11_spill] sm:$0xff] %v4181_v57  ;;  %1405 = vperm.xlu1 %2627, %v3912_v0   ;;  %v1122_v3 = vpop.permute.xlu1 %1121  ;;  %2363 = vmatmul.f32.gmra.mxu0 %v4174_v24  ;;  %v5539_v57 = vmax.f32 %v3684_v13, %v3775_v38  ;;  %v4209_v24 = vld [vmem:[%s2912_s22 + $0x220] sm:$0xff]  ;;  %v1081_v38 = vld [vmem:[%s2912_s22 + $0x188] sm:$0xff] }
 0x143   : > { %5535 = vst [vmem:[#allocation90_spill] sm:$0xff] %v4184_v21  ;;  %v1175_v11 = vadd.f32 %v1122_v3, %v1079_v46  ;;  %2634 = vset.pattern.permute.xlu0 %v5536_v33  ;;  %v4192_v52 = vpop.permute.xlu0 %1369  ;;  %v4195_v30 = vpop.f32.mrf.mxu3  ;;  %2239 = vmatmul.f32.gmra.mxu2 %v4189_v31  ;;  %v1099_v46 = vadd.f32 %v971_v62, %v3512_v35  ;;  %v5540_v3 = vld [vmem:[#allocation13_spill] sm:$0xff] }
 0x144   : > { %5537 = vst [vmem:[#allocation91_spill] sm:$0xff] %v4192_v52  ;;  %598 = vperm.xlu0 %2634, %v4009_v28   ;;  %v974_v7 = vadd.f32 %v5540_v3, %v3593_v48  ;;  %v4213_v52 = vpop.f32.mrf.mxu1  ;;  %v4216_v21 = vld [vmem:[%s2912_s22 + $0x230] sm:$0xff]  ;;  %v4237_v3 = vadd.f32 %v4042_v6, %v1209_v53  ;;  %v5549_v6 = vmax.f32 %v3450_v36, %v3838_v25  ;;  %v4272_v36 = vld [vmem:[%s2912_s22 + $0x238] sm:$0xff] }
 0x145   : > { %5538 = vst [vmem:[#allocation92_spill] sm:$0xff] %v4195_v30  ;;  %v4202_v56 = vmax.f32 %v5539_v57, %v1175_v11  ;;  %v4219_v13 = vadd.f32 %v1099_v46, %v4209_v24  ;;  %v4223_v11 = vld [vmem:[%s2912_s22 + $0x1f0] sm:$0xff]  ;;  %v4225_v57 = vpop.f32.mrf.mxu2 }
 0x146   : > { %v4211_v30 = vpop.f32.mrf.mxu0  ;;  %5542 = vst [vmem:[#allocation93_spill] sm:$0xff] %v4213_v52  ;;  %v4233_v62 = vld [vmem:[%s2912_s22 + $0x270] sm:$0xff]  ;;  %v1102_v46 = vadd.f32 %v974_v7, %v3643_v61 }
 0x147   : > { %5541 = vst [vmem:[#allocation13_spill] sm:$0xff] %v4211_v30  ;;  %2304 = vmatmul.f32.gmra.mxu3 %v4216_v21  ;;  %2174 = vmatmul.f32.gmra.mxu1 %v4209_v24 }
 0x148   : > { %5543 = vst [vmem:[#allocation94_spill] sm:$0xff] %v4219_v13  ;;  %v4243_v13 = vld [vmem:[%s2912_s22 + $0x2f8] sm:$0xff] }
 0x149   : > { %5544 = vst [vmem:[#allocation95_spill] sm:$0xff] %v4223_v11  ;;  %1421 = vperm.xlu2 %2625, %v3711_v45   ;;  %v4228_v35 = vpop.permute.xlu2 %1169  ;;  %v4250_v61 = vadd.f32 %v4243_v13, %v1102_v46 }
 0x14a   : > { %5545 = vst [vmem:[#allocation96_spill] sm:$0xff] %v4225_v57  ;;  %1417 = vperm.xlu1 %2627, %v3960_v39   ;;  %v1130_v48 = vpop.permute.xlu1 %1129  ;;  %2366 = vmatmul.f32.gmra.mxu0 %v4223_v11  ;;  %v1212_v11 = vld [vmem:[%s2912_s22 + $0x268] sm:$0xff] }
 0x14b   : > { %5546 = vst [vmem:[#allocation97_spill] sm:$0xff] %v4228_v35  ;;  %v1177_v52 = vadd.f32 %v1130_v48, %v1081_v38  ;;  %v4239_v57 = vpop.permute.xlu0 %1389  ;;  %v4247_v30 = vpop.f32.mrf.mxu3  ;;  %2242 = vmatmul.f32.gmra.mxu2 %v4233_v62  ;;  %v1105_v48 = vadd.f32 %v3954_v19, %v3835_v26  ;;  %v4293_v35 = vld [vmem:[%s2912_s22 + $0x3d0] sm:$0xff]  ;;  %v4332_v19 = vld [vmem:[%s2912_s22 + $0x300] sm:$0xff] }
 0x14c   : > { %603 = vperm.xlu0 %2634, %v3779_v47   ;;  %5547 = vst [vmem:[#allocation98_spill] sm:$0xff] %v4247_v30  ;;  %v4260_v38 = vpop.f32.mrf.mxu1  ;;  %v4266_v30 = vld [vmem:[%s2912_s22 + $0x278] sm:$0xff] }
 0x14d   : > { %5548 = vst [vmem:[#allocation99_spill] sm:$0xff] %v4250_v61  ;;  %v4255_v53 = vmax.f32 %v5549_v6, %v1177_v52  ;;  %v4268_v46 = vpop.f32.mrf.mxu2  ;;  %v5554_v61 = vmov 7   ;;  %v4277_v6 = vld [vmem:[%s2912_s22 + $0x2b8] sm:$0xff] }
 0x14e   : > { %v4258_v7 = vpop.f32.mrf.mxu0  ;;  %5551 = vst [vmem:[#allocation101_spill] sm:$0xff] %v4260_v38 }
 0x14f   : > { %5550 = vst [vmem:[#allocation100_spill] sm:$0xff] %v4258_v7  ;;  %v4282_v7 = vadd.f32 %v4076_v51, %v1212_v11  ;;  %2307 = vmatmul.f32.gmra.mxu3 %v4266_v30  ;;  %2177 = vmatmul.f32.gmra.mxu1 %v1212_v11 }
 0x150   : > { %5552 = vst [vmem:[#allocation102_spill] sm:$0xff] %v4266_v30 }
 0x151   : > { %5553 = vst [vmem:[#allocation103_spill] sm:$0xff] %v4268_v46  ;;  %2629 = vset.pattern.permute.xlu2 %v5554_v61 }
 0x152   : > { %5555 = vst [vmem:[#allocation104_spill] sm:$0xff] %v4272_v36  ;;  %2628 = vset.pattern.permute.xlu1 %v5554_v61  ;;  %v1142_v25 = vpop.permute.xlu1 %1141  ;;  %1497 = vperm.xlu2 %2629, %v3779_v47   ;;  %v1246_v52 = vpop.permute.xlu2 %1245 }
 0x153   : > { %v1180_v46 = vadd.f32 %v1142_v25, %v3556_v18  ;;  %v4286_v38 = vadd.f32 %v1246_v52, %v4037_v49  ;;  %1493 = vperm.xlu1 %2628, %v4009_v28   ;;  %v4289_v61 = vpop.permute.xlu0 %1401  ;;  %2369 = vmatmul.f32.gmra.mxu0 %v4272_v36  ;;  %v4297_v26 = vpop.f32.mrf.mxu3  ;;  %v4300_v18 = vadd.f32 %v4293_v35, %v1105_v48  ;;  %v4317_v52 = vld [vmem:[%s2912_s22 + $0x340] sm:$0xff] }
 0x154   : > { %628 = vperm.xlu0 %2634, %v3897_v63   ;;  %5556 = vst [vmem:[#allocation105_spill] sm:$0xff] %v4297_v26  ;;  %v5558_v49 = vmax.f32 %v3501_v27, %v3894_v8  ;;  %2245 = vmatmul.f32.gmra.mxu2 %v4277_v6  ;;  %v4312_v25 = vpop.f32.mrf.mxu1  ;;  %v4325_v8 = vld [vmem:[%s2912_s22 + $0x280] sm:$0xff] }
 0x155   : > { %5557 = vst [vmem:[#allocation106_spill] sm:$0xff] %v4300_v18  ;;  %v4320_v18 = vld [vmem:[%s2912_s22 + $0x2c0] sm:$0xff]  ;;  %v4322_v27 = vpop.f32.mrf.mxu2 }
 0x156   : > { %v4305_v28 = vmax.f32 %v5558_v49, %v1180_v46  ;;  %v4310_v51 = vpop.f32.mrf.mxu0  ;;  %5560 = vst [vmem:[#allocation108_spill] sm:$0xff] %v4312_v25  ;;  %v4329_v49 = vld [vmem:[%s2912_s22 + $0x2b0] sm:$0xff] }
 0x157   : > { %5559 = vst [vmem:[#allocation107_spill] sm:$0xff] %v4310_v51  ;;  %v4336_v51 = vadd.f32 %v4114_v1, %v4317_v52  ;;  %2310 = vmatmul.f32.gmra.mxu3 %v4320_v18  ;;  %2180 = vmatmul.f32.gmra.mxu1 %v4329_v49 }
 0x158   : > { %5561 = vst [vmem:[#allocation109_spill] sm:$0xff] %v4320_v18 }
 0x159   : > { %5562 = vst [vmem:[#allocation110_spill] sm:$0xff] %v4322_v27 }
 0x15a   : > { %5563 = vst [vmem:[#allocation111_spill] sm:$0xff] %v4325_v8  ;;  %v1154_v46 = vpop.permute.xlu1 %1153  ;;  %1509 = vperm.xlu2 %2629, %v3508_v10   ;;  %v1254_v11 = vpop.permute.xlu2 %1253 }
 0x15b   : > { %v1183_v48 = vadd.f32 %v1154_v46, %v3706_v9  ;;  %v4340_v26 = vadd.f32 %v1254_v11, %v4108_v29  ;;  %1505 = vperm.xlu1 %2628, %v3520_v40   ;;  %v4343_v10 = vpop.permute.xlu0 %1413  ;;  %2372 = vmatmul.f32.gmra.mxu0 %v4325_v8  ;;  %v4348_v1 = vpop.f32.mrf.mxu3  ;;  %v5566_v46 = vmax.f32 %v3548_v15, %v3941_v17  ;;  %v4371_v15 = vld [vmem:[%s2912_s22 + $0x2c8] sm:$0xff]  ;;  %v4374_v17 = vld [vmem:[%s2912_s22 + $0x418] sm:$0xff] }
 0x15c   : > { %5564 = vst [vmem:[#allocation112_spill] sm:$0xff] %v4343_v10  ;;  %643 = vperm.xlu0 %2634, %v3944_v58   ;;  %2248 = vmatmul.f32.gmra.mxu2 %v4332_v19  ;;  %v4361_v27 = vpop.f32.mrf.mxu1  ;;  %v4378_v40 = vld [vmem:[%s2912_s22 + $0x348] sm:$0xff] }
 0x15d   : > { %5565 = vst [vmem:[#allocation113_spill] sm:$0xff] %v4348_v1  ;;  %v4353_v29 = vmax.f32 %v5566_v46, %v1183_v48  ;;  %v4366_v1 = vld [vmem:[%s2912_s22 + $0x308] sm:$0xff] }
 0x15e   : > { %v4359_v11 = vpop.f32.mrf.mxu0  ;;  %5568 = vst [vmem:[#allocation115_spill] sm:$0xff] %v4361_v27  ;;  %v4368_v36 = vpop.f32.mrf.mxu2 }
 0x15f   : > { %5567 = vst [vmem:[#allocation114_spill] sm:$0xff] %v4359_v11  ;;  %2313 = vmatmul.f32.gmra.mxu3 %v4366_v1  ;;  %2183 = vmatmul.f32.gmra.mxu1 %v4243_v13 }
 0x160   : > { %5569 = vst [vmem:[#allocation116_spill] sm:$0xff] %v4368_v36 }
 0x161   : > { %5570 = vst [vmem:[#allocation117_spill] sm:$0xff] %v4371_v15 }
 0x162   : > { %v1166_v48 = vpop.permute.xlu1 %1165  ;;  %1517 = vperm.xlu2 %2629, %v3897_v63   ;;  %v1266_v46 = vpop.permute.xlu2 %1265 }
 0x163   : > { %v1186_v11 = vadd.f32 %v1166_v48, %v3891_v22  ;;  %v4382_v27 = vadd.f32 %v1266_v46, %v4209_v24  ;;  %1513 = vperm.xlu1 %2628, %v3563_v12   ;;  %v4385_v25 = vpop.permute.xlu0 %1425  ;;  %2375 = vmatmul.f32.gmra.mxu0 %v4371_v15  ;;  %v4390_v36 = vpop.f32.mrf.mxu3  ;;  %v4394_v48 = vadd.f32 %v4152_v43, %v4374_v17 }
 0x164   : > { %5571 = vst [vmem:[#allocation118_spill] sm:$0xff] %v4385_v25  ;;  %658 = vperm.xlu0 %2634, %v3992_v23   ;;  %v5573_v24 = vmax.f32 %v3589_v32, %v3989_v59  ;;  %2251 = vmatmul.f32.gmra.mxu2 %v4378_v40  ;;  %v4407_v15 = vpop.f32.mrf.mxu1  ;;  %v4417_v32 = vld [vmem:[%s2912_s22 + $0x310] sm:$0xff] }
 0x165   : > { %5572 = vst [vmem:[#allocation119_spill] sm:$0xff] %v4390_v36  ;;  %v4412_v36 = vld [vmem:[%s2912_s22 + $0x350] sm:$0xff] }
 0x166   : > { %v4399_v12 = vmax.f32 %v5573_v24, %v1186_v11  ;;  %v4405_v25 = vpop.f32.mrf.mxu0  ;;  %5575 = vst [vmem:[#allocation121_spill] sm:$0xff] %v4407_v15  ;;  %v4414_v10 = vpop.f32.mrf.mxu2  ;;  %v4420_v59 = vld [vmem:[%s2912_s22 + $0x390] sm:$0xff]  ;;  %v1701_v15 = vld [vmem:[%s4444_s8 + $0x8] sm:$0xff] }
 0x167   : > { %5574 = vst [vmem:[#allocation120_spill] sm:$0xff] %v4405_v25  ;;  %2316 = vmatmul.f32.gmra.mxu3 %v4412_v36  ;;  %2186 = vmatmul.f32.gmra.mxu1 %v4317_v52 }
 0x168   : > { %5576 = vst [vmem:[#allocation122_spill] sm:$0xff] %v4412_v36  ;;  %v4461_v36 = vld [vmem:[%s2912_s22 + $0x388] sm:$0xff] }
 0x169   : > { %5577 = vst [vmem:[#allocation123_spill] sm:$0xff] %v4414_v10  ;;  %v4451_v10 = vld [vmem:[%s2912_s22 + $0x398] sm:$0xff] }
 0x16a   : > { %5578 = vst [vmem:[#allocation124_spill] sm:$0xff] %v4417_v32  ;;  %1529 = vperm.xlu2 %2629, %v3944_v58   ;;  %v1278_v11 = vpop.permute.xlu2 %1277 }
 0x16b   : > { %5579 = vst [vmem:[#allocation125_spill] sm:$0xff] %v4420_v59  ;;  %v4424_v24 = vadd.f32 %v1278_v11, %v4243_v13  ;;  %1525 = vperm.xlu1 %2628, %v3599_v50   ;;  %v4427_v46 = vpop.permute.xlu1 %1241  ;;  %2378 = vmatmul.f32.gmra.mxu0 %v4417_v32  ;;  %v4434_v25 = vpop.f32.mrf.mxu3  ;;  %v4457_v13 = vld [vmem:[%s2912_s22 + $0x358] sm:$0xff] }
 0x16c   : > { %673 = vperm.xlu0 %2634, %v4030_v37   ;;  %v4431_v43 = vpop.permute.xlu0 %1501  ;;  %5580 = vst [vmem:[#allocation126_spill] sm:$0xff] %v4434_v25  ;;  %2254 = vmatmul.f32.gmra.mxu2 %v4420_v59  ;;  %v4448_v11 = vpop.f32.mrf.mxu1  ;;  %v4464_v59 = vld [vmem:[%s2912_s22 + $0x3d8] sm:$0xff] }
 0x16d   : > { %5582 = vst [vmem:[#allocation128_spill] sm:$0xff] %v4448_v11 }
 0x16e   : > { %v4446_v50 = vpop.f32.mrf.mxu0  ;;  %5583 = vst [vmem:[#allocation129_spill] sm:$0xff] %v4451_v10  ;;  %v4453_v25 = vpop.f32.mrf.mxu2 }
 0x16f   : > { %5581 = vst [vmem:[#allocation127_spill] sm:$0xff] %v4446_v50  ;;  %2319 = vmatmul.f32.gmra.mxu3 %v4451_v10  ;;  %2189 = vmatmul.f32.gmra.mxu1 %v4461_v36  ;;  %v4489_v10 = vld [vmem:[%s2912_s22 + $0x3e0] sm:$0xff] }
 0x170   : > { %5584 = vst [vmem:[#allocation130_spill] sm:$0xff] %v4453_v25 }
 0x171   : > { %5585 = vst [vmem:[#allocation131_spill] sm:$0xff] %v4457_v13 }
 0x172   : > { %1541 = vperm.xlu2 %2629, %v3992_v23   ;;  %v1290_v32 = vpop.permute.xlu2 %1289  ;;  %5586 = vst [vmem:[#allocation132_spill] sm:$0xff] %v4461_v36  ;;  %v4544_v36 = vld [vmem:[%s2912_s22 + $0x468] sm:$0xff] }
 0x173   : > { %v4467_v8 = vadd.f32 %v1290_v32, %v4293_v35  ;;  %1537 = vperm.xlu1 %2628, %v3652_v60   ;;  %v1250_v50 = vpop.permute.xlu1 %1249  ;;  %2381 = vmatmul.f32.gmra.mxu0 %v4457_v13  ;;  %v4475_v30 = vpop.f32.mrf.mxu3  ;;  %v1706_v13 = vld [vmem:[%s4444_s8 + $0x30] sm:$0xff]  ;;  %v4499_v32 = vld [vmem:[%s2912_s22 + $0x420] sm:$0xff] }
 0x174   : > { %v1303_v25 = vadd.f32 %v1250_v50, %v4069_v54  ;;  %1723 = vperm.xlu0 %2634, %v1701_v15   ;;  %v4472_v11 = vpop.permute.xlu0 %1521  ;;  %5587 = vst [vmem:[#allocation133_spill] sm:$0xff] %v4475_v30  ;;  %2257 = vmatmul.f32.gmra.mxu2 %v4464_v59  ;;  %v1103_v54 = vadd.f32 %v3745_v41, %v3706_v9  ;;  %v4486_v50 = vpop.f32.mrf.mxu1  ;;  %v4493_v30 = vld [vmem:[%s2912_s22 + $0x3a0] sm:$0xff] }
 0x175   : > { %5589 = vst [vmem:[#allocation135_spill] sm:$0xff] %v4486_v50  ;;  %v1106_v50 = vadd.f32 %v3801_v5, %v3891_v22 }
 0x176   : > { %v1319_v60 = vmax.f32 %v4202_v56, %v1303_v25  ;;  %5590 = vst [vmem:[#allocation136_spill] sm:$0xff] %v4493_v30  ;;  %v4495_v18 = vpop.f32.mrf.mxu2  ;;  %v1231_v41 = vadd.f32 %v4317_v52, %v1103_v54 }
 0x177   : > { %v4484_v15 = vpop.f32.mrf.mxu0  ;;  %5591 = vst [vmem:[#allocation137_spill] sm:$0xff] %v4495_v18  ;;  %2322 = vmatmul.f32.gmra.mxu3 %v4489_v10  ;;  %2192 = vmatmul.f32.gmra.mxu1 %v4293_v35  ;;  %v4529_v35 = vld [vmem:[%s2912_s22 + $0x428] sm:$0xff]  ;;  %v1234_v5 = vadd.f32 %v4374_v17, %v1106_v50 }
 0x178   : > { %5588 = vst [vmem:[#allocation134_spill] sm:$0xff] %v4484_v15 }
 0x179   : > { %5598 = vst [vmem:[#allocation143_spill] sm:$0xff] %v4529_v35  ;;  %v4551_v50 = vadd.f32 %v1234_v5, %v4499_v32 }
 0x17a   : > { %1553 = vperm.xlu2 %2629, %v4030_v37  }
 0x17b   : > { %1549 = vperm.xlu1 %2628, %v3711_v45   ;;  %v4502_v56 = vpop.permute.xlu1 %1261  ;;  %v4504_v9 = vpop.permute.xlu2 %1365  ;;  %2384 = vmatmul.f32.gmra.mxu0 %v4493_v30  ;;  %v4516_v45 = vadd.f32 %v1231_v41, %v4378_v40  ;;  %v5597_v30 = vmov 8   ;;  %5604 = vst [vmem:[#allocation145_spill] sm:$0xff] %v4551_v50  ;;  %v2655_v50 = vld [vmem:[%s2794_s25 + $0x18] sm:$0xff] }
 0x17c   : > { %1748 = vperm.xlu0 %2634, %v1706_v13   ;;  %v4508_v25 = vpop.permute.xlu0 %1533  ;;  %v4512_v18 = vpop.f32.mrf.mxu3  ;;  %2260 = vmatmul.f32.gmra.mxu2 %v4499_v32  ;;  %v1709_v13 = vld [vmem:[%s4444_s8 + $0x48] sm:$0xff] }
 0x17d   : > { %5592 = vst [vmem:[#allocation138_spill] sm:$0xff] %v4512_v18  ;;  %v4522_v52 = vpop.f32.mrf.mxu1  ;;  %v4532_v18 = vld [vmem:[%s2912_s22 + $0x3e8] sm:$0xff] }
 0x17e   : > { %5593 = vst [vmem:[#allocation139_spill] sm:$0xff] %v4516_v45  ;;  %v4525_v54 = vpop.f32.mrf.mxu2  ;;  %v5600_v45 = vld [vmem:[#allocation32_spill] sm:$0xff] }
 0x17f   : > { %v4520_v15 = vpop.f32.mrf.mxu0  ;;  %5595 = vst [vmem:[#allocation141_spill] sm:$0xff] %v4522_v52  ;;  %2325 = vmatmul.f32.gmra.mxu3 %v4529_v35  ;;  %2195 = vmatmul.f32.gmra.mxu1 %v4374_v17  ;;  %v4574_v17 = vld [vmem:[%s2912_s22 + $0x460] sm:$0xff] }
 0x180   : > { %5594 = vst [vmem:[#allocation140_spill] sm:$0xff] %v4520_v15  ;;  %v5601_v15 = vld [vmem:[#allocation64_spill] sm:$0xff] }
 0x181   : > { %5596 = vst [vmem:[#allocation142_spill] sm:$0xff] %v4525_v54 }
 0x182   : > { %2633 = vset.pattern.permute.xlu2 %v5597_v30  ;;  %5599 = vst [vmem:[#allocation144_spill] sm:$0xff] %v4532_v18 }
 0x183   : > { %2632 = vset.pattern.permute.xlu1 %v5597_v30  ;;  %v4535_v41 = vpop.permute.xlu1 %1273  ;;  %1613 = vperm.xlu2 %2633, %v5600_v45   ;;  %v1378_v22 = vpop.permute.xlu2 %1377  ;;  %5602 = vst [vmem:[#allocation32_spill] sm:$0xff] %v4544_v36 }
 0x184   : > { %v1431_v52 = vadd.f32 %v1378_v22, %v5601_v15  ;;  %1763 = vperm.xlu0 %2634, %v1709_v13   ;;  %1609 = vperm.xlu1 %2632, %v3779_v47   ;;  %v4541_v54 = vpop.permute.xlu0 %1545  ;;  %v4548_v30 = vpop.f32.mrf.mxu3  ;;  %v1712_v13 = vld [vmem:[%s4444_s8 + $0x60] sm:$0xff] }
 0x185   : > { %2387 = vmatmul.f32.gmra.mxu0 %v4532_v18  ;;  %5603 = vst [vmem:[#allocation64_spill] sm:$0xff] %v4548_v30  ;;  %2263 = vmatmul.f32.gmra.mxu2 %v4544_v36  ;;  %v4559_v45 = vpop.f32.mrf.mxu1  ;;  %v4565_v18 = vld [vmem:[%s2912_s22 + $0x470] sm:$0xff] }
 0x186   : > { %v4553_v15 = vmax.f32 %v1319_v60, %v1431_v52  ;;  %5607 = vst [vmem:[#allocation148_spill] sm:$0xff] %v4559_v45  ;;  %v4562_v22 = vpop.f32.mrf.mxu2  ;;  %v4568_v30 = vld [vmem:[%s2912_s22 + $0x430] sm:$0xff]  ;;  %v2654_v60 = vld [vmem:[%s2794_s25 + $0x20] sm:$0xff]  ;;  %s5039_s25 = sld [smem:[#allocation2]] }
 0x187   : > { %v4557_v47 = vpop.f32.mrf.mxu0  ;;  %5608 = vst [vmem:[#allocation149_spill] sm:$0xff] %v4562_v22  ;;  %2328 = vmatmul.f32.gmra.mxu3 %v4565_v18  ;;  %2198 = vmatmul.f32.gmra.mxu1 %v4574_v17 }
 0x188   : > { %5605 = vst [vmem:[#allocation146_spill] sm:$0xff] %v4553_v15 }
 0x189   : > { %5606 = vst [vmem:[#allocation147_spill] sm:$0xff] %v4557_v47 }
 0x18a   : > { %5609 = vst [vmem:[#allocation150_spill] sm:$0xff] %v4565_v18 }
 0x18b   : > { %v4570_v5 = vpop.permute.xlu1 %1285  ;;  %1621 = vperm.xlu2 %2633, %v2654_v60   ;;  %v1386_v52 = vpop.permute.xlu2 %1385  ;;  %v5611_v60 = vmax.f32 %v4255_v53, %v4237_v3 }
 0x18c   : > { %v1433_v47 = vadd.f32 %v1386_v52, %v4118_v2  ;;  %1778 = vperm.xlu0 %2634, %v1712_v13   ;;  %1617 = vperm.xlu1 %2632, %v2655_v50   ;;  %v4582_v22 = vpop.f32.mrf.mxu3  ;;  %v1715_v50 = vld [vmem:[%s4444_s8 + $0x78] sm:$0xff] }
 0x18d   : > { %v4578_v45 = vpop.permute.xlu0 %1605  ;;  %2390 = vmatmul.f32.gmra.mxu0 %v4568_v30  ;;  %5610 = vst [vmem:[#allocation151_spill] sm:$0xff] %v4582_v22  ;;  %v4592_v2 = vpop.f32.mrf.mxu1  ;;  %v4598_v52 = vld [vmem:[%s2912_s22 + $0x478] sm:$0xff] }
 0x18e   : > { %v4587_v35 = vmax.f32 %v5611_v60, %v1433_v47  ;;  %5613 = vst [vmem:[#allocation153_spill] sm:$0xff] %v4592_v2  ;;  %v4595_v13 = vpop.f32.mrf.mxu2  ;;  %v5617_v60 = vmax.f32 %v4305_v28, %v4282_v7  ;;  %v5621_v7 = vld [vmem:[#allocation57_spill] sm:$0xff] }
 0x18f   : > { %v4590_v36 = vpop.f32.mrf.mxu0  ;;  %5614 = vst [vmem:[#allocation154_spill] sm:$0xff] %v4595_v13 }
 0x190   : > { %5612 = vst [vmem:[#allocation152_spill] sm:$0xff] %v4590_v36 }
 0x191   : > { %5615 = vst [vmem:[#allocation155_spill] sm:$0xff] %v4598_v52 }
 0x193   : > { %v4600_v18 = vpop.permute.xlu1 %1297  ;;  %1633 = vperm.xlu2 %2633, %v3850_v34   ;;  %v1398_v22 = vpop.permute.xlu2 %1397 }
 0x194   : > { %v1436_v3 = vadd.f32 %v1398_v22, %v4233_v62  ;;  %1793 = vperm.xlu0 %2634, %v1715_v50   ;;  %1629 = vperm.xlu1 %2632, %v3897_v63   ;;  %v4608_v47 = vpop.f32.mrf.mxu3  ;;  %v5620_v50 = vld [vmem:[#allocation61_spill] sm:$0xff] }
 0x195   : > { %v4605_v53 = vpop.permute.xlu0 %1625  ;;  %2393 = vmatmul.f32.gmra.mxu0 %v4598_v52  ;;  %5616 = vst [vmem:[#allocation156_spill] sm:$0xff] %v4608_v47  ;;  %v4617_v34 = vpop.f32.mrf.mxu1  ;;  %v4626_v47 = vadd.f32 %v4431_v43, %v5620_v50  ;;  %v4768_v52 = vadd.f32 %v4541_v54, %v4489_v10  ;;  %v1708_v54 = vld [vmem:[%s4444_s8 + $0x40] sm:$0xff] }
 0x196   : > { %v4613_v13 = vmax.f32 %v5617_v60, %v1436_v3  ;;  %v4619_v36 = vpop.f32.mrf.mxu2 }
 0x197   : > { %v4615_v2 = vpop.f32.mrf.mxu0  ;;  %5619 = vst [vmem:[#allocation158_spill] sm:$0xff] %v4619_v36  ;;  %v5672_v36 = vld [vmem:[#allocation48_spill] sm:$0xff] }
 0x198   : > { %5618 = vst [vmem:[#allocation157_spill] sm:$0xff] %v4615_v2  ;;  %v5623_v2 = vmax.f32 %v4353_v29, %v4336_v51 }
 0x19b   : > { %1645 = vperm.xlu2 %2633, %v3912_v0   ;;  %v1410_v63 = vpop.permute.xlu2 %1409 }
 0x19c   : > { %v1439_v62 = vadd.f32 %v1410_v63, %v4378_v40  ;;  %1641 = vperm.xlu1 %2632, %v3944_v58   ;;  %v1374_v22 = vpop.permute.xlu1 %1373  ;;  %v4631_v60 = vpop.f32.mrf.mxu3  ;;  %v5624_v40 = vmax.f32 %v3973_v42, %v4286_v38 }
 0x19d   : > { %v1430_v28 = vadd.f32 %v1374_v22, %v5621_v7  ;;  %v4629_v3 = vpop.permute.xlu0 %1637  ;;  %5622 = vst [vmem:[#allocation61_spill] sm:$0xff] %v4631_v60  ;;  %v4645_v43 = vpop.f32.mrf.mxu1  ;;  %v5629_v7 = vmax.f32 %v4399_v12, %v4394_v48  ;;  %v5671_v60 = vld [vmem:[#allocation25_spill] sm:$0xff] }
 0x19e   : > { %v4636_v0 = vmax.f32 %v5623_v2, %v1439_v62  ;;  %5626 = vst [vmem:[#allocation159_spill] sm:$0xff] %v4645_v43  ;;  %v4647_v22 = vpop.f32.mrf.mxu2 }
 0x19f   : > { %v4641_v58 = vmax.f32 %v5624_v40, %v1430_v28  ;;  %v4643_v63 = vpop.f32.mrf.mxu0  ;;  %5627 = vst [vmem:[#allocation160_spill] sm:$0xff] %v4647_v22 }
 0x1a0   : > { %5625 = vst [vmem:[#allocation57_spill] sm:$0xff] %v4643_v63 }
 0x1a3   : > { %1657 = vperm.xlu2 %2633, %v3960_v39   ;;  %v1422_v51 = vpop.permute.xlu2 %1421  ;;  %v5630_v39 = vmax.f32 %v4086_v4, %v4340_v26  ;;  %v4682_v4 = vadd.f32 %v4472_v11, %v4216_v21  ;;  %v1702_v21 = vld [vmem:[%s4444_s8 + $0x10] sm:$0xff] }
 0x1a4   : > { %v1442_v29 = vadd.f32 %v1422_v51, %v4499_v32  ;;  %1653 = vperm.xlu1 %2632, %v3992_v23   ;;  %v1382_v42 = vpop.permute.xlu1 %1381  ;;  %v4657_v62 = vpop.f32.mrf.mxu3  ;;  %v1700_v23 = vld [vmem:[%s4444_s8] sm:$0xff] }
 0x1a5   : > { %v1432_v38 = vadd.f32 %v1382_v42, %v4080_v55  ;;  %v4655_v2 = vpop.permute.xlu0 %1649  ;;  %5628 = vst [vmem:[#allocation161_spill] sm:$0xff] %v4657_v62  ;;  %v4672_v51 = vpop.f32.mrf.mxu1 }
 0x1a6   : > { %v4662_v28 = vmax.f32 %v5629_v7, %v1442_v29  ;;  %5632 = vst [vmem:[#allocation163_spill] sm:$0xff] %v4672_v51  ;;  %v4674_v55 = vpop.f32.mrf.mxu2 }
 0x1a7   : > { %v4667_v40 = vmax.f32 %v5630_v39, %v1432_v38  ;;  %v4669_v32 = vpop.f32.mrf.mxu0  ;;  %5633 = vst [vmem:[#allocation164_spill] sm:$0xff] %v4674_v55  ;;  %v5635_v38 = vmax.f32 %v4054_v20, %v4382_v27  ;;  %v1703_v39 = vld [vmem:[%s4444_s8 + $0x18] sm:$0xff]  ;;  %v4706_v27 = vld [vmem:[%s2912_s22] sm:$0xff] }
 0x1a8   : > { %5631 = vst [vmem:[#allocation162_spill] sm:$0xff] %v4669_v32  ;;  %v4721_v32 = vadd.f32 %v4508_v25, %v4366_v1  ;;  %v1705_v25 = vld [vmem:[%s4444_s8 + $0x28] sm:$0xff]  ;;  %v5652_v55 = vld [vmem:[#allocation3_spill] sm:$0xff] }
 0x1a9   : > { %5655 = vst [vmem:[#allocation3_spill] sm:$0xff] %v4768_v52 }
 0x1ab   : > { %2635 = vset.pattern.permute.xlu2 %v5536_v33 }
 0x1ac   : > { %1665 = vperm.xlu1 %2632, %v4030_v37   ;;  %v1394_v48 = vpop.permute.xlu1 %1393  ;;  %1718 = vperm.xlu2 %2635, %v1700_v23   ;;  %v4678_v12 = vpop.permute.xlu2 %1497 }
 0x1ad   : > { %v1435_v26 = vadd.f32 %v1394_v48, %v4189_v31  ;;  %v4685_v29 = vpop.permute.xlu0 %1661  ;;  %v4687_v42 = vpop.f32.mrf.mxu3  ;;  %v4715_v31 = vld [vmem:[%s2912_s22 + $0x8] sm:$0xff] }
 0x1ae   : > { %5634 = vst [vmem:[#allocation165_spill] sm:$0xff] %v4687_v42  ;;  %v4697_v23 = vpop.f32.mrf.mxu1  ;;  %v4699_v50 = vpop.f32.mrf.mxu2  ;;  %v2659_v42 = vld [vmem:[%s2912_s22 + $0x50] sm:$0xff] }
 0x1af   : > { %v4692_v7 = vmax.f32 %v5635_v38, %v1435_v26  ;;  %v4694_v37 = vpop.f32.mrf.mxu0  ;;  %5637 = vst [vmem:[#allocation167_spill] sm:$0xff] %v4697_v23  ;;  %v5639_v26 = vld [vmem:[#allocation73_spill] sm:$0xff]  ;;  %v5641_v23 = vld [vmem:[#allocation8_spill] sm:$0xff] }
 0x1b0   : > { %5636 = vst [vmem:[#allocation166_spill] sm:$0xff] %v4694_v37 }
 0x1b1   : > { %5638 = vst [vmem:[#allocation168_spill] sm:$0xff] %v4699_v50 }
 0x1b2   : > { %5642 = vst [vmem:[#allocation8_spill] sm:$0xff] %v4721_v32 }
 0x1b4   : > { %2636 = vset.pattern.permute.xlu1 %v5536_v33  ;;  %v1406_v11 = vpop.permute.xlu1 %1405  ;;  %1733 = vperm.xlu2 %2635, %v1703_v39   ;;  %v1510_v20 = vpop.permute.xlu2 %1509  ;;  %v788_v33 = vadd.f32 %v4715_v31, %v5641_v23  ;;  %v4734_v23 = vld [vmem:[%s2912_s22 + $0x10] sm:$0xff] }
 0x1b5   : > { %v1438_v48 = vadd.f32 %v1406_v11, %v4332_v19  ;;  %v4710_v38 = vadd.f32 %v1510_v20, %v5639_v26  ;;  %1728 = vperm.xlu1 %2636, %v1702_v21   ;;  %v4712_v50 = vpop.f32.mrf.mxu3  ;;  %v5643_v19 = vmax.f32 %v4090_v44, %v4424_v24  ;;  %v5650_v21 = vld [vmem:[#allocation26_spill] sm:$0xff] }
 0x1b6   : > { %5640 = vst [vmem:[#allocation73_spill] sm:$0xff] %v4712_v50  ;;  %v599_v39 = vpop.permute.xlu0 %598  ;;  %v5646_v50 = vld [vmem:[#allocation6_spill] sm:$0xff]  ;;  %v4739_v22 = vpop.f32.mrf.mxu1 }
 0x1b7   : > { %v4726_v11 = vmax.f32 %v5643_v19, %v1438_v48  ;;  %v676_v20 = vadd.f32 %v599_v39, %v4706_v27  ;;  %v4731_v26 = vpop.f32.mrf.mxu0  ;;  %v916_v62 = vadd.f32 %v4734_v23, %v5646_v50  ;;  %5647 = vst [vmem:[#allocation6_spill] sm:$0xff] %v4739_v22  ;;  %v4741_v44 = vpop.f32.mrf.mxu2  ;;  %v4746_v48 = vld [vmem:[%s2912_s22 + $0x20] sm:$0xff]  ;;  %v4750_v19 = vld [vmem:[%s2912_s22 + $0x18] sm:$0xff] }
 0x1b8   : > { %5645 = vst [vmem:[#allocation170_spill] sm:$0xff] %v4731_v26  ;;  %v1704_v39 = vld [vmem:[%s4444_s8 + $0x20] sm:$0xff]  ;;  %v1044_v26 = vadd.f32 %v4750_v19, %v5650_v21  ;;  %v789_v21 = vadd.f32 %v2659_v42, %v5652_v55  ;;  %v5658_v55 = vld [vmem:[#allocation16_spill] sm:$0xff] }
 0x1b9   : > { %5644 = vst [vmem:[#allocation169_spill] sm:$0xff] %v4726_v11  ;;  %v804_v1 = vmax.f32 %v676_v20, %v788_v33  ;;  %v581_v20 = vld [vmem:[%s2912_s22 + $0x48] sm:$0xff]  ;;  %v2664_v11 = vld [vmem:[%s2912_s22 + $0x1c0] sm:$0xff] }
 0x1ba   : > { %5648 = vst [vmem:[#allocation171_spill] sm:$0xff] %v4741_v44  ;;  %v1172_v44 = vadd.f32 %v4150_v16, %v4746_v48  ;;  %v5656_v16 = vmax.f32 %v4129_v14, %v4467_v8 }
 0x1bb   : > { %5649 = vst [vmem:[#allocation172_spill] sm:$0xff] %v4746_v48  ;;  %v932_v43 = vmax.f32 %v804_v1, %v916_v62  ;;  %v5653_v62 = vld [vmem:[#allocation47_spill] sm:$0xff]  ;;  %v5654_v1 = vld [vmem:[#allocation56_spill] sm:$0xff] }
 0x1bc   : > { %v1418_v50 = vpop.permute.xlu1 %1417  ;;  %1743 = vperm.xlu2 %2635, %v1705_v25   ;;  %v4754_v33 = vpop.permute.xlu2 %1517  ;;  %v1300_v25 = vadd.f32 %v5654_v1, %v5653_v62  ;;  %v5660_v62 = vld [vmem:[#allocation43_spill] sm:$0xff] }
 0x1bd   : > { %v1060_v22 = vmax.f32 %v932_v43, %v1044_v26  ;;  %v1441_v24 = vadd.f32 %v1418_v50, %v4464_v59  ;;  %1738 = vperm.xlu1 %2636, %v1704_v39   ;;  %v4760_v37 = vpop.f32.mrf.mxu3  ;;  %v2660_v39 = vld [vmem:[%s2912_s22 + $0x58] sm:$0xff]  ;;  %v1428_v1 = vadd.f32 %v4504_v9, %v5660_v62  ;;  %v5673_v48 = vld [vmem:[#allocation91_spill] sm:$0xff] }
 0x1be   : > { %5651 = vst [vmem:[#allocation26_spill] sm:$0xff] %v4760_v37  ;;  %v604_v51 = vpop.permute.xlu0 %603  ;;  %v917_v50 = vadd.f32 %v2660_v39, %v5658_v55  ;;  %v4782_v32 = vpop.f32.mrf.mxu1 }
 0x1bf   : > { %v4773_v59 = vmax.f32 %v5656_v16, %v1441_v24  ;;  %v677_v43 = vadd.f32 %v604_v51, %v581_v20  ;;  %v1188_v26 = vmax.f32 %v1060_v22, %v1172_v44  ;;  %v4777_v37 = vpop.f32.mrf.mxu0  ;;  %5661 = vst [vmem:[#allocation16_spill] sm:$0xff] %v4782_v32  ;;  %v4784_v14 = vpop.f32.mrf.mxu2  ;;  %v1707_v22 = vld [vmem:[%s4444_s8 + $0x38] sm:$0xff]  ;;  %v2661_v51 = vld [vmem:[%s2912_s22 + $0x60] sm:$0xff]  ;;  %v709_v32 = vadd.f32 %v2659_v42, %v581_v20  ;;  %v2665_v20 = vld [vmem:[%s2912_s22 + $0x1c8] sm:$0xff] }
 0x1c0   : > { %5659 = vst [vmem:[#allocation56_spill] sm:$0xff] %v4777_v37  ;;  %v5663_v44 = vld [vmem:[#allocation14_spill] sm:$0xff] }
 0x1c1   : > { %5657 = vst [vmem:[#allocation47_spill] sm:$0xff] %v4773_v59  ;;  %v805_v10 = vmax.f32 %v677_v43, %v789_v21  ;;  %v1316_v63 = vmax.f32 %v1188_v26, %v1300_v25  ;;  %v1045_v24 = vadd.f32 %v2661_v51, %v5663_v44  ;;  %v4792_v37 = vld [vmem:[%s2912_s22 + $0x38] sm:$0xff]  ;;  %v586_v21 = vld [vmem:[%s2912_s22 + $0x1b0] sm:$0xff]  ;;  %v4798_v25 = vld [vmem:[%s2912_s22 + $0x68] sm:$0xff] }
 0x1c2   : > { %5662 = vst [vmem:[#allocation43_spill] sm:$0xff] %v4784_v14  ;;  %v5665_v43 = vld [vmem:[#allocation63_spill] sm:$0xff] }
 0x1c3   : > { %v933_v16 = vmax.f32 %v805_v10, %v917_v50  ;;  %v1444_v55 = vmax.f32 %v1316_v63, %v1428_v1  ;;  %5664 = vst [vmem:[#allocation14_spill] sm:$0xff] %v4792_v37  ;;  %v1173_v26 = vadd.f32 %v4798_v25, %v5665_v43  ;;  %v2663_v50 = vld [vmem:[%s2912_s22 + $0x1b8] sm:$0xff]  ;;  %v5667_v63 = vld [vmem:[#allocation5_spill] sm:$0xff]  ;;  %v5669_v59 = vld [vmem:[#allocation55_spill] sm:$0xff] }
 0x1c4   : > { %1758 = vperm.xlu2 %2635, %v1708_v54   ;;  %v4794_v9 = vpop.permute.xlu2 %1529  ;;  %v794_v1 = vadd.f32 %v2663_v50, %v5667_v63  ;;  %v5668_v10 = vld [vmem:[#allocation53_spill] sm:$0xff]  ;;  %v1301_v43 = vadd.f32 %v4427_v46, %v5669_v59  ;;  %v922_v63 = vadd.f32 %v2664_v11, %v5671_v60  ;;  %v5678_v60 = vld [vmem:[#allocation52_spill] sm:$0xff] }
 0x1c5   : > { %v1061_v62 = vmax.f32 %v933_v16, %v1045_v24  ;;  %1753 = vperm.xlu1 %2636, %v1707_v22   ;;  %v1494_v8 = vpop.permute.xlu1 %1493  ;;  %v4802_v14 = vpop.f32.mrf.mxu3  ;;  %v1668_v54 = vadd.f32 %v4578_v45, %v5668_v10  ;;  %v1429_v45 = vadd.f32 %v5673_v48, %v5672_v36  ;;  %v1711_v10 = vld [vmem:[%s4444_s8 + $0x58] sm:$0xff]  ;;  %v837_v36 = vadd.f32 %v2660_v39, %v709_v32  ;;  %v5683_v39 = vld [vmem:[#allocation7_spill] sm:$0xff] }
 0x1c6   : > { %5666 = vst [vmem:[#allocation63_spill] sm:$0xff] %v4802_v14  ;;  %v1556_v44 = vadd.f32 %v1494_v8, %v4792_v37  ;;  %v629_v52 = vpop.permute.xlu0 %628  ;;  %v4818_v37 = vpop.f32.mrf.mxu1  ;;  %v2668_v32 = vld [vmem:[%s2912_s22 + $0x298] sm:$0xff] }
 0x1c7   : > { %v1189_v22 = vmax.f32 %v1061_v62, %v1173_v26  ;;  %v682_v24 = vadd.f32 %v629_v52, %v586_v21  ;;  %v4811_v14 = vpop.f32.mrf.mxu0  ;;  %5674 = vst [vmem:[#allocation53_spill] sm:$0xff] %v4818_v37  ;;  %v4820_v46 = vpop.f32.mrf.mxu2  ;;  %v5676_v52 = vld [vmem:[#allocation15_spill] sm:$0xff]  ;;  %v1710_v26 = vld [vmem:[%s4444_s8 + $0x50] sm:$0xff]  ;;  %v4829_v62 = vadd.f32 %v4678_v12, %v5678_v60  ;;  %v5686_v60 = vld [vmem:[#allocation90_spill] sm:$0xff] }
 0x1c8   : > { %v1572_v16 = vmax.f32 %v1444_v55, %v1556_v44  ;;  %5670 = vst [vmem:[#allocation5_spill] sm:$0xff] %v4811_v14  ;;  %v1050_v59 = vadd.f32 %v2665_v20, %v5676_v52  ;;  %v2667_v12 = vld [vmem:[%s2912_s22 + $0x290] sm:$0xff]  ;;  %v5687_v37 = vld [vmem:[#allocation31_spill] sm:$0xff] }
 0x1c9   : > { %v810_v8 = vmax.f32 %v682_v24, %v794_v1  ;;  %5675 = vst [vmem:[#allocation55_spill] sm:$0xff] %v4820_v46  ;;  %v1317_v42 = vmax.f32 %v1189_v22, %v1301_v43  ;;  %v589_v24 = vld [vmem:[%s2912_s22 + $0x288] sm:$0xff]  ;;  %v4837_v43 = vld [vmem:[%s2912_s22 + $0x1d0] sm:$0xff]  ;;  %v5681_v22 = vld [vmem:[#allocation75_spill] sm:$0xff] }
 0x1ca   : > { %v4824_v55 = vmax.f32 %v1572_v16, %v1668_v54  ;;  %5679 = vst [vmem:[#allocation48_spill] sm:$0xff] %v4829_v62  ;;  %v1178_v54 = vadd.f32 %v4837_v43, %v5681_v22 }
 0x1cb   : > { %v938_v48 = vmax.f32 %v810_v8, %v922_v63  ;;  %v4831_v1 = vmax.f32 %v1317_v42, %v1429_v45  ;;  %v797_v63 = vadd.f32 %v2667_v12, %v5683_v39  ;;  %v714_v45 = vadd.f32 %v2663_v50, %v586_v21  ;;  %v5684_v8 = vld [vmem:[#allocation68_spill] sm:$0xff]  ;;  %v5688_v39 = vld [vmem:[#allocation82_spill] sm:$0xff] }
 0x1cc   : > { %5677 = vst [vmem:[#allocation25_spill] sm:$0xff] %v4824_v55  ;;  %1773 = vperm.xlu2 %2635, %v1711_v10   ;;  %v4833_v44 = vpop.permute.xlu2 %1541  ;;  %v925_v55 = vadd.f32 %v2668_v32, %v5687_v37  ;;  %v1434_v21 = vadd.f32 %v4239_v57, %v5688_v39  ;;  %v5693_v37 = vld [vmem:[#allocation87_spill] sm:$0xff] }
 0x1cd   : > { %5680 = vst [vmem:[#allocation91_spill] sm:$0xff] %v4831_v1  ;;  %v1066_v16 = vmax.f32 %v938_v48, %v1050_v59  ;;  %1768 = vperm.xlu1 %2636, %v1710_v26   ;;  %v1506_v52 = vpop.permute.xlu1 %1505  ;;  %v4841_v46 = vpop.f32.mrf.mxu3  ;;  %v1306_v59 = vadd.f32 %v4502_v56, %v5686_v60  ;;  %v965_v26 = vadd.f32 %v2661_v51, %v837_v36  ;;  %v2669_v56 = vld [vmem:[%s2912_s22 + $0x2a0] sm:$0xff]  ;;  %v5690_v51 = vld [vmem:[#allocation17_spill] sm:$0xff]  ;;  %v5699_v1 = vld [vmem:[#allocation88_spill] sm:$0xff] }
 0x1ce   : > { %5682 = vst [vmem:[#allocation15_spill] sm:$0xff] %v4841_v46  ;;  %v4848_v10 = vadd.f32 %v1506_v52, %v5684_v8  ;;  %v644_v42 = vpop.permute.xlu0 %643  ;;  %v1714_v52 = vld [vmem:[%s4444_s8 + $0x70] sm:$0xff]  ;;  %v1053_v36 = vadd.f32 %v2669_v56, %v5690_v51  ;;  %v4870_v57 = vadd.f32 %v4754_v33, %v5693_v37  ;;  %v1673_v33 = vadd.f32 %v4605_v53, %v5699_v1 }
 0x1cf   : > { %v1194_v48 = vmax.f32 %v1066_v16, %v1178_v54  ;;  %v685_v22 = vadd.f32 %v644_v42, %v589_v24  ;;  %v842_v54 = vadd.f32 %v2664_v11, %v714_v45  ;;  %v1713_v16 = vld [vmem:[%s4444_s8 + $0x68] sm:$0xff]  ;;  %v4864_v42 = vpop.f32.mrf.mxu1  ;;  %v4866_v46 = vpop.f32.mrf.mxu2  ;;  %v5695_v45 = vld [vmem:[#allocation81_spill] sm:$0xff] }
 0x1d0   : > { %5685 = vst [vmem:[#allocation52_spill] sm:$0xff] %v4848_v10  ;;  %v4859_v8 = vpop.f32.mrf.mxu0  ;;  %v4879_v11 = vld [vmem:[%s2912_s22 + $0x2a8] sm:$0xff] }
 0x1d1   : > { %v813_v50 = vmax.f32 %v685_v22, %v797_v63  ;;  %5689 = vst [vmem:[#allocation75_spill] sm:$0xff] %v4859_v8  ;;  %v1322_v14 = vmax.f32 %v1194_v48, %v1306_v59  ;;  %v1093_v63 = vadd.f32 %v4798_v25, %v965_v26  ;;  %v592_v48 = vld [vmem:[%s2912_s22 + $0x360] sm:$0xff]  ;;  %v1181_v51 = vadd.f32 %v4879_v11, %v5695_v45  ;;  %v2671_v25 = vld [vmem:[%s2912_s22 + $0x368] sm:$0xff]  ;;  %v2672_v45 = vld [vmem:[%s2912_s22 + $0x70] sm:$0xff] }
 0x1d2   : > { %5691 = vst [vmem:[#allocation7_spill] sm:$0xff] %v4864_v42  ;;  %v970_v26 = vadd.f32 %v2665_v20, %v842_v54 }
 0x1d3   : > { %5692 = vst [vmem:[#allocation68_spill] sm:$0xff] %v4866_v46  ;;  %v941_v22 = vmax.f32 %v813_v50, %v925_v55  ;;  %v4873_v10 = vmax.f32 %v1322_v14, %v1434_v21  ;;  %v5696_v14 = vld [vmem:[#allocation10_spill] sm:$0xff]  ;;  %v717_v21 = vadd.f32 %v2667_v12, %v589_v24  ;;  %v1221_v62 = vadd.f32 %v2672_v45, %v1093_v63  ;;  %v2673_v24 = vld [vmem:[%s2912_s22 + $0x370] sm:$0xff] }
 0x1d4   : > { %5694 = vst [vmem:[#allocation90_spill] sm:$0xff] %v4870_v57  ;;  %1788 = vperm.xlu2 %2635, %v1714_v52   ;;  %v4875_v59 = vpop.permute.xlu2 %1553  ;;  %v800_v55 = vadd.f32 %v2671_v25, %v5696_v14  ;;  %v5697_v50 = vld [vmem:[#allocation78_spill] sm:$0xff]  ;;  %v5700_v12 = vld [vmem:[#allocation37_spill] sm:$0xff] }
 0x1d5   : > { %v1069_v8 = vmax.f32 %v941_v22, %v1053_v36  ;;  %1783 = vperm.xlu1 %2636, %v1713_v16   ;;  %v1514_v46 = vpop.permute.xlu1 %1513  ;;  %v4888_v15 = vpop.f32.mrf.mxu3  ;;  %v1309_v36 = vadd.f32 %v4535_v41, %v4329_v49  ;;  %v928_v54 = vadd.f32 %v2673_v24, %v5700_v12  ;;  %v845_v53 = vadd.f32 %v2668_v32, %v717_v21  ;;  %v5707_v12 = vld [vmem:[#allocation12_spill] sm:$0xff]  ;;  %v595_v32 = vld [vmem:[%s2912_s22 + $0x438] sm:$0xff]  ;;  %v5709_v21 = vld [vmem:[#allocation11_spill] sm:$0xff] }
 0x1d6   : > { %v1561_v52 = vadd.f32 %v1514_v46, %v5697_v50  ;;  %v659_v42 = vpop.permute.xlu0 %658  ;;  %5698 = vst [vmem:[#allocation31_spill] sm:$0xff] %v4888_v15  ;;  %v1437_v46 = vadd.f32 %v4289_v61, %v4277_v6 }
 0x1d7   : > { %v1197_v16 = vmax.f32 %v1069_v8, %v1181_v51  ;;  %v688_v22 = vadd.f32 %v659_v42, %v592_v48  ;;  %v2674_v8 = vld [vmem:[%s2912_s22 + $0x378] sm:$0xff]  ;;  %v5701_v42 = vld [vmem:[#allocation21_spill] sm:$0xff]  ;;  %v1098_v51 = vadd.f32 %v4837_v43, %v970_v26  ;;  %v4907_v50 = vpop.f32.mrf.mxu1  ;;  %v4922_v26 = vld [vmem:[%s2912_s22 + $0x380] sm:$0xff] }
 0x1d8   : > { %v1577_v20 = vmax.f32 %v4587_v35, %v1561_v52  ;;  %v1056_v63 = vadd.f32 %v2674_v8, %v5701_v42  ;;  %v4905_v35 = vpop.f32.mrf.mxu0  ;;  %v5704_v52 = vld [vmem:[#allocation109_spill] sm:$0xff] }
 0x1d9   : > { %v816_v14 = vmax.f32 %v688_v22, %v800_v55  ;;  %v1325_v41 = vmax.f32 %v1197_v16, %v1309_v36  ;;  %5703 = vst [vmem:[#allocation17_spill] sm:$0xff] %v4905_v35  ;;  %v4911_v45 = vadd.f32 %v4794_v9, %v5704_v52  ;;  %v2675_v55 = vld [vmem:[%s2912_s22 + $0x78] sm:$0xff]  ;;  %v2676_v22 = vld [vmem:[%s2912_s22 + $0x440] sm:$0xff]  ;;  %v720_v9 = vadd.f32 %v2671_v25, %v592_v48 }
 0x1da   : > { %v4903_v1 = vmax.f32 %v1577_v20, %v1673_v33  ;;  %v1349_v36 = vadd.f32 %v2675_v55, %v1221_v62  ;;  %v803_v43 = vadd.f32 %v2676_v22, %v5707_v12  ;;  %v4919_v33 = vpop.f32.mrf.mxu2  ;;  %v1184_v20 = vadd.f32 %v4922_v26, %v5709_v21  ;;  %v4930_v12 = vld [vmem:[%s2912_s22 + $0xd0] sm:$0xff] }
 0x1db   : > { %5705 = vst [vmem:[#allocation87_spill] sm:$0xff] %v4911_v45  ;;  %v944_v61 = vmax.f32 %v816_v14, %v928_v54  ;;  %v4914_v16 = vmax.f32 %v1325_v41, %v1437_v46  ;;  %v973_v46 = vadd.f32 %v2669_v56, %v845_v53  ;;  %v5710_v41 = vld [vmem:[#allocation102_spill] sm:$0xff]  ;;  %v2680_v56 = vld [vmem:[%s2912_s22 + $0x448] sm:$0xff]  ;;  %v5713_v53 = vld [vmem:[#allocation41_spill] sm:$0xff] }
 0x1dc   : > { %5702 = vst [vmem:[#allocation82_spill] sm:$0xff] %v4903_v1  ;;  %v1226_v1 = vadd.f32 %v1098_v51, %v5686_v60  ;;  %v5715_v60 = vmax.f32 %v4641_v58, %v4626_v47  ;;  %v5719_v58 = vld [vmem:[#allocation129_spill] sm:$0xff] }
 0x1dd   : > { %5706 = vst [vmem:[#allocation81_spill] sm:$0xff] %v4914_v16  ;;  %v1072_v42 = vmax.f32 %v944_v61, %v1056_v63  ;;  %v1526_v54 = vpop.permute.xlu1 %1525  ;;  %v1614_v14 = vpop.permute.xlu2 %1613  ;;  %v2679_v61 = vld [vmem:[%s2912_s22 + $0x80] sm:$0xff]  ;;  %v1101_v16 = vadd.f32 %v4879_v11, %v973_v46  ;;  %v2683_v11 = vld [vmem:[%s2912_s22 + $0x458] sm:$0xff] }
 0x1de   : > { %5708 = vst [vmem:[#allocation10_spill] sm:$0xff] %v4919_v33  ;;  %v1564_v55 = vadd.f32 %v1526_v54, %v5710_v41  ;;  %v1670_v35 = vadd.f32 %v4930_v12, %v1614_v14  ;;  %v674_v15 = vpop.permute.xlu0 %673  ;;  %v5712_v33 = vld [vmem:[#allocation132_spill] sm:$0xff]  ;;  %v1477_v21 = vadd.f32 %v2679_v61, %v1349_v36  ;;  %v4937_v57 = vpop.f32.mrf.mxu3  ;;  %v931_v54 = vadd.f32 %v2680_v56, %v5713_v53  ;;  %v5714_v41 = vld [vmem:[#allocation111_spill] sm:$0xff] }
 0x1df   : > { %5711 = vst [vmem:[#allocation78_spill] sm:$0xff] %v4930_v12  ;;  %v1312_v48 = vadd.f32 %v4570_v5, %v5712_v33  ;;  %v1200_v25 = vmax.f32 %v1072_v42, %v1184_v20  ;;  %v691_v63 = vadd.f32 %v674_v15, %v595_v32  ;;  %v1676_v14 = vadd.f32 %v4629_v3, %v5714_v41  ;;  %v5716_v5 = vld [vmem:[#allocation125_spill] sm:$0xff]  ;;  %v5717_v15 = vld [vmem:[#allocation112_spill] sm:$0xff]  ;;  %v5718_v53 = vld [vmem:[#allocation27_spill] sm:$0xff] }
 0x1e0   : > { %v1580_v62 = vmax.f32 %v4613_v13, %v1564_v55  ;;  %v4947_v51 = vmax.f32 %v5715_v60, %v1670_v35  ;;  %v1440_v20 = vadd.f32 %v5717_v15, %v5716_v5  ;;  %v848_v36 = vadd.f32 %v2673_v24, %v720_v9  ;;  %v2681_v12 = vld [vmem:[%s2912_s22 + $0x450] sm:$0xff]  ;;  %v4956_v13 = vpop.f32.mrf.mxu1  ;;  %v4964_v24 = vld [vmem:[%s2912_s22 + $0x88] sm:$0xff]  ;;  %v4977_v60 = vld [vmem:[%s2912_s22 + $0x160] sm:$0xff] }
 0x1e1   : > { %v819_v42 = vmax.f32 %v691_v63, %v803_v43  ;;  %v1328_v61 = vmax.f32 %v1200_v25, %v1312_v48  ;;  %v1059_v45 = vadd.f32 %v2681_v12, %v5718_v53  ;;  %v1354_v47 = vadd.f32 %v1226_v1, %v5688_v39  ;;  %v4969_v48 = vpop.f32.mrf.mxu0  ;;  %v5722_v53 = vld [vmem:[#allocation131_spill] sm:$0xff] }
 0x1e2   : > { %v4954_v3 = vmax.f32 %v1580_v62, %v1676_v14  ;;  %v4961_v35 = vadd.f32 %v4833_v44, %v5719_v58  ;;  %v1589_v43 = vadd.f32 %v4964_v24, %v1477_v21  ;;  %v5720_v62 = vld [vmem:[#allocation97_spill] sm:$0xff]  ;;  %v976_v25 = vadd.f32 %v2674_v8, %v848_v36 }
 0x1e3   : > { %v947_v55 = vmax.f32 %v819_v42, %v931_v54  ;;  %v4967_v9 = vmax.f32 %v1328_v61, %v1440_v20  ;;  %v1187_v46 = vadd.f32 %v2683_v11, %v5720_v62  ;;  %v723_v41 = vadd.f32 %v2676_v22, %v595_v32  ;;  %v5721_v54 = vld [vmem:[#allocation122_spill] sm:$0xff]  ;;  %v4980_v20 = vpop.f32.mrf.mxu2 }
 0x1e4   : > { %v1482_v42 = vadd.f32 %v1354_v47, %v5693_v37  ;;  %v1315_v8 = vadd.f32 %v4600_v18, %v4574_v17  ;;  %v1229_v61 = vadd.f32 %v1101_v16, %v4329_v49  ;;  %v1679_v22 = vadd.f32 %v4655_v2, %v5722_v53  ;;  %v5724_v37 = vld [vmem:[#allocation32_spill] sm:$0xff]  ;;  %v5725_v47 = vld [vmem:[#allocation118_spill] sm:$0xff] }
 0x1e5   : > { %v1075_v63 = vmax.f32 %v947_v55, %v1059_v45  ;;  %v1538_v39 = vpop.permute.xlu1 %1537  ;;  %v1622_v1 = vpop.permute.xlu2 %1621  ;;  %v1584_v44 = vmax.f32 %v4967_v9, %v4961_v35  ;;  %v708_v32 = vadd.f32 %v4715_v31, %v4706_v27  ;;  %v5723_v62 = vmax.f32 %v4667_v40, %v4710_v38  ;;  %v5727_v31 = vld [vmem:[#allocation95_spill] sm:$0xff]  ;;  %v5728_v27 = vld [vmem:[#allocation150_spill] sm:$0xff]  ;;  %v5732_v53 = vld [vmem:[#allocation104_spill] sm:$0xff] }
 0x1e6   : > { %v1567_v14 = vadd.f32 %v1538_v39, %v5721_v54  ;;  %v1672_v21 = vadd.f32 %v4977_v60, %v1622_v1  ;;  %v1724_v15 = vpop.permute.xlu0 %1723  ;;  %v1443_v18 = vadd.f32 %v5725_v47, %v5724_v37  ;;  %v1104_v2 = vadd.f32 %v4922_v26, %v976_v25  ;;  %v5729_v38 = vld [vmem:[#allocation51_spill] sm:$0xff]  ;;  %v5730_v26 = vld [vmem:[#allocation54_spill] sm:$0xff] }
 0x1e7   : > { %v1203_v45 = vmax.f32 %v1075_v63, %v1187_v46  ;;  %v1797_v36 = vmul.f32 %v1724_v15, %v1589_v43  ;;  %v5726_v46 = vld [vmem:[#allocation33_spill] sm:$0xff]  ;;  %v4999_v63 = vpop.f32.mrf.mxu3  ;;  %v851_v16 = vadd.f32 %v2680_v56, %v723_v41  ;;  %v5007_v40 = vadd.f32 %v4875_v59, %v5728_v27  ;;  %v5731_v59 = vld [vmem:[#allocation143_spill] sm:$0xff] }
 0x1e8   : > { %v1583_v55 = vmax.f32 %v4636_v0, %v1567_v14  ;;  %v4994_v39 = vmax.f32 %v5723_v62, %v1672_v21  ;;  %v1594_v0 = vadd.f32 %v1482_v42, %v5727_v31  ;;  %v5010_v14 = vpop.f32.mrf.mxu1  ;;  %v1357_v21 = vadd.f32 %v4277_v6, %v1229_v61  ;;  %v5733_v61 = vld [vmem:[#allocation58_spill] sm:$0xff]  ;;  %v5789_v42 = vld [vmem:[#allocation87_spill] sm:$0xff] }
 0x1e9   : > { %v1833_v43 = vadd.f32 %v5726_v46, %v1797_v36  ;;  %v1331_v49 = vmax.f32 %v1203_v45, %v1315_v8  ;;  %v836_v8 = vadd.f32 %v4734_v23, %v708_v32  ;;  %v979_v45 = vadd.f32 %v2681_v12, %v851_v16  ;;  %v5021_v62 = vpop.f32.mrf.mxu0  ;;  %v5736_v31 = vld [vmem:[#allocation34_spill] sm:$0xff] }
 0x1ea   : > { %v5002_v1 = vmax.f32 %v1583_v55, %v1679_v22  ;;  %v1232_v6 = vadd.f32 %v1104_v2, %v5712_v33  ;;  %v1485_v32 = vadd.f32 %v1357_v21, %v5704_v52  ;;  %v5735_v33 = vld [vmem:[#allocation59_spill] sm:$0xff]  ;;  %v2685_v21 = vld [vmem:[%s2912_s22 + $0xe8] sm:$0xff] }
 0x1eb   : > { %v1898_v54 = vadd.f32 %v5729_v38, %v1833_v43  ;;  %v5013_v15 = vmax.f32 %v1331_v49, %v1443_v18  ;;  %v1682_v18 = vadd.f32 %v4685_v29, %v4568_v30  ;;  %v964_v12 = vadd.f32 %v4750_v19, %v836_v8  ;;  %v5035_v16 = vpop.f32.mrf.mxu2  ;;  %v5737_v29 = vld [vmem:[#allocation86_spill] sm:$0xff]  ;;  %v5739_v8 = vld [vmem:[#allocation4_spill] sm:$0xff] }
 0x1ec   : > { %v5734_v43 = vmax.f32 %v4692_v7, %v4682_v4  ;;  %v1107_v52 = vadd.f32 %v2683_v11, %v979_v45  ;;  %v1360_v30 = vadd.f32 %v5716_v5, %v1232_v6  ;;  %v5738_v4 = vld [vmem:[#allocation117_spill] sm:$0xff] }
 0x1ed   : > { %v1963_v56 = vadd.f32 %v5730_v26, %v1898_v54  ;;  %v1550_v25 = vpop.permute.xlu1 %1549  ;;  %v1634_v41 = vpop.permute.xlu2 %1633  ;;  %v1597_v7 = vadd.f32 %v1485_v32, %v5738_v4  ;;  %v839_v26 = vadd.f32 %v2685_v21, %v5739_v8  ;;  %v5076_v21 = vstv %s5039_s25  ;;  %v5753_v8 = vld [vmem:[#allocation13_spill] sm:$0xff] }
 0x1ee   : > { %v1570_v36 = vadd.f32 %v1550_v25, %v5731_v59  ;;  %v1675_v22 = vadd.f32 %v1634_v41, %v5732_v53  ;;  %v1749_v55 = vpop.permute.xlu0 %1748  ;;  %v5741_v41 = vld [vmem:[#allocation89_spill] sm:$0xff]  ;;  %v5742_v59 = vld [vmem:[#allocation158_spill] sm:$0xff]  ;;  %v1488_v6 = vadd.f32 %v1360_v30, %v5719_v58  ;;  %v5750_v30 = vld [vmem:[#allocation91_spill] sm:$0xff] }
 0x1ef   : > { %v2028_v47 = vadd.f32 %v5733_v61, %v1963_v56  ;;  %v1802_v23 = vmul.f32 %v1749_v55, %v1594_v0  ;;  %v5047_v54 = vpop.f32.mrf.mxu3  ;;  %v5740_v56 = vld [vmem:[#allocation172_spill] sm:$0xff]  ;;  %v1235_v61 = vadd.f32 %v4574_v17, %v1107_v52  ;;  %v5749_v58 = vld [vmem:[#allocation29_spill] sm:$0xff] }
 0x1f0   : > { %v1586_v46 = vmax.f32 %v4662_v28, %v1570_v36  ;;  %v5033_v49 = vmax.f32 %v5734_v43, %v1675_v22  ;;  %v1092_v25 = vadd.f32 %v5740_v56, %v964_v12  ;;  %v5054_v36 = vpop.f32.mrf.mxu1  ;;  %v5745_v12 = vld [vmem:[#allocation61_spill] sm:$0xff] }
 0x1f1   : > { %v2093_v2 = vadd.f32 %v5735_v33, %v2028_v47  ;;  %v1848_v0 = vadd.f32 %v5736_v31, %v1802_v23  ;;  %v5744_v47 = vld [vmem:[#allocation92_spill] sm:$0xff]  ;;  %v2686_v43 = vld [vmem:[%s2912_s22 + $0xf0] sm:$0xff]  ;;  %v5069_v17 = vpop.f32.mrf.mxu0 }
 0x1f2   : > { %v5041_v38 = vmax.f32 %v1586_v46, %v1682_v18  ;;  %v967_v33 = vadd.f32 %v2686_v43, %v839_v26  ;;  %v5758_v43 = vld [vmem:[#allocation16_spill] sm:$0xff] }
 0x1f3   : > { %v2158_v28 = vadd.f32 %v4617_v34, %v2093_v2  ;;  %v1913_v19 = vadd.f32 %v5737_v29, %v1848_v0  ;;  %v5743_v34 = vld [vmem:[#allocation124_spill] sm:$0xff]  ;;  %v5746_v0 = vld [vmem:[#allocation169_spill] sm:$0xff]  ;;  %v5079_v56 = vpop.f32.mrf.mxu2 }
 0x1f4   : > { %v2687_v2 = vld [vmem:[%s2912_s22 + $0x28] sm:$0xff] }
 0x1f5   : > { %v1978_v11 = vadd.f32 %v5741_v41, %v1913_v19  ;;  %v1646_v45 = vpop.permute.xlu2 %1645  ;;  %v2223_v5 = vadd.f32 %v5742_v59, %v2158_v28  ;;  %v1220_v31 = vadd.f32 %v2687_v2, %v1092_v25  ;;  %v5747_v28 = vld [vmem:[#allocation8_spill] sm:$0xff]  ;;  %v5756_v59 = vld [vmem:[#allocation57_spill] sm:$0xff] }
 0x1f6   : > { %v1678_v53 = vadd.f32 %v1646_v45, %v5743_v34  ;;  %v1764_v22 = vpop.permute.xlu0 %1763  ;;  %v1610_v55 = vpop.permute.xlu1 %1609  ;;  %v5748_v29 = vmax.f32 %v5746_v0, %v5747_v28  ;;  %v5754_v25 = vld [vmem:[#allocation136_spill] sm:$0xff] }
 0x1f7   : > { %v2043_v23 = vadd.f32 %v5744_v47, %v1978_v11  ;;  %v1805_v32 = vmul.f32 %v1764_v22, %v1597_v7  ;;  %v1669_v18 = vadd.f32 %v4964_v24, %v1610_v55  ;;  %v2288_v46 = vadd.f32 %v5745_v12, %v2223_v5  ;;  %v5751_v24 = vld [vmem:[#allocation48_spill] sm:$0xff]  ;;  %v2688_v22 = vld [vmem:[%s2912_s22 + $0xf8] sm:$0xff]  ;;  %v2689_v47 = vld [vmem:[%s2912_s22 + $0x30] sm:$0xff] }
 0x1f8   : > { %v5067_v19 = vmax.f32 %v5748_v29, %v1678_v53  ;;  %v5752_v4 = vmax.f32 %v5750_v30, %v5751_v24  ;;  %v1600_v41 = vadd.f32 %v1488_v6, %v5754_v25  ;;  %v5755_v11 = vld [vmem:[#allocation108_spill] sm:$0xff]  ;;  %v1363_v53 = vadd.f32 %v5724_v37, %v1235_v61  ;;  %v5757_v6 = vld [vmem:[#allocation110_spill] sm:$0xff] }
 0x1f9   : > { %v1857_v52 = vadd.f32 %v5749_v58, %v1805_v32  ;;  %v2108_v26 = vadd.f32 %v5753_v8, %v2043_v23  ;;  %v2353_v5 = vadd.f32 %v5756_v59, %v2288_v46  ;;  %v1095_v55 = vadd.f32 %v2688_v22, %v967_v33  ;;  %v5095_v46 = vpop.f32.mrf.mxu3  ;;  %v5759_v61 = vld [vmem:[#allocation144_spill] sm:$0xff]  ;;  %v5761_v30 = vld [vmem:[#allocation18_spill] sm:$0xff] }
 0x1fa   : > { %v1685_v7 = vmax.f32 %v5752_v4, %v1669_v18  ;;  %v1348_v32 = vadd.f32 %v2689_v47, %v1220_v31  ;;  %v5760_v31 = vld [vmem:[#allocation113_spill] sm:$0xff]  ;;  %v1491_v58 = vadd.f32 %v1363_v53, %v5728_v27  ;;  %v2691_v4 = vld [vmem:[%s2912_s22 + $0x100] sm:$0xff]  ;;  %v5762_v8 = vld [vmem:[#allocation14_spill] sm:$0xff]  ;;  %v5116_v47 = vpop.f32.mrf.mxu0 }
 0x1fb   : > { %v1922_v45 = vadd.f32 %v5755_v11, %v1857_v52  ;;  %v2173_v37 = vadd.f32 %v5758_v43, %v2108_v26  ;;  %v2690_v52 = vld [vmem:[%s2912_s22 + $0x180] sm:$0xff]  ;;  %v5766_v22 = vld [vmem:[#allocation22_spill] sm:$0xff]  ;;  %v2692_v43 = vld [vmem:[%s2912_s22 + $0x188] sm:$0xff] }
 0x1fc   : > { %v2400_v34 = vmul.f32 %v5076_v21, %v1685_v7  ;;  %v969_v24 = vadd.f32 %v2690_v52, %v5761_v30  ;;  %v1223_v7 = vadd.f32 %v2691_v4, %v1095_v55  ;;  %v1476_v26 = vadd.f32 %v5762_v8, %v1348_v32  ;;  %v5763_v11 = vld [vmem:[#allocation47_spill] sm:$0xff]  ;;  %v5771_v30 = vld [vmem:[#allocation130_spill] sm:$0xff] }
 0x1fd   : > { %v1987_v23 = vadd.f32 %v5757_v6, %v1922_v45  ;;  %v1658_v12 = vpop.permute.xlu2 %1657  ;;  %v5764_v45 = vld [vmem:[#allocation3_spill] sm:$0xff]  ;;  %v5768_v6 = vld [vmem:[#allocation114_spill] sm:$0xff] }
 0x1fe   : > { %v2416_v18 = vadd.f32 %v2400_v34, %v2353_v5  ;;  %v1681_v33 = vadd.f32 %v1658_v12, %v5759_v61  ;;  %v1779_v2 = vpop.permute.xlu0 %1778  ;;  %v5099_v0 = vpop.permute.xlu1 %1617  ;;  %v5765_v59 = vmax.f32 %v5763_v11, %v5764_v45  ;;  %v5767_v27 = vld [vmem:[#allocation43_spill] sm:$0xff]  ;;  %v1097_v61 = vadd.f32 %v2692_v43, %v969_v24  ;;  %v2695_v24 = vld [vmem:[%s2912_s22 + $0x1f0] sm:$0xff] }
 0x1ff   : > { %v2052_v28 = vadd.f32 %v5760_v31, %v1987_v23  ;;  %v1808_v29 = vmul.f32 %v1779_v2, %v1600_v41  ;;  %v5113_v34 = vpop.f32.mrf.mxu1  ;;  %v2238_v53 = vadd.f32 %v5767_v27, %v2173_v37  ;;  %v5770_v55 = vld [vmem:[#allocation155_spill] sm:$0xff]  ;;  %v5124_v31 = vpop.f32.mrf.mxu2 }
 0x200   : > { %2432 = vst [vmem:[%s5092_s11 + $0x8] sm:$0xff] %v2416_v18  ;;  %v5111_v5 = vmax.f32 %v5765_v59, %v1681_v33  ;;  %v5769_v18 = vld [vmem:[#allocation128_spill] sm:$0xff]  ;;  %v1603_v32 = vadd.f32 %v1491_v58, %v5770_v55  ;;  %v5773_v59 = vld [vmem:[#allocation133_spill] sm:$0xff] }
 0x201   : > { %v1866_v41 = vadd.f32 %v5766_v22, %v1808_v29  ;;  %v2117_v23 = vadd.f32 %v5768_v6, %v2052_v28  ;;  %v2693_v33 = vld [vmem:[%s2912_s22 + $0x108] sm:$0xff]  ;;  %v2694_v29 = vld [vmem:[%s2912_s22 + $0x40] sm:$0xff]  ;;  %v5134_v43 = vpop.f32.mrf.mxu3 }
 0x202   : > { %v1351_v2 = vadd.f32 %v2693_v33, %v1223_v7  ;;  %v1588_v52 = vadd.f32 %v2694_v29, %v1476_v26  ;;  %v5772_v28 = vld [vmem:[#allocation63_spill] sm:$0xff]  ;;  %v2696_v7 = vld [vmem:[%s2912_s22 + $0x190] sm:$0xff]  ;;  %v5774_v33 = vld [vmem:[#allocation42_spill] sm:$0xff] }
 0x203   : > { %v1931_v12 = vadd.f32 %v5769_v18, %v1866_v41  ;;  %v2303_v11 = vadd.f32 %v5772_v28, %v2238_v53  ;;  %v2182_v45 = vadd.f32 %v4907_v50, %v2117_v23  ;;  %v1225_v6 = vadd.f32 %v2696_v7, %v1097_v61  ;;  %v2697_v18 = vld [vmem:[%s2912_s22 + $0x110] sm:$0xff]  ;;  %v5775_v50 = vld [vmem:[#allocation90_spill] sm:$0xff]  ;;  %v5782_v7 = vld [vmem:[#allocation23_spill] sm:$0xff] }
 0x204   : > { %v1479_v26 = vadd.f32 %v2697_v18, %v1351_v2  ;;  %v5776_v23 = vmax.f32 %v4873_v10, %v5775_v50  ;;  %v5779_v61 = vld [vmem:[#allocation134_spill] sm:$0xff] }
 0x205   : > { %v1996_v4 = vadd.f32 %v5771_v30, %v1931_v12  ;;  %v2700_v50 = vld [vmem:[%s2912_s22 + $0x118] sm:$0xff] }
 0x206   : > { %v1794_v37 = vpop.permute.xlu0 %1793  ;;  %v1630_v8 = vpop.permute.xlu1 %1629 }
 0x207   : > { %v2061_v58 = vadd.f32 %v5773_v59, %v1996_v4  ;;  %v1811_v22 = vmul.f32 %v1794_v37, %v1603_v32  ;;  %v1674_v41 = vadd.f32 %v2695_v24, %v1630_v8  ;;  %v1719_v27 = vpop.permute.xlu2 %1718  ;;  %v5777_v32 = vld [vmem:[#allocation5_spill] sm:$0xff]  ;;  %v5778_v4 = vld [vmem:[#allocation24_spill] sm:$0xff]  ;;  %v5142_v8 = vpop.f32.mrf.mxu1 }
 0x208   : > { %v1796_v12 = vmul.f32 %v1719_v27, %v1588_v52  ;;  %v2368_v30 = vadd.f32 %v5777_v32, %v2303_v11  ;;  %v5780_v59 = vld [vmem:[#allocation148_spill] sm:$0xff]  ;;  %v5781_v52 = vld [vmem:[#allocation10_spill] sm:$0xff]  ;;  %v5783_v11 = vld [vmem:[#allocation45_spill] sm:$0xff] }
 0x209   : > { %v1875_v53 = vadd.f32 %v5774_v33, %v1811_v22  ;;  %v1690_v29 = vmax.f32 %v5776_v23, %v1674_v41  ;;  %v2126_v28 = vadd.f32 %v5779_v61, %v2061_v58  ;;  %v2247_v27 = vadd.f32 %v5781_v52, %v2182_v45  ;;  %v2698_v22 = vld [vmem:[%s2912_s22 + $0x260] sm:$0xff]  ;;  %v2699_v41 = vld [vmem:[%s2912_s22 + $0x198] sm:$0xff]  ;;  %v5784_v23 = vld [vmem:[#allocation149_spill] sm:$0xff]  ;;  %v5157_v45 = vpop.f32.mrf.mxu2 }
 0x20a   : > { %v1830_v37 = vadd.f32 %v5778_v4, %v1796_v12  ;;  %v1100_v10 = vadd.f32 %v2698_v22, %v5782_v7  ;;  %v1353_v18 = vadd.f32 %v2699_v41, %v1225_v6  ;;  %v5152_v12 = vpop.f32.mrf.mxu0  ;;  %v1591_v58 = vadd.f32 %v2700_v50, %v1479_v26  ;;  %v5785_v32 = vld [vmem:[#allocation46_spill] sm:$0xff]  ;;  %v2701_v6 = vld [vmem:[%s2912_s22 + $0x2c8] sm:$0xff]  ;;  %v5786_v7 = vld [vmem:[#allocation151_spill] sm:$0xff] }
 0x20b   : > { %v1940_v2 = vadd.f32 %v5780_v59, %v1875_v53  ;;  %v2405_v24 = vmul.f32 %v5076_v21, %v1690_v29  ;;  %v2191_v59 = vadd.f32 %v5054_v36, %v2126_v28  ;;  %v2702_v26 = vld [vmem:[%s2912_s22 + $0x268] sm:$0xff] }
 0x20c   : > { %v1895_v33 = vadd.f32 %v5783_v11, %v1830_v37  ;;  %v2312_v37 = vadd.f32 %v4937_v57, %v2247_v27  ;;  %v5787_v11 = vld [vmem:[#allocation49_spill] sm:$0xff]  ;;  %v5792_v57 = vld [vmem:[#allocation44_spill] sm:$0xff] }
 0x20d   : > { %v2421_v53 = vadd.f32 %v2405_v24, %v2368_v30  ;;  %v2005_v29 = vadd.f32 %v5784_v23, %v1940_v2  ;;  %v1228_v30 = vadd.f32 %v2702_v26, %v1100_v10  ;;  %v2703_v24 = vld [vmem:[%s2912_s22 + $0x1a0] sm:$0xff]  ;;  %v5794_v26 = vld [vmem:[#allocation153_spill] sm:$0xff] }
 0x20e   : > { %v1960_v4 = vadd.f32 %v5785_v32, %v1895_v33  ;;  %v1642_v61 = vpop.permute.xlu1 %1641  ;;  %v1481_v2 = vadd.f32 %v2703_v24, %v1353_v18  ;;  %v5788_v32 = vld [vmem:[#allocation81_spill] sm:$0xff]  ;;  %v2377_v10 = vadd.f32 %v4969_v48, %v2312_v37 }
 0x20f   : > { %2437 = vst [vmem:[%s5092_s11 + $0x30] sm:$0xff] %v2421_v53  ;;  %v1677_v52 = vadd.f32 %v2701_v6, %v1642_v61  ;;  %v1734_v22 = vpop.permute.xlu2 %1733  ;;  %v2070_v41 = vadd.f32 %v5786_v7, %v2005_v29  ;;  %v5790_v36 = vmax.f32 %v5788_v32, %v5789_v42  ;;  %v5791_v53 = vld [vmem:[#allocation50_spill] sm:$0xff]  ;;  %v5171_v6 = vpop.f32.mrf.mxu3  ;;  %v2256_v29 = vadd.f32 %v5079_v56, %v2191_v59  ;;  %v5793_v7 = vld [vmem:[#allocation152_spill] sm:$0xff]  ;;  %v5797_v59 = vld [vmem:[#allocation69_spill] sm:$0xff] }
 0x210   : > { %v2025_v33 = vadd.f32 %v5787_v11, %v1960_v4  ;;  %v1799_v23 = vmul.f32 %v1734_v22, %v1591_v58  ;;  %v2704_v58 = vld [vmem:[%s2912_s22 + $0x270] sm:$0xff]  ;;  %v2199_v11 = vpop.f32.mrf.mxu1 }
 0x211   : > { %v1693_v28 = vmax.f32 %v5790_v36, %v1677_v52  ;;  %v2135_v4 = vadd.f32 %v5793_v7, %v2070_v41  ;;  %v1356_v22 = vadd.f32 %v2704_v58, %v1228_v30  ;;  %v5795_v52 = vld [vmem:[#allocation67_spill] sm:$0xff]  ;;  %v5796_v36 = vld [vmem:[#allocation154_spill] sm:$0xff]  ;;  %v2321_v41 = vadd.f32 %v5095_v46, %v2256_v29  ;;  %v5798_v7 = vld [vmem:[#allocation156_spill] sm:$0xff]  ;;  %v2264_v58 = vpop.f32.mrf.mxu2 }
 0x212   : > { %v2090_v61 = vadd.f32 %v5791_v53, %v2025_v33  ;;  %v1839_v27 = vadd.f32 %v5792_v57, %v1799_v23  ;;  %v2705_v33 = vld [vmem:[%s2912_s22 + $0x1a8] sm:$0xff]  ;;  %v5184_v37 = vpop.f32.mrf.mxu0  ;;  %v2706_v57 = vld [vmem:[%s2912_s22 + $0x278] sm:$0xff]  ;;  %v1671_v29 = vadd.f32 %v2700_v50, %v5099_v0 }
 0x213   : > { %v2408_v18 = vmul.f32 %v5076_v21, %v1693_v28  ;;  %v1593_v32 = vadd.f32 %v2705_v33, %v1481_v2  ;;  %v2200_v30 = vadd.f32 %v2199_v11, %v2135_v4  ;;  %v5803_v11 = vld [vmem:[#allocation28_spill] sm:$0xff] }
 0x214   : > { %v2155_v42 = vadd.f32 %v5794_v26, %v2090_v61  ;;  %v1904_v24 = vadd.f32 %v5795_v52, %v1839_v27  ;;  %v1484_v27 = vadd.f32 %v2706_v57, %v1356_v22 }
 0x215   : > { %v2424_v23 = vadd.f32 %v2408_v18, %v2377_v10  ;;  %v5799_v10 = vld [vmem:[#allocation70_spill] sm:$0xff] }
 0x216   : > { %v2220_v56 = vadd.f32 %v5796_v36, %v2155_v42  ;;  %v1969_v48 = vadd.f32 %v5797_v59, %v1904_v24  ;;  %v1654_v28 = vpop.permute.xlu1 %1653  ;;  %v5800_v42 = vld [vmem:[#allocation25_spill] sm:$0xff]  ;;  %v5802_v24 = vld [vmem:[#allocation71_spill] sm:$0xff]  ;;  %v2265_v59 = vadd.f32 %v2264_v58, %v2200_v30  ;;  %v5811_v30 = vld [vmem:[#allocation80_spill] sm:$0xff] }
 0x217   : > { %2440 = vst [vmem:[%s5092_s11 + $0x48] sm:$0xff] %v2424_v23  ;;  %v1680_v53 = vadd.f32 %v1654_v28, %v5754_v25  ;;  %v1744_v61 = vpop.permute.xlu2 %1743  ;;  %v2399_v52 = vmul.f32 %v5076_v21, %v5800_v42  ;;  %v5801_v25 = vld [vmem:[#allocation157_spill] sm:$0xff]  ;;  %v2707_v23 = vld [vmem:[%s2912_s22 + $0xc0] sm:$0xff]  ;;  %v2329_v50 = vpop.f32.mrf.mxu3 }
 0x218   : > { %v2285_v2 = vadd.f32 %v5798_v7, %v2220_v56  ;;  %v2034_v18 = vadd.f32 %v5799_v10, %v1969_v48  ;;  %v1801_v26 = vmul.f32 %v1744_v61, %v1593_v32  ;;  %v5804_v36 = vld [vmem:[#allocation79_spill] sm:$0xff]  ;;  %v2386_v56 = vadd.f32 %v5116_v47, %v2321_v41  ;;  %v5806_v48 = vld [vmem:[#allocation77_spill] sm:$0xff]  ;;  %v5807_v7 = vld [vmem:[#allocation146_spill] sm:$0xff] }
 0x219   : > { %v1696_v46 = vmax.f32 %v1584_v44, %v1680_v53  ;;  %v1350_v32 = vadd.f32 %v2707_v23, %v5804_v36  ;;  %v5805_v44 = vld [vmem:[#allocation163_spill] sm:$0xff]  ;;  %v5810_v47 = vld [vmem:[#allocation164_spill] sm:$0xff]  ;;  %v2709_v42 = vld [vmem:[%s2912_s22 + $0x350] sm:$0xff] }
 0x21a   : > { %v2350_v4 = vadd.f32 %v5801_v25, %v2285_v2  ;;  %v2099_v22 = vadd.f32 %v5802_v24, %v2034_v18  ;;  %v1845_v33 = vadd.f32 %v5803_v11, %v1801_v26  ;;  %v2708_v53 = vld [vmem:[%s2912_s22 + $0x280] sm:$0xff]  ;;  %v5808_v2 = vld [vmem:[#allocation52_spill] sm:$0xff]  ;;  %v2330_v25 = vadd.f32 %v2329_v50, %v2265_v59  ;;  %v5813_v24 = vld [vmem:[#allocation165_spill] sm:$0xff] }
 0x21b   : > { %v2411_v35 = vmul.f32 %v5076_v21, %v1696_v46  ;;  %v1596_v61 = vadd.f32 %v2708_v53, %v1484_v27  ;;  %v5809_v10 = vmax.f32 %v5807_v7, %v5808_v2  ;;  %v5814_v11 = vld [vmem:[#allocation83_spill] sm:$0xff]  ;;  %v2710_v36 = vld [vmem:[%s2912_s22 + $0xc8] sm:$0xff]  ;;  %v5819_v2 = vld [vmem:[#allocation6_spill] sm:$0xff] }
 0x21c   : > { %v2415_v9 = vadd.f32 %v2399_v52, %v2350_v4  ;;  %v2164_v0 = vadd.f32 %v5805_v44, %v2099_v22  ;;  %v1910_v28 = vadd.f32 %v5806_v48, %v1845_v33  ;;  %v5812_v52 = vld [vmem:[#allocation139_spill] sm:$0xff]  ;;  %v5816_v44 = vld [vmem:[#allocation166_spill] sm:$0xff]  ;;  %v5818_v48 = vld [vmem:[#allocation20_spill] sm:$0xff] }
 0x21d   : > { %v2427_v57 = vadd.f32 %v2411_v35, %v2386_v56  ;;  %v1687_v18 = vmax.f32 %v5809_v10, %v1671_v29  ;;  %v1487_v46 = vadd.f32 %v2709_v42, %v5812_v52  ;;  %v2394_v29 = vpop.f32.mrf.mxu0  ;;  %v1478_v56 = vadd.f32 %v2710_v36, %v1350_v32  ;;  %v5823_v42 = vld [vmem:[#allocation171_spill] sm:$0xff] }
 0x21e   : > { %2431 = vst [vmem:[%s5092_s11] sm:$0xff] %v2415_v9  ;;  %v2229_v41 = vadd.f32 %v5810_v47, %v2164_v0  ;;  %v1975_v58 = vadd.f32 %v5811_v30, %v1910_v28  ;;  %v1666_v26 = vpop.permute.xlu1 %1665  ;;  %v5815_v35 = vmax.f32 %v5013_v15, %v5007_v40  ;;  %v2395_v53 = vadd.f32 %v2394_v29, %v2330_v25  ;;  %v5820_v15 = vld [vmem:[#allocation101_spill] sm:$0xff]  ;;  %v5821_v47 = vld [vmem:[#allocation78_spill] sm:$0xff]  ;;  %v5822_v30 = vld [vmem:[#allocation84_spill] sm:$0xff] }
 0x21f   : > { %2443 = vst [vmem:[%s5092_s11 + $0x60] sm:$0xff] %v2427_v57  ;;  %v1683_v27 = vadd.f32 %v1666_v26, %v5770_v55  ;;  %v1759_v4 = vpop.permute.xlu2 %1758  ;;  %v2402_v59 = vmul.f32 %v5076_v21, %v1687_v18  ;;  %v5817_v55 = vld [vmem:[#allocation85_spill] sm:$0xff]  ;;  %v2711_v57 = vld [vmem:[%s2912_s22 + $0x358] sm:$0xff]  ;;  %v1590_v18 = vadd.f32 %v5821_v47, %v1478_v56  ;;  %v5824_v25 = vld [vmem:[#allocation103_spill] sm:$0xff] }
 0x220   : > { %v2294_v22 = vadd.f32 %v5813_v24, %v2229_v41  ;;  %v2040_v33 = vadd.f32 %v5814_v11, %v1975_v58  ;;  %v1804_v23 = vmul.f32 %v1759_v4, %v1596_v61  ;;  %v1599_v32 = vadd.f32 %v2711_v57, %v1487_v46  ;;  %v2712_v41 = vld [vmem:[%s2912_s22 + $0x150] sm:$0xff]  ;;  %v2713_v4 = vld [vmem:[%s2912_s22 + $0x428] sm:$0xff]  ;;  %v5832_v57 = vld [vmem:[#allocation38_spill] sm:$0xff] }
 0x221   : > { %v1699_v9 = vmax.f32 %v5815_v35, %v1683_v27  ;;  %v1352_v58 = vadd.f32 %v2712_v41, %v5822_v30  ;;  %v5825_v24 = vld [vmem:[#allocation145_spill] sm:$0xff] }
 0x222   : > { %v2359_v0 = vadd.f32 %v5816_v44, %v2294_v22  ;;  %v2105_v50 = vadd.f32 %v5817_v55, %v2040_v33  ;;  %v1854_v28 = vadd.f32 %v5818_v48, %v1804_v23  ;;  %v1490_v46 = vadd.f32 %v2713_v4, %v5825_v24  ;;  %v5826_v33 = vld [vmem:[#allocation26_spill] sm:$0xff]  ;;  %v5827_v23 = vld [vmem:[#allocation105_spill] sm:$0xff]  ;;  %v5829_v55 = vld [vmem:[#allocation56_spill] sm:$0xff] }
 0x223   : > { %v2414_v61 = vmul.f32 %v5076_v21, %v1699_v9  ;;  %v2714_v9 = vld [vmem:[%s2912_s22 + $0x158] sm:$0xff]  ;;  %v5830_v48 = vld [vmem:[#allocation107_spill] sm:$0xff]  ;;  %v5835_v30 = vld [vmem:[#allocation121_spill] sm:$0xff] }
 0x224   : > { %v2418_v7 = vadd.f32 %v2402_v59, %v2359_v0  ;;  %v2170_v40 = vadd.f32 %v5819_v2, %v2105_v50  ;;  %v1919_v10 = vadd.f32 %v5820_v15, %v1854_v28  ;;  %v1480_v59 = vadd.f32 %v2714_v9, %v1352_v58  ;;  %v5828_v44 = vld [vmem:[#allocation82_spill] sm:$0xff]  ;;  %v2715_v2 = vld [vmem:[%s2912_s22 + $0x228] sm:$0xff]  ;;  %v5838_v4 = vld [vmem:[#allocation123_spill] sm:$0xff] }
 0x225   : > { %v2430_v26 = vadd.f32 %v2414_v61, %v2395_v53  ;;  %v2404_v0 = vmul.f32 %v5076_v21, %v5828_v44  ;;  %v5831_v53 = vld [vmem:[#allocation40_spill] sm:$0xff]  ;;  %v5842_v44 = vld [vmem:[#allocation65_spill] sm:$0xff] }
 0x226   : > { %2434 = vst [vmem:[%s5092_s11 + $0x18] sm:$0xff] %v2418_v7  ;;  %v2235_v52 = vadd.f32 %v5823_v42, %v2170_v40  ;;  %v1984_v27 = vadd.f32 %v5824_v25, %v1919_v10  ;;  %v5833_v40 = vld [vmem:[#allocation94_spill] sm:$0xff]  ;;  %v5837_v25 = vld [vmem:[#allocation68_spill] sm:$0xff] }
 0x227   : > { %2446 = vst [vmem:[%s5092_s11 + $0x78] sm:$0xff] %v2430_v26  ;;  %v1774_v22 = vpop.permute.xlu2 %1773  ;;  %v1729_v11 = vpop.permute.xlu1 %1728  ;;  %v1355_v15 = vadd.f32 %v2715_v2, %v5833_v40  ;;  %v5836_v26 = vld [vmem:[#allocation60_spill] sm:$0xff]  ;;  %v2718_v40 = vld [vmem:[%s2912_s22 + $0x300] sm:$0xff] }
 0x228   : > { %v2300_v29 = vadd.f32 %v5826_v33, %v2235_v52  ;;  %v2049_v36 = vadd.f32 %v5827_v23, %v1984_v27  ;;  %v1807_v56 = vmul.f32 %v1774_v22, %v1599_v32  ;;  %v1798_v35 = vmul.f32 %v1729_v11, %v1590_v18  ;;  %v2716_v32 = vld [vmem:[%s2912_s22 + $0x430] sm:$0xff]  ;;  %v5834_v18 = vld [vmem:[#allocation7_spill] sm:$0xff]  ;;  %v5839_v22 = vld [vmem:[#allocation62_spill] sm:$0xff] }
 0x229   : > { %v1602_v10 = vadd.f32 %v2716_v32, %v1490_v46  ;;  %v1592_v52 = vadd.f32 %v4977_v60, %v1480_v59  ;;  %v2717_v46 = vld [vmem:[%s2912_s22 + $0x230] sm:$0xff]  ;;  %v2407_v59 = vmul.f32 %v5076_v21, %v4954_v3 }
 0x22a   : > { %v2365_v50 = vadd.f32 %v5829_v55, %v2300_v29  ;;  %v2114_v28 = vadd.f32 %v5830_v48, %v2049_v36  ;;  %v1863_v61 = vadd.f32 %v5831_v53, %v1807_v56  ;;  %v1836_v7 = vadd.f32 %v5832_v57, %v1798_v35  ;;  %v5840_v36 = vld [vmem:[#allocation31_spill] sm:$0xff]  ;;  %v5841_v35 = vld [vmem:[#allocation126_spill] sm:$0xff] }
 0x22b   : > { %v1483_v23 = vadd.f32 %v2717_v46, %v1355_v15  ;;  %v5847_v15 = vld [vmem:[#allocation99_spill] sm:$0xff] }
 0x22c   : > { %v2420_v47 = vadd.f32 %v2404_v0, %v2365_v50  ;;  %v2179_v41 = vadd.f32 %v5834_v18, %v2114_v28  ;;  %v1928_v58 = vadd.f32 %v5835_v30, %v1863_v61  ;;  %v1901_v42 = vadd.f32 %v5836_v26, %v1836_v7  ;;  %v5843_v50 = vld [vmem:[#allocation17_spill] sm:$0xff]  ;;  %v5844_v28 = vld [vmem:[#allocation127_spill] sm:$0xff]  ;;  %v5845_v61 = vld [vmem:[#allocation66_spill] sm:$0xff] }
 0x22d   : > { %v5846_v7 = vld [vmem:[#allocation36_spill] sm:$0xff]  ;;  %v1358_v32 = vadd.f32 %v2718_v40, %v5847_v15  ;;  %v5861_v40 = vld [vmem:[#allocation106_spill] sm:$0xff] }
 0x22e   : > { %2436 = vst [vmem:[%s5092_s11 + $0x28] sm:$0xff] %v2420_v47  ;;  %v2244_v27 = vadd.f32 %v5837_v25, %v2179_v41  ;;  %v1993_v24 = vadd.f32 %v5838_v4, %v1928_v58  ;;  %v1966_v11 = vadd.f32 %v5839_v22, %v1901_v42  ;;  %v5848_v47 = vld [vmem:[#allocation19_spill] sm:$0xff]  ;;  %v5850_v42 = vld [vmem:[#allocation141_spill] sm:$0xff]  ;;  %v5851_v25 = vld [vmem:[#allocation72_spill] sm:$0xff] }
 0x22f   : > { %v1789_v33 = vpop.permute.xlu2 %1788  ;;  %v1739_v29 = vpop.permute.xlu1 %1738  ;;  %v5849_v58 = vld [vmem:[#allocation159_spill] sm:$0xff] }
 0x230   : > { %v2309_v56 = vadd.f32 %v5840_v36, %v2244_v27  ;;  %v2058_v9 = vadd.f32 %v5841_v35, %v1993_v24  ;;  %v2031_v0 = vadd.f32 %v5842_v44, %v1966_v11  ;;  %v1810_v60 = vmul.f32 %v1789_v33, %v1602_v10  ;;  %v2719_v10 = vld [vmem:[%s2912_s22 + $0x238] sm:$0xff]  ;;  %v5852_v24 = vld [vmem:[#allocation160_spill] sm:$0xff]  ;;  %v5855_v35 = vld [vmem:[#allocation161_spill] sm:$0xff] }
 0x231   : > { %v1800_v55 = vmul.f32 %v1739_v29, %v1592_v52  ;;  %v1595_v41 = vadd.f32 %v2719_v10, %v1483_v23  ;;  %v5853_v11 = vld [vmem:[#allocation142_spill] sm:$0xff]  ;;  %v2720_v36 = vld [vmem:[%s2912_s22 + $0x308] sm:$0xff] }
 0x232   : > { %v2374_v48 = vadd.f32 %v5843_v50, %v2309_v56  ;;  %v2123_v53 = vadd.f32 %v5844_v28, %v2058_v9  ;;  %v2096_v57 = vadd.f32 %v5845_v61, %v2031_v0  ;;  %v1872_v2 = vadd.f32 %v5846_v7, %v1810_v60  ;;  %v5854_v29 = vld [vmem:[#allocation74_spill] sm:$0xff]  ;;  %v5856_v44 = vld [vmem:[#allocation64_spill] sm:$0xff]  ;;  %v5859_v61 = vld [vmem:[#allocation147_spill] sm:$0xff] }
 0x233   : > { %v1842_v18 = vadd.f32 %v5848_v47, %v1800_v55  ;;  %v5857_v55 = vld [vmem:[#allocation76_spill] sm:$0xff]  ;;  %v5858_v28 = vld [vmem:[#allocation162_spill] sm:$0xff]  ;;  %v2722_v47 = vld [vmem:[%s2912_s22 + $0x310] sm:$0xff] }
 0x234   : > { %v2423_v30 = vadd.f32 %v2407_v59, %v2374_v48  ;;  %v2188_v3 = vadd.f32 %v5010_v14, %v2123_v53  ;;  %v2161_v26 = vadd.f32 %v5849_v58, %v2096_v57  ;;  %v1937_v52 = vadd.f32 %v5850_v42, %v1872_v2  ;;  %v5860_v57 = vld [vmem:[#allocation39_spill] sm:$0xff]  ;;  %v2721_v2 = vld [vmem:[%s2912_s22 + $0x3d8] sm:$0xff]  ;;  %v5865_v42 = vld [vmem:[#allocation96_spill] sm:$0xff] }
 0x235   : > { %v1907_v27 = vadd.f32 %v5851_v25, %v1842_v18  ;;  %v1486_v14 = vadd.f32 %v2720_v36, %v1358_v32  ;;  %v2410_v59 = vmul.f32 %v5076_v21, %v5002_v1  ;;  %v1361_v15 = vadd.f32 %v2721_v2, %v5861_v40  ;;  %v5862_v32 = vld [vmem:[#allocation9_spill] sm:$0xff]  ;;  %v5866_v25 = vld [vmem:[#allocation168_spill] sm:$0xff]  ;;  %v5877_v2 = vld [vmem:[#allocation119_spill] sm:$0xff] }
 0x236   : > { %2439 = vst [vmem:[%s5092_s11 + $0x40] sm:$0xff] %v2423_v30  ;;  %v2253_v4 = vadd.f32 %v5035_v16, %v2188_v3  ;;  %v2226_v22 = vadd.f32 %v5852_v24, %v2161_v26  ;;  %v2002_v33 = vadd.f32 %v5853_v11, %v1937_v52  ;;  %v2401_v16 = vmul.f32 %v5076_v21, %v4947_v51  ;;  %v5864_v3 = vld [vmem:[#allocation167_spill] sm:$0xff] }
 0x237   : > { %v1972_v46 = vadd.f32 %v5854_v29, %v1907_v27  ;;  %v1754_v23 = vpop.permute.xlu1 %1753  ;;  %v1598_v1 = vadd.f32 %v2722_v47, %v1486_v14  ;;  %v5869_v14 = vld [vmem:[#allocation100_spill] sm:$0xff] }
 0x238   : > { %v2318_v56 = vadd.f32 %v5047_v54, %v2253_v4  ;;  %v2291_v9 = vadd.f32 %v5855_v35, %v2226_v22  ;;  %v2067_v0 = vadd.f32 %v5856_v44, %v2002_v33  ;;  %v1803_v60 = vmul.f32 %v1754_v23, %v1595_v41  ;;  %v5867_v22 = vld [vmem:[#allocation98_spill] sm:$0xff]  ;;  %v5870_v35 = vld [vmem:[#allocation35_spill] sm:$0xff] }
 0x239   : > { %v2037_v50 = vadd.f32 %v5857_v55, %v1972_v46  ;;  %v5868_v46 = vld [vmem:[#allocation73_spill] sm:$0xff]  ;;  %v5871_v44 = vld [vmem:[#allocation170_spill] sm:$0xff]  ;;  %v5873_v55 = vld [vmem:[#allocation115_spill] sm:$0xff] }
 0x23a   : > { %v2383_v48 = vadd.f32 %v5069_v17, %v2318_v56  ;;  %v2356_v53 = vadd.f32 %v5858_v28, %v2291_v9  ;;  %v2132_v54 = vadd.f32 %v5859_v61, %v2067_v0  ;;  %v1851_v7 = vadd.f32 %v5860_v57, %v1803_v60  ;;  %v5863_v17 = vld [vmem:[#allocation93_spill] sm:$0xff]  ;;  %v5875_v61 = vld [vmem:[#allocation116_spill] sm:$0xff] }
 0x23b   : > { %v2102_v51 = vadd.f32 %v5862_v32, %v2037_v50  ;;  %v2406_v32 = vmul.f32 %v5076_v21, %v5033_v49 }
 0x23c   : > { %v2426_v18 = vadd.f32 %v2410_v59, %v2383_v48  ;;  %v2417_v10 = vadd.f32 %v2401_v16, %v2356_v53  ;;  %v2197_v41 = vadd.f32 %v5142_v8, %v2132_v54  ;;  %v1916_v30 = vadd.f32 %v5863_v17, %v1851_v7  ;;  %v2723_v8 = vld [vmem:[%s2912_s22 + $0x3e0] sm:$0xff]  ;;  %v5872_v16 = vld [vmem:[#allocation53_spill] sm:$0xff]  ;;  %v2724_v48 = vld [vmem:[%s2912_s22 + $0x3e8] sm:$0xff] }
 0x23d   : > { %v2167_v58 = vadd.f32 %v5864_v3, %v2102_v51  ;;  %v1489_v29 = vadd.f32 %v2723_v8, %v1361_v15  ;;  %v5876_v7 = vld [vmem:[#allocation15_spill] sm:$0xff] }
 0x23e   : > { %2442 = vst [vmem:[%s5092_s11 + $0x58] sm:$0xff] %v2426_v18  ;;  %v2262_v26 = vadd.f32 %v5157_v45, %v2197_v41  ;;  %v1981_v52 = vadd.f32 %v5865_v42, %v1916_v30  ;;  %v2413_v45 = vmul.f32 %v5076_v21, %v5041_v38  ;;  %v5874_v38 = vld [vmem:[#allocation55_spill] sm:$0xff]  ;;  %v5882_v42 = vld [vmem:[#allocation137_spill] sm:$0xff] }
 0x23f   : > { %2433 = vst [vmem:[%s5092_s11 + $0x10] sm:$0xff] %v2417_v10  ;;  %v2232_v27 = vadd.f32 %v5866_v25, %v2167_v58  ;;  %v1769_v4 = vpop.permute.xlu1 %1768  ;;  %v1601_v28 = vadd.f32 %v2724_v48, %v1489_v29  ;;  %v5878_v51 = vld [vmem:[#allocation75_spill] sm:$0xff]  ;;  %v5880_v10 = vld [vmem:[#allocation30_spill] sm:$0xff] }
 0x240   : > { %v2327_v24 = vadd.f32 %v5171_v6, %v2262_v26  ;;  %v2046_v11 = vadd.f32 %v5867_v22, %v1981_v52  ;;  %v1806_v33 = vmul.f32 %v1769_v4, %v1598_v1  ;;  %v2403_v6 = vmul.f32 %v5076_v21, %v4994_v39  ;;  %v5879_v1 = vld [vmem:[#allocation120_spill] sm:$0xff]  ;;  %v5881_v3 = vld [vmem:[#allocation135_spill] sm:$0xff]  ;;  %v5883_v25 = vld [vmem:[#allocation138_spill] sm:$0xff] }
 0x241   : > { %v2297_v23 = vadd.f32 %v5868_v46, %v2232_v27  ;;  %v2409_v4 = vmul.f32 %v5076_v21, %v5067_v19  ;;  %v5884_v22 = vld [vmem:[#allocation140_spill] sm:$0xff] }
 0x242   : > { %v2392_v36 = vadd.f32 %v5184_v37, %v2327_v24  ;;  %v2111_v56 = vadd.f32 %v5869_v14, %v2046_v11  ;;  %v1860_v9 = vadd.f32 %v5870_v35, %v1806_v33 }
 0x243   : > { %v2362_v0 = vadd.f32 %v5871_v44, %v2297_v23 }
 0x244   : > { %v2429_v60 = vadd.f32 %v2413_v45, %v2392_v36  ;;  %v2176_v59 = vadd.f32 %v5872_v16, %v2111_v56  ;;  %v1925_v50 = vadd.f32 %v5873_v55, %v1860_v9 }
 0x245   : > { %v2419_v53 = vadd.f32 %v2403_v6, %v2362_v0 }
 0x246   : > { %2445 = vst [vmem:[%s5092_s11 + $0x70] sm:$0xff] %v2429_v60  ;;  %v2241_v37 = vadd.f32 %v5874_v38, %v2176_v59  ;;  %v1990_v54 = vadd.f32 %v5875_v61, %v1925_v50 }
 0x247   : > { %2435 = vst [vmem:[%s5092_s11 + $0x20] sm:$0xff] %v2419_v53  ;;  %v1784_v57 = vpop.permute.xlu1 %1783 }
 0x248   : > { %v2306_v39 = vadd.f32 %v5876_v7, %v2241_v37  ;;  %v2055_v40 = vadd.f32 %v5877_v2, %v1990_v54  ;;  %v1809_v15 = vmul.f32 %v1784_v57, %v1601_v28 }
 0x24a   : > { %v2371_v47 = vadd.f32 %v5878_v51, %v2306_v39  ;;  %v2120_v18 = vadd.f32 %v5879_v1, %v2055_v40  ;;  %v1869_v41 = vadd.f32 %v5880_v10, %v1809_v15 }
 0x24c   : > { %v2422_v17 = vadd.f32 %v2406_v32, %v2371_v47  ;;  %v2185_v30 = vadd.f32 %v4956_v13, %v2120_v18  ;;  %v1934_v58 = vadd.f32 %v5881_v3, %v1869_v41 }
 0x24e   : > { %2438 = vst [vmem:[%s5092_s11 + $0x38] sm:$0xff] %v2422_v17  ;;  %v2250_v26 = vadd.f32 %v4980_v20, %v2185_v30  ;;  %v1999_v52 = vadd.f32 %v5882_v42, %v1934_v58 }
 0x250   : > { %v2315_v49 = vadd.f32 %v4999_v63, %v2250_v26  ;;  %v2064_v27 = vadd.f32 %v5883_v25, %v1999_v52  ;;  %v2412_v63 = vmul.f32 %v5076_v21, %v5111_v5 }
 0x252   : > { %v2380_v24 = vadd.f32 %v5021_v62, %v2315_v49  ;;  %v2129_v11 = vadd.f32 %v5884_v22, %v2064_v27 }
 0x254   : > { %v2425_v13 = vadd.f32 %v2409_v4, %v2380_v24  ;;  %v2194_v33 = vadd.f32 %v5113_v34, %v2129_v11 }
 0x256   : > { %2441 = vst [vmem:[%s5092_s11 + $0x50] sm:$0xff] %v2425_v13  ;;  %v2259_v8 = vadd.f32 %v5124_v31, %v2194_v33 }
 0x258   : > { %v2324_v20 = vadd.f32 %v5134_v43, %v2259_v8 }
 0x25a   : > { %v2389_v29 = vadd.f32 %v5152_v12, %v2324_v20 }
 0x25c   : > { %v2428_v46 = vadd.f32 %v2412_v63, %v2389_v29 }
 0x25e   : > { %2444 = vst [vmem:[%s5092_s11 + $0x68] sm:$0xff] %v2428_v46 }
 0x25f PF: > { %s16_s20 = sadd.s32 1, %s2731_s20  }
 0x260   : > { %p13_p4 = scmp.ge.s32.totalorder %s16_s20, 6  }
 0x262   :  { %15 = sbr.rel (!%p13_p4) target bundleno = 2 (0x2), region = 76 }

</bundles_post_ra>
